<compile_context>
chip_gen: v5e
topology: v5e:2x2
jax: 0.10.0
libtpu: 0.0.40
codegen_flags: <defaults>
</compile_context>

<pallas_src>
import jax
import jax.numpy as jnp
from jax import lax
from jax.experimental import pallas as pl
from jax.experimental.pallas import tpu as pltpu


def _round_up(a, b):
    return (a + b - 1) // b * b


def value_net_kernel(x_ref, eps_h_ref, eps_o_ref,
                     w1m_ref, w1s_ref, w2m_ref, w2s_ref, w3m_ref, w3s_ref,
                     bh_ref, w4_ref, bo_ref, out_ref):
    """Fused 4-layer Bayesian MLP (BBB local-reparameterization) forward.

    Per grid step it sees one batch tile of x / eps / out; all weights are the
    same pinned block every step (VMEM-resident, single HBM fetch).
    """
    hidden = bh_ref.shape[1]
    out_dim = bo_ref.shape[1]

    def sample(act_mu, act_var, eps):
        return act_mu + jnp.sqrt(act_var) * eps

    def layer(h, wm_ref, ws_ref, bm, bs2, eps):
        # bf16 operands into the MXU, f32 accumulation, f32 elementwise tail.
        hb = h.astype(jnp.bfloat16)
        h2b = (h * h).astype(jnp.bfloat16)
        act_mu = (jnp.dot(hb, wm_ref[...], preferred_element_type=jnp.float32)
                  + bm)
        act_var = (jnp.dot(h2b, ws_ref[...], preferred_element_type=jnp.float32)
                   + bs2 + 1e-16)
        return sample(act_mu, act_var, eps)

    x = x_ref[...]                                   # (bb, d_in) f32

    # Hidden layers 1-3 (ReLU), eps slices are lane-aligned static views.
    h = jnp.maximum(
        layer(x, w1m_ref, w1s_ref, bh_ref[0:1, :], bh_ref[1:2, :],
              eps_h_ref[:, 0:hidden]), 0.0)
    h = jnp.maximum(
        layer(h, w2m_ref, w2s_ref, bh_ref[2:3, :], bh_ref[3:4, :],
              eps_h_ref[:, hidden:2 * hidden]), 0.0)
    h = jnp.maximum(
        layer(h, w3m_ref, w3s_ref, bh_ref[4:5, :], bh_ref[5:6, :],
              eps_h_ref[:, 2 * hidden:3 * hidden]), 0.0)

    # Output layer (no activation).  W4 is stored row-major (out_dim, hidden)
    # f32 (tiny); for out_dim==1 use a VPU multiply + XLU row reduction instead
    # of a 1-column (or zero-padded 128-column) MXU pass.
    w4m = w4_ref[0:out_dim, :]                       # (out_dim, hidden)
    w4s2 = w4_ref[out_dim:2 * out_dim, :]
    if out_dim == 1:
        act_mu = jnp.sum(h * w4m, axis=-1, keepdims=True) + bo_ref[0:1, :]
        act_var = (jnp.sum((h * h) * w4s2, axis=-1, keepdims=True)
                   + bo_ref[1:2, :] + 1e-16)
    else:
        dn = (((1,), (1,)), ((), ()))                # contract hidden dims
        act_mu = (lax.dot_general(h, w4m, dn,
                                  preferred_element_type=jnp.float32)
                  + bo_ref[0:1, :])
        act_var = (lax.dot_general(h * h, w4s2, dn,
                                   preferred_element_type=jnp.float32)
                   + bo_ref[1:2, :] + 1e-16)

    out_ref[...] = sample(act_mu, act_var, eps_o_ref[...])


def make_params(key, input1_dim, input2_dim, output_dim, hidden=512):
    """Deterministic f32 'training-format' params mimicking BBB_LRT_Linear.

    Weights are stored (in_features, out_features) = torch weight transposed,
    biases as (1, out_features); sigma = softplus(rho) with rho = -5.0.
    """
    dims = [(input1_dim + input2_dim, hidden),
            (hidden, hidden),
            (hidden, hidden),
            (hidden, output_dim)]
    params = []
    for i, (din, dout) in enumerate(dims):
        k_w, k_b = jax.random.split(jax.random.fold_in(key, i))
        w_mu = jax.random.normal(k_w, (din, dout), jnp.float32) * 0.1
        b_mu = jax.random.normal(k_b, (1, dout), jnp.float32) * 0.1
        sigma = jnp.log1p(jnp.exp(-5.0))  # softplus(rho), rho = -5
        w_sigma = jnp.full((din, dout), sigma, jnp.float32)
        b_sigma = jnp.full((1, dout), sigma, jnp.float32)
        params.append((w_mu, w_sigma, b_mu, b_sigma))
    return params


def prepare_kernel_params(params):
    """One-time parameter preprocessing (amortized across forward calls).

    - folds sigma squaring into the stored tensors (sigma^2),
    - casts the large hidden-layer weight matrices to bf16,
    - packs the 6 hidden-layer biases into one (6, hidden) f32 array,
    - stores the narrow output layer unpadded as (2*out_dim, hidden) f32
      (mu rows then sigma^2 rows) plus a (2, out_dim) f32 bias pack.
    """
    (w1m, w1s, b1m, b1s), (w2m, w2s, b2m, b2s), \
        (w3m, w3s, b3m, b3s), (w4m, w4s, b4m, b4s) = params

    def w_prep(wm, ws):
        return wm.astype(jnp.bfloat16), (ws * ws).astype(jnp.bfloat16)

    w1m_, w1s_ = w_prep(w1m, w1s)
    w2m_, w2s_ = w_prep(w2m, w2s)
    w3m_, w3s_ = w_prep(w3m, w3s)

    bh = jnp.concatenate(
        [b1m, b1s * b1s, b2m, b2s * b2s, b3m, b3s * b3s], axis=0
    ).astype(jnp.float32)                                  # (6, hidden)

    w4 = jnp.concatenate([w4m.T, (w4s * w4s).T], axis=0).astype(jnp.float32)
    bo = jnp.concatenate([b4m, b4s * b4s], axis=0).astype(jnp.float32)

    out_dim = w4m.shape[1]
    flat = (w1m_, w1s_, w2m_, w2s_, w3m_, w3s_, bh, w4, bo)
    return flat, out_dim


def value_net_forward(input1, input2, kernel_params, out_dim, key,
                      block_b_max=256):
    """Invoke the fused Pallas kernel; returns (batch, out_dim) f32."""
    (w1m, w1s, w2m, w2s, w3m, w3s, bh, w4, bo) = kernel_params
    hidden = bh.shape[1]

    # torch.cat([input1, input2], 1) — tiny XLA concat in the wrapper.
    x = jnp.concatenate([input1.astype(jnp.float32),
                         input2.astype(jnp.float32)], axis=1)
    batch, d_in = x.shape

    # Pad batch to a multiple of the sublane (8) / batch tile.
    padded_b = _round_up(batch, 8)
    block_b = min(padded_b, block_b_max)
    padded_b = _round_up(padded_b, block_b)
    if padded_b != batch:
        x = jnp.pad(x, ((0, padded_b - batch), (0, 0)))

    # eps drawn once in the wrapper (data-independent, off the in-kernel
    # critical path); packed lane-aligned for layers 1-3 plus the output draw.
    k1, k2 = jax.random.split(key)
    eps_h = jax.random.normal(k1, (padded_b, 3 * hidden), jnp.float32)
    eps_o = jax.random.normal(k2, (padded_b, out_dim), jnp.float32)

    grid = (padded_b // block_b,)
    pin = lambda ndim: (lambda i: (0,) * ndim)   # weights resident across steps

    out = pl.pallas_call(
        value_net_kernel,
        out_shape=jax.ShapeDtypeStruct((padded_b, out_dim), jnp.float32),
        grid=grid,
        in_specs=[
            pl.BlockSpec((block_b, d_in), lambda i: (i, 0)),        # x
            pl.BlockSpec((block_b, 3 * hidden), lambda i: (i, 0)),  # eps_h
            pl.BlockSpec((block_b, out_dim), lambda i: (i, 0)),     # eps_o
            pl.BlockSpec((d_in, hidden), pin(2)),                   # w1 mu
            pl.BlockSpec((d_in, hidden), pin(2)),                   # w1 sigma^2
            pl.BlockSpec((hidden, hidden), pin(2)),                 # w2 mu
            pl.BlockSpec((hidden, hidden), pin(2)),                 # w2 sigma^2
            pl.BlockSpec((hidden, hidden), pin(2)),                 # w3 mu
            pl.BlockSpec((hidden, hidden), pin(2)),                 # w3 sigma^2
            pl.BlockSpec((6, hidden), pin(2)),                      # biases 1-3
            pl.BlockSpec((2 * out_dim, hidden), pin(2)),            # w4 mu|s^2
            pl.BlockSpec((2, out_dim), pin(2)),                     # b4 mu|s^2
        ],
        out_specs=pl.BlockSpec((block_b, out_dim), lambda i: (i, 0)),
        # "arbitrary": with <~256 rows per core the duplicated weight DMA of a
        # megacore "parallel" split on v7x would outweigh the compute win.
        compiler_params=pltpu.CompilerParams(
            dimension_semantics=("arbitrary",),
            vmem_limit_bytes=16 << 20),
    )(x, eps_h, eps_o, w1m, w1s, w2m, w2s, w3m, w3s, bh, w4, bo)

    return out[:batch, :out_dim]


if __name__ == "__main__":
    key = jax.random.PRNGKey(0)
    k_params, k_in1, k_in2, k_eps = jax.random.split(key, 4)

    batch = 8
    input1_dim = 16
    input2_dim = 8
    output_dim = 1

    params = make_params(k_params, input1_dim, input2_dim, output_dim)
    kparams, out_dim = prepare_kernel_params(params)

    input1 = jax.random.normal(k_in1, (batch, input1_dim), jnp.float32)
    input2 = jax.random.normal(k_in2, (batch, input2_dim), jnp.float32)

    action_prob = value_net_forward(input1, input2, kparams, out_dim, k_eps)
    jax.block_until_ready(action_prob)
    assert action_prob.shape == (batch, output_dim)
    assert bool(jnp.all(jnp.isfinite(action_prob)))
    print("KERNEL_OK")
</pallas_src>

<mosaic_0001>
module attributes {stable_mosaic.version = 11 : i64} {
  func.func @value_net_kernel(%arg0: i32, %arg1: memref<8x24xf32, #tpu.memory_space<vmem>>, %arg2: memref<8x1536xf32, #tpu.memory_space<vmem>>, %arg3: memref<8x1xf32, #tpu.memory_space<vmem>>, %arg4: memref<24x512xbf16, #tpu.memory_space<vmem>>, %arg5: memref<24x512xbf16, #tpu.memory_space<vmem>>, %arg6: memref<512x512xbf16, #tpu.memory_space<vmem>>, %arg7: memref<512x512xbf16, #tpu.memory_space<vmem>>, %arg8: memref<512x512xbf16, #tpu.memory_space<vmem>>, %arg9: memref<512x512xbf16, #tpu.memory_space<vmem>>, %arg10: memref<6x512xf32, #tpu.memory_space<vmem>>, %arg11: memref<2x512xf32, #tpu.memory_space<vmem>>, %arg12: memref<2x1xf32, #tpu.memory_space<vmem>>, %arg13: memref<8x1xf32, #tpu.memory_space<vmem>>) attributes {dimension_semantics = [#tpu.dimension_semantics<arbitrary>], iteration_bounds = array<i64: 1>, scalar_prefetch = 0 : i64, scratch_operands = 0 : i64, tpu.core_type = #tpu.core_type<tc>, window_params = [{transform_indices = @transform_0, window_bounds = array<i64: 8, 24>}, {transform_indices = @transform_1, window_bounds = array<i64: 8, 1536>}, {transform_indices = @transform_2, window_bounds = array<i64: 8, 1>}, {pipeline_mode = #tpu.pipeline_mode<synchronous>, transform_indices = @transform_3, window_bounds = array<i64: 24, 512>}, {pipeline_mode = #tpu.pipeline_mode<synchronous>, transform_indices = @transform_4, window_bounds = array<i64: 24, 512>}, {pipeline_mode = #tpu.pipeline_mode<synchronous>, transform_indices = @transform_5, window_bounds = array<i64: 512, 512>}, {pipeline_mode = #tpu.pipeline_mode<synchronous>, transform_indices = @transform_6, window_bounds = array<i64: 512, 512>}, {pipeline_mode = #tpu.pipeline_mode<synchronous>, transform_indices = @transform_7, window_bounds = array<i64: 512, 512>}, {pipeline_mode = #tpu.pipeline_mode<synchronous>, transform_indices = @transform_8, window_bounds = array<i64: 512, 512>}, {pipeline_mode = #tpu.pipeline_mode<synchronous>, transform_indices = @transform_9, window_bounds = array<i64: 6, 512>}, {pipeline_mode = #tpu.pipeline_mode<synchronous>, transform_indices = @transform_10, window_bounds = array<i64: 2, 512>}, {pipeline_mode = #tpu.pipeline_mode<synchronous>, transform_indices = @transform_11, window_bounds = array<i64: 2, 1>}, {transform_indices = @transform_12, window_bounds = array<i64: 8, 1>}]} {
    %c0 = arith.constant 0 : index
    %c0_0 = arith.constant 0 : index
    %0 = vector.load %arg1[%c0, %c0_0] : memref<8x24xf32, #tpu.memory_space<vmem>>, vector<8x24xf32>
    %c0_1 = arith.constant 0 : index
    %c0_2 = arith.constant 0 : index
    %1 = vector.load %arg10[%c0_1, %c0_2] : memref<6x512xf32, #tpu.memory_space<vmem>>, vector<1x512xf32>
    %c1 = arith.constant 1 : index
    %c0_3 = arith.constant 0 : index
    %2 = vector.load %arg10[%c1, %c0_3] : memref<6x512xf32, #tpu.memory_space<vmem>>, vector<1x512xf32>
    %c0_4 = arith.constant 0 : index
    %c0_5 = arith.constant 0 : index
    %3 = vector.load %arg2[%c0_4, %c0_5] : memref<8x1536xf32, #tpu.memory_space<vmem>>, vector<8x512xf32>
    %4 = arith.truncf %0 : vector<8x24xf32> to vector<8x24xbf16>
    %5 = arith.mulf %0, %0 : vector<8x24xf32>
    %6 = arith.truncf %5 : vector<8x24xf32> to vector<8x24xbf16>
    %c0_6 = arith.constant 0 : index
    %c0_7 = arith.constant 0 : index
    %7 = vector.load %arg4[%c0_6, %c0_7] : memref<24x512xbf16, #tpu.memory_space<vmem>>, vector<24x512xbf16>
    %cst = arith.constant dense<0.000000e+00> : vector<8x512xf32>
    %8 = tpu.matmul %4, %7, %cst {dimension_numbers = #tpu.dot_dimension_numbers<[1], [0], [0], [1], [0, 0, 1, 1], [], []>} : vector<8x24xbf16>, vector<24x512xbf16>, vector<8x512xf32> -> vector<8x512xf32>
    %9 = vector.broadcast %1 : vector<1x512xf32> to vector<8x512xf32>
    %10 = arith.addf %8, %9 : vector<8x512xf32>
    %c0_8 = arith.constant 0 : index
    %c0_9 = arith.constant 0 : index
    %11 = vector.load %arg5[%c0_8, %c0_9] : memref<24x512xbf16, #tpu.memory_space<vmem>>, vector<24x512xbf16>
    %cst_10 = arith.constant dense<0.000000e+00> : vector<8x512xf32>
    %12 = tpu.matmul %6, %11, %cst_10 {dimension_numbers = #tpu.dot_dimension_numbers<[1], [0], [0], [1], [0, 0, 1, 1], [], []>} : vector<8x24xbf16>, vector<24x512xbf16>, vector<8x512xf32> -> vector<8x512xf32>
    %13 = vector.broadcast %2 : vector<1x512xf32> to vector<8x512xf32>
    %14 = arith.addf %12, %13 : vector<8x512xf32>
    %cst_11 = arith.constant 1.000000e-16 : f32
    %15 = vector.broadcast %cst_11 : f32 to vector<8x512xf32>
    %16 = arith.addf %14, %15 : vector<8x512xf32>
    %17 = math.sqrt %16 : vector<8x512xf32>
    %18 = arith.mulf %17, %3 : vector<8x512xf32>
    %19 = arith.addf %10, %18 : vector<8x512xf32>
    %cst_12 = arith.constant 0.000000e+00 : f32
    %20 = vector.broadcast %cst_12 : f32 to vector<8x512xf32>
    %21 = arith.maximumf %19, %20 : vector<8x512xf32>
    %c2 = arith.constant 2 : index
    %c0_13 = arith.constant 0 : index
    %22 = vector.load %arg10[%c2, %c0_13] : memref<6x512xf32, #tpu.memory_space<vmem>>, vector<1x512xf32>
    %c3 = arith.constant 3 : index
    %c0_14 = arith.constant 0 : index
    %23 = vector.load %arg10[%c3, %c0_14] : memref<6x512xf32, #tpu.memory_space<vmem>>, vector<1x512xf32>
    %c0_15 = arith.constant 0 : index
    %c512 = arith.constant 512 : index
    %24 = vector.load %arg2[%c0_15, %c512] : memref<8x1536xf32, #tpu.memory_space<vmem>>, vector<8x512xf32>
    %25 = arith.truncf %21 : vector<8x512xf32> to vector<8x512xbf16>
    %26 = arith.mulf %21, %21 : vector<8x512xf32>
    %27 = arith.truncf %26 : vector<8x512xf32> to vector<8x512xbf16>
    %c0_16 = arith.constant 0 : index
    %c0_17 = arith.constant 0 : index
    %28 = vector.load %arg6[%c0_16, %c0_17] : memref<512x512xbf16, #tpu.memory_space<vmem>>, vector<512x512xbf16>
    %cst_18 = arith.constant dense<0.000000e+00> : vector<8x512xf32>
    %29 = tpu.matmul %25, %28, %cst_18 {dimension_numbers = #tpu.dot_dimension_numbers<[1], [0], [0], [1], [0, 0, 1, 1], [], []>} : vector<8x512xbf16>, vector<512x512xbf16>, vector<8x512xf32> -> vector<8x512xf32>
    %30 = vector.broadcast %22 : vector<1x512xf32> to vector<8x512xf32>
    %31 = arith.addf %29, %30 : vector<8x512xf32>
    %c0_19 = arith.constant 0 : index
    %c0_20 = arith.constant 0 : index
    %32 = vector.load %arg7[%c0_19, %c0_20] : memref<512x512xbf16, #tpu.memory_space<vmem>>, vector<512x512xbf16>
    %cst_21 = arith.constant dense<0.000000e+00> : vector<8x512xf32>
    %33 = tpu.matmul %27, %32, %cst_21 {dimension_numbers = #tpu.dot_dimension_numbers<[1], [0], [0], [1], [0, 0, 1, 1], [], []>} : vector<8x512xbf16>, vector<512x512xbf16>, vector<8x512xf32> -> vector<8x512xf32>
    %34 = vector.broadcast %23 : vector<1x512xf32> to vector<8x512xf32>
    %35 = arith.addf %33, %34 : vector<8x512xf32>
    %cst_22 = arith.constant 1.000000e-16 : f32
    %36 = vector.broadcast %cst_22 : f32 to vector<8x512xf32>
    %37 = arith.addf %35, %36 : vector<8x512xf32>
    %38 = math.sqrt %37 : vector<8x512xf32>
    %39 = arith.mulf %38, %24 : vector<8x512xf32>
    %40 = arith.addf %31, %39 : vector<8x512xf32>
    %cst_23 = arith.constant 0.000000e+00 : f32
    %41 = vector.broadcast %cst_23 : f32 to vector<8x512xf32>
    %42 = arith.maximumf %40, %41 : vector<8x512xf32>
    %c4 = arith.constant 4 : index
    %c0_24 = arith.constant 0 : index
    %43 = vector.load %arg10[%c4, %c0_24] : memref<6x512xf32, #tpu.memory_space<vmem>>, vector<1x512xf32>
    %c5 = arith.constant 5 : index
    %c0_25 = arith.constant 0 : index
    %44 = vector.load %arg10[%c5, %c0_25] : memref<6x512xf32, #tpu.memory_space<vmem>>, vector<1x512xf32>
    %c0_26 = arith.constant 0 : index
    %c1024 = arith.constant 1024 : index
    %45 = vector.load %arg2[%c0_26, %c1024] : memref<8x1536xf32, #tpu.memory_space<vmem>>, vector<8x512xf32>
    %46 = arith.truncf %42 : vector<8x512xf32> to vector<8x512xbf16>
    %47 = arith.mulf %42, %42 : vector<8x512xf32>
    %48 = arith.truncf %47 : vector<8x512xf32> to vector<8x512xbf16>
    %c0_27 = arith.constant 0 : index
    %c0_28 = arith.constant 0 : index
    %49 = vector.load %arg8[%c0_27, %c0_28] : memref<512x512xbf16, #tpu.memory_space<vmem>>, vector<512x512xbf16>
    %cst_29 = arith.constant dense<0.000000e+00> : vector<8x512xf32>
    %50 = tpu.matmul %46, %49, %cst_29 {dimension_numbers = #tpu.dot_dimension_numbers<[1], [0], [0], [1], [0, 0, 1, 1], [], []>} : vector<8x512xbf16>, vector<512x512xbf16>, vector<8x512xf32> -> vector<8x512xf32>
    %51 = vector.broadcast %43 : vector<1x512xf32> to vector<8x512xf32>
    %52 = arith.addf %50, %51 : vector<8x512xf32>
    %c0_30 = arith.constant 0 : index
    %c0_31 = arith.constant 0 : index
    %53 = vector.load %arg9[%c0_30, %c0_31] : memref<512x512xbf16, #tpu.memory_space<vmem>>, vector<512x512xbf16>
    %cst_32 = arith.constant dense<0.000000e+00> : vector<8x512xf32>
    %54 = tpu.matmul %48, %53, %cst_32 {dimension_numbers = #tpu.dot_dimension_numbers<[1], [0], [0], [1], [0, 0, 1, 1], [], []>} : vector<8x512xbf16>, vector<512x512xbf16>, vector<8x512xf32> -> vector<8x512xf32>
    %55 = vector.broadcast %44 : vector<1x512xf32> to vector<8x512xf32>
    %56 = arith.addf %54, %55 : vector<8x512xf32>
    %cst_33 = arith.constant 1.000000e-16 : f32
    %57 = vector.broadcast %cst_33 : f32 to vector<8x512xf32>
    %58 = arith.addf %56, %57 : vector<8x512xf32>
    %59 = math.sqrt %58 : vector<8x512xf32>
    %60 = arith.mulf %59, %45 : vector<8x512xf32>
    %61 = arith.addf %52, %60 : vector<8x512xf32>
    %cst_34 = arith.constant 0.000000e+00 : f32
    %62 = vector.broadcast %cst_34 : f32 to vector<8x512xf32>
    %63 = arith.maximumf %61, %62 : vector<8x512xf32>
    %c0_35 = arith.constant 0 : index
    %c0_36 = arith.constant 0 : index
    %64 = vector.load %arg11[%c0_35, %c0_36] : memref<2x512xf32, #tpu.memory_space<vmem>>, vector<1x512xf32>
    %c1_37 = arith.constant 1 : index
    %c0_38 = arith.constant 0 : index
    %65 = vector.load %arg11[%c1_37, %c0_38] : memref<2x512xf32, #tpu.memory_space<vmem>>, vector<1x512xf32>
    %66 = vector.broadcast %64 : vector<1x512xf32> to vector<8x512xf32>
    %67 = arith.mulf %63, %66 : vector<8x512xf32>
    %cst_39 = arith.constant dense<0.000000e+00> : vector<8xf32>
    %68 = vector.multi_reduction <add>, %67, %cst_39 [1] : vector<8x512xf32> to vector<8xf32>
    %69 = vector.shape_cast %68 : vector<8xf32> to vector<8x1xf32>
    %c0_40 = arith.constant 0 : index
    %c0_41 = arith.constant 0 : index
    %70 = vector.load %arg12[%c0_40, %c0_41] : memref<2x1xf32, #tpu.memory_space<vmem>>, vector<1x1xf32>
    %71 = vector.broadcast %70 : vector<1x1xf32> to vector<8x1xf32>
    %72 = arith.addf %69, %71 : vector<8x1xf32>
    %73 = arith.mulf %63, %63 : vector<8x512xf32>
    %74 = vector.broadcast %65 : vector<1x512xf32> to vector<8x512xf32>
    %75 = arith.mulf %73, %74 : vector<8x512xf32>
    %cst_42 = arith.constant dense<0.000000e+00> : vector<8xf32>
    %76 = vector.multi_reduction <add>, %75, %cst_42 [1] : vector<8x512xf32> to vector<8xf32>
    %77 = vector.shape_cast %76 : vector<8xf32> to vector<8x1xf32>
    %c1_43 = arith.constant 1 : index
    %c0_44 = arith.constant 0 : index
    %78 = vector.load %arg12[%c1_43, %c0_44] : memref<2x1xf32, #tpu.memory_space<vmem>>, vector<1x1xf32>
    %79 = vector.broadcast %78 : vector<1x1xf32> to vector<8x1xf32>
    %80 = arith.addf %77, %79 : vector<8x1xf32>
    %cst_45 = arith.constant 1.000000e-16 : f32
    %81 = vector.broadcast %cst_45 : f32 to vector<8x1xf32>
    %82 = arith.addf %80, %81 : vector<8x1xf32>
    %c0_46 = arith.constant 0 : index
    %c0_47 = arith.constant 0 : index
    %83 = vector.load %arg3[%c0_46, %c0_47] : memref<8x1xf32, #tpu.memory_space<vmem>>, vector<8x1xf32>
    %84 = math.sqrt %82 : vector<8x1xf32>
    %85 = arith.mulf %84, %83 : vector<8x1xf32>
    %86 = arith.addf %72, %85 : vector<8x1xf32>
    %c0_48 = arith.constant 0 : index
    %c0_49 = arith.constant 0 : index
    %87 = vector.load %arg13[%c0_48, %c0_49] : memref<8x1xf32, #tpu.memory_space<vmem>>, vector<8x1xf32>
    tpu.vector_store %arg13[%c0_48, %c0_49], %86 {strides = array<i32>} : memref<8x1xf32, #tpu.memory_space<vmem>>, vector<8x1xf32>,
    return
  }
  func.func @transform_0(%arg0: i32) -> (i32, i32) {
    %c0_i32 = arith.constant 0 : i32
    %c0_i32_0 = arith.constant 0 : i32
    return %arg0, %c0_i32 : i32, i32
  }
  func.func @transform_1(%arg0: i32) -> (i32, i32) {
    %c0_i32 = arith.constant 0 : i32
    %c0_i32_0 = arith.constant 0 : i32
    return %arg0, %c0_i32 : i32, i32
  }
  func.func @transform_2(%arg0: i32) -> (i32, i32) {
    %c0_i32 = arith.constant 0 : i32
    %c0_i32_0 = arith.constant 0 : i32
    return %arg0, %c0_i32 : i32, i32
  }
  func.func @transform_3(%arg0: i32) -> (i32, i32) {
    %c0_i32 = arith.constant 0 : i32
    %c0_i32_0 = arith.constant 0 : i32
    %c0_i32_1 = arith.constant 0 : i32
    return %c0_i32, %c0_i32_0 : i32, i32
  }
  func.func @transform_4(%arg0: i32) -> (i32, i32) {
    %c0_i32 = arith.constant 0 : i32
    %c0_i32_0 = arith.constant 0 : i32
    %c0_i32_1 = arith.constant 0 : i32
    return %c0_i32, %c0_i32_0 : i32, i32
  }
  func.func @transform_5(%arg0: i32) -> (i32, i32) {
    %c0_i32 = arith.constant 0 : i32
    %c0_i32_0 = arith.constant 0 : i32
    %c0_i32_1 = arith.constant 0 : i32
    return %c0_i32, %c0_i32_0 : i32, i32
  }
  func.func @transform_6(%arg0: i32) -> (i32, i32) {
    %c0_i32 = arith.constant 0 : i32
    %c0_i32_0 = arith.constant 0 : i32
    %c0_i32_1 = arith.constant 0 : i32
    return %c0_i32, %c0_i32_0 : i32, i32
  }
  func.func @transform_7(%arg0: i32) -> (i32, i32) {
    %c0_i32 = arith.constant 0 : i32
    %c0_i32_0 = arith.constant 0 : i32
    %c0_i32_1 = arith.constant 0 : i32
    return %c0_i32, %c0_i32_0 : i32, i32
  }
  func.func @transform_8(%arg0: i32) -> (i32, i32) {
    %c0_i32 = arith.constant 0 : i32
    %c0_i32_0 = arith.constant 0 : i32
    %c0_i32_1 = arith.constant 0 : i32
    return %c0_i32, %c0_i32_0 : i32, i32
  }
  func.func @transform_9(%arg0: i32) -> (i32, i32) {
    %c0_i32 = arith.constant 0 : i32
    %c0_i32_0 = arith.constant 0 : i32
    %c0_i32_1 = arith.constant 0 : i32
    return %c0_i32, %c0_i32_0 : i32, i32
  }
  func.func @transform_10(%arg0: i32) -> (i32, i32) {
    %c0_i32 = arith.constant 0 : i32
    %c0_i32_0 = arith.constant 0 : i32
    %c0_i32_1 = arith.constant 0 : i32
    return %c0_i32, %c0_i32_0 : i32, i32
  }
  func.func @transform_11(%arg0: i32) -> (i32, i32) {
    %c0_i32 = arith.constant 0 : i32
    %c0_i32_0 = arith.constant 0 : i32
    %c0_i32_1 = arith.constant 0 : i32
    return %c0_i32, %c0_i32_0 : i32, i32
  }
  func.func @transform_12(%arg0: i32) -> (i32, i32) {
    %c0_i32 = arith.constant 0 : i32
    %c0_i32_0 = arith.constant 0 : i32
    return %arg0, %c0_i32 : i32, i32
  }
}

</mosaic_0001>

<bundles_post_ra>
// kernel: tpu_custom_call.1
= control target key start
LH: loop header
LB: loop body
LE: loop exit
PB: predicated region body
PF: predicated region fallthrough
CT: control target
= control target key end

     0   :  { %17 = vsyncpa [#allocation3], 0  ;;  %s7999_s0 = inlined_call_operand.vmem [shape: f32[8,24], index: 0, kind: input, shape index: {}]   ;;  %s8000_s1 = inlined_call_operand.hbm [shape: f32[8,1536], index: 1, kind: input, shape index: {}]   ;;  %s8001_s2 = inlined_call_operand.vmem [shape: f32[8,1], index: 2, kind: input, shape index: {}]   ;;  %s8002_s3 = inlined_call_operand.hbm [shape: bf16[24,512], index: 3, kind: input, shape index: {}]   ;;  %s8003_s4 = inlined_call_operand.hbm [shape: bf16[24,512], index: 4, kind: input, shape index: {}]   ;;  %s8004_s5 = inlined_call_operand.hbm [shape: bf16[512,512], index: 5, kind: input, shape index: {}]   ;;  %s8005_s6 = inlined_call_operand.hbm [shape: bf16[512,512], index: 6, kind: input, shape index: {}]   ;;  %s8006_s7 = inlined_call_operand.hbm [shape: bf16[512,512], index: 7, kind: input, shape index: {}]   ;;  %s8007_s8 = inlined_call_operand.hbm [shape: bf16[512,512], index: 8, kind: input, shape index: {}]   ;;  %s8008_s9 = inlined_call_operand.hbm [shape: f32[6,512], index: 9, kind: input, shape index: {}]   ;;  %s8009_s10 = inlined_call_operand.vmem [shape: f32[2,512], index: 10, kind: input, shape index: {}]   ;;  %s8010_s11 = inlined_call_operand.vmem [shape: f32[2,1], index: 11, kind: input, shape index: {}]   ;;  %s8011_s12 = inlined_call_operand.vmem [shape: f32[8,1], index: 12, kind: output, shape index: {}]  }
   0x1   :  { %18 = vsyncpa [#allocation5], 0 }
   0x2   :  { %19 = vsyncpa [#allocation8], 0 }
   0x3   :  { %20 = vsyncpa [#allocation11], 0  ;;  %s41_s23 = sshll.u32 %s8002_s3, 4  ;;  %s42_s23 = int_to_ptr.hbm [resolvable:$true] %s41_s23 }
   0x4   :  { %21 = vsyncpa [#allocation14], 0  ;;  %s7497_s24 = smov [#allocation4]   ;;  %s67_s28 = sshll.u32 %s8004_s5, 4  ;;  %s68_s28 = int_to_ptr.hbm [resolvable:$true] %s67_s28 }
   0x5   :  { %s43_s25 = sshll.u32 %s7497_s24, 4  ;;  %s7498_s29 = smov 256   ;;  %s44_s25 = int_to_ptr.vmem [resolvable:$true] %s43_s25 }
   0x6   :  { %s7499_s30 = smov 16   ;;  %s7500_s13 = smov [#allocation7]  }
   0x7   :  { %49 = dma.hbm_to_vmem [thread:$0]  %s42_s23, 768, %s44_s25, [#allocation5], %s7498_s29, %s7498_s29, %s7499_s30  }
   0x8   :  { %s69_s14 = sshll.u32 %s7500_s13, 4  ;;  %s93_s16 = sshll.u32 %s8006_s7, 4  ;;  %s70_s14 = int_to_ptr.vmem [resolvable:$true] %s69_s14  ;;  %s94_s16 = int_to_ptr.hbm [resolvable:$true] %s93_s16 }
   0x9   :  { %75 = dma.hbm_to_vmem [thread:$0]  %s68_s28, 16384, %s70_s14, [#allocation8], %s7498_s29, %s7498_s29, %s7499_s30  }
   0xa   :  { %s29_s18 = sshll.u32 %s8000_s1, 4  ;;  %s7501_s19 = smov [#allocation10]   ;;  %s30_s18 = int_to_ptr.hbm [resolvable:$true] %s29_s18 }
   0xb   :  { %s95_s20 = sshll.u32 %s7501_s19, 4  ;;  %s7502_s21 = smov [#allocation2]   ;;  %s96_s20 = int_to_ptr.vmem [resolvable:$true] %s95_s20 }
   0xc   :  { %101 = dma.hbm_to_vmem [thread:$0]  %s94_s16, 16384, %s96_s20, [#allocation11], %s7498_s29, %s7498_s29, %s7499_s30  }
   0xd   :  { %s31_s7 = sshll.u32 %s7502_s21, 4  ;;  %s54_s24 = sshll.u32 %s8003_s4, 4  ;;  %s32_s7 = int_to_ptr.vmem [resolvable:$true] %s31_s7  ;;  %s55_s24 = int_to_ptr.hbm [resolvable:$true] %s54_s24 }
   0xe   :  { %34 = dma.hbm_to_vmem [thread:$0]  %s30_s18, 1536, %s32_s7, [#allocation3]  }
   0xf   :  { %s80_s1 = sshll.u32 %s8005_s6, 4  ;;  %s7503_s27 = smov [#allocation6]   ;;  %s81_s1 = int_to_ptr.hbm [resolvable:$true] %s80_s1 }
  0x10   :  { %s56_s28 = sshll.u32 %s7503_s27, 4  ;;  %s7504_s13 = smov [#allocation9]   ;;  %s57_s28 = int_to_ptr.vmem [resolvable:$true] %s56_s28 }
  0x11   :  { %62 = dma.hbm_to_vmem [thread:$0]  %s55_s24, 768, %s57_s28, [#allocation5], %s7498_s29, %s7498_s29, %s7499_s30  }
  0x12   :  { %s82_s14 = sshll.u32 %s7504_s13, 4  ;;  %s106_s4 = sshll.u32 %s8007_s8, 4  ;;  %s83_s14 = int_to_ptr.vmem [resolvable:$true] %s82_s14  ;;  %s107_s4 = int_to_ptr.hbm [resolvable:$true] %s106_s4 }
  0x13   :  { %88 = dma.hbm_to_vmem [thread:$0]  %s81_s1, 16384, %s83_s14, [#allocation8], %s7498_s29, %s7498_s29, %s7499_s30  }
  0x14   :  { %s120_s5 = sshll.u32 %s8008_s9, 4  ;;  %s7505_s17 = smov [#allocation12]   ;;  %s121_s5 = int_to_ptr.hbm [resolvable:$true] %s120_s5 }
  0x15   :  { %s108_s18 = sshll.u32 %s7505_s17, 4  ;;  %s7506_s19 = smov [#allocation13]   ;;  %s109_s18 = int_to_ptr.vmem [resolvable:$true] %s108_s18 }
  0x16   :  { %114 = dma.hbm_to_vmem [thread:$0]  %s107_s4, 16384, %s109_s18, [#allocation11], %s7498_s29, %s7498_s29, %s7499_s30  }
  0x17   :  { %s122_s8 = sshll.u32 %s7506_s19, 4  ;;  %s123_s8 = int_to_ptr.vmem [resolvable:$true] %s122_s8 }
  0x18   :  { %125 = dma.hbm_to_vmem [thread:$0]  %s121_s5, 512, %s123_s8, [#allocation14]  }
  0x19   :  { %7487 = dma.done.wait [#allocation3], 1536  }
  0x1a   :  { %7488 = vsyncadd [#allocation3], 4294965760 }
  0x1b   :  { %7489 = dma.done.wait [#allocation5], 1536  }
  0x1c   :  { %7490 = vsyncadd [#allocation5], 4294965760 }
  0x1d   :  { %7491 = dma.done.wait [#allocation8], 32768  }
  0x1e   :  { %7492 = vsyncadd [#allocation8], 4294934528 }
  0x1f   :  { %7493 = dma.done.wait [#allocation11], 32768  }
  0x20   :  { %7494 = vsyncadd [#allocation11], 4294934528 }
  0x21   :  { %7495 = dma.done.wait [#allocation14], 512  }
  0x22   :  { %7496 = vsyncadd [#allocation14], 4294966784  ;;  %v178_v0 = vld [vmem:[#allocation4 + $0x20] sm:$0xff]  ;;  %v179_v1 = vld [vmem:[#allocation4 + $0x28] sm:$0xff]  ;;  %vm223_vm0 = vcmask 1043456   ;;  %vm219_vm1 = vcmask 195584  }
  0x23   :  { %v4650_v2 = vld [vmem:[#allocation4] sm:$0xf]  ;;  %v203_v3 = vunpack.c.l.b16 %v178_v0  ;;  %v204_v4 = vunpack.c.h.b16 %v178_v0  ;;  %v205_v5 = vunpack.c.l.b16 %v179_v1  ;;  %v206_v6 = vunpack.c.h.b16 %v179_v1  ;;  %v6739_v7 = vld [vmem:[#allocation4 + $0xc] sm:$0xf0]  ;;  %v6737_v8 = vld [vmem:[#allocation4 + $0x4] sm:$0xf] }
  0x24   :  { %v4652_v9 = vld [vmem:[#allocation4 + $0x10] sm:$0xf0]  ;;  %v4658_v14 = vld [vmem:[#allocation4 + $0x8] sm:$0xf]  ;;  %v6740_v15 = vld [vmem:[#allocation4 + $0x14] sm:$0xf0]  ;;  %v4651_v17 = vor.u32 %v6739_v7, %v4650_v2 }
  0x25   :  { %v211_v10 = vpack.c.b16 %v203_v3, %v203_v3  ;;  %v212_v11 = vpack.c.b16 %v204_v4, %v204_v4  ;;  %v213_v12 = vpack.c.b16 %v205_v5, %v205_v5  ;;  %v214_v13 = vpack.c.b16 %v206_v6, %v206_v6  ;;  %v292_v16 = vld [vmem:[#allocation6 + $0x20] sm:$0xff]  ;;  %v6738_v19 = vld [vmem:[#allocation4 + $0xc] sm:$0xf]  ;;  %v4660_v20 = vld [vmem:[#allocation4 + $0x18] sm:$0xf0] }
  0x26   :  { %v4655_v18 = vor.u32 %v6737_v8, %v4652_v9  ;;  %v317_v21 = vunpack.c.l.b16 %v292_v16  ;;  %v293_v22 = vld [vmem:[#allocation6 + $0x28] sm:$0xff]  ;;  %v7621_v27 = vld [vmem:[%s7999_s0] sm:$0xff]  ;;  %v318_v29 = vunpack.c.h.b16 %v292_v16  ;;  %v4659_v32 = vor.u32 %v6740_v15, %v4658_v14  ;;  %v4670_v34 = vld [vmem:[#allocation6] sm:$0xf] }
  0x27   :  { %v225_v23 = vsel %vm223_vm0, %v211_v10, 0  ;;  %v228_v24 = vsel %vm223_vm0, %v212_v11, 0  ;;  %v231_v25 = vsel %vm223_vm0, %v213_v12, 0  ;;  %v234_v26 = vsel %vm223_vm0, %v214_v13, 0  ;;  %v6743_v38 = vld [vmem:[#allocation6 + $0xc] sm:$0xf0] }
  0x28   :  { %242 = vmatpush.bf16.msra.mxu0 %v225_v23  ;;  %255 = vmatpush.bf16.msra.mxu1 %v228_v24  ;;  %v325_v28 = vpack.c.b16 %v317_v21, %v317_v21  ;;  %v319_v30 = vunpack.c.l.b16 %v293_v22  ;;  %v320_v31 = vunpack.c.h.b16 %v293_v22  ;;  %v4663_v33 = vor.u32 %v6738_v19, %v4660_v20  ;;  %v6741_v39 = vld [vmem:[#allocation6 + $0x4] sm:$0xf]  ;;  %v4672_v40 = vld [vmem:[#allocation6 + $0x10] sm:$0xf0]  ;;  %v4802_v43 = vld [vmem:[#allocation7 + $0xe0] sm:$0xf] }
  0x29   :  { %268 = vmatpush.bf16.msra.mxu2 %v231_v25  ;;  %281 = vmatpush.bf16.msra.mxu3 %v234_v26  ;;  %v326_v35 = vpack.c.b16 %v318_v29, %v318_v29  ;;  %v171_v41 = vpack.c.bf16 %v7621_v27, %v7621_v27  ;;  %v6775_v44 = vld [vmem:[#allocation7 + $0xec] sm:$0xf0]  ;;  %v4678_v46 = vld [vmem:[#allocation6 + $0x8] sm:$0xf]  ;;  %v6744_v47 = vld [vmem:[#allocation6 + $0x14] sm:$0xf0]  ;;  %v4671_v54 = vor.u32 %v6743_v38, %v4670_v34 }
  0x2a   :  { %v327_v36 = vpack.c.b16 %v319_v30, %v319_v30  ;;  %v328_v37 = vpack.c.b16 %v320_v31, %v320_v31  ;;  %v337_v42 = vsel %vm223_vm0, %v325_v28, 0  ;;  %v4930_v48 = vld [vmem:[#allocation7 + $0x1e0] sm:$0xf]  ;;  %v6807_v49 = vld [vmem:[#allocation7 + $0x1ec] sm:$0xf0]  ;;  %v4675_v55 = vor.u32 %v6741_v39, %v4672_v40 }
  0x2b   :  { %v340_v45 = vsel %vm223_vm0, %v326_v35, 0  ;;  %v6742_v52 = vld [vmem:[#allocation6 + $0xc] sm:$0xf]  ;;  %v4680_v53 = vld [vmem:[#allocation6 + $0x18] sm:$0xf0]  ;;  %v4803_v59 = vor.u32 %v6775_v44, %v4802_v43  ;;  %v4931_v60 = vor.u32 %v6807_v49, %v4930_v48  ;;  %v4679_v2 = vor.u32 %v6744_v47, %v4678_v46 }
  0x2c   :  { %243 = vmatpush.bf16.msra.mxu0 %v4651_v17  ;;  %256 = vmatpush.bf16.msra.mxu1 %v4655_v18  ;;  %v343_v50 = vsel %vm223_vm0, %v327_v36, 0  ;;  %v346_v51 = vsel %vm223_vm0, %v328_v37, 0  ;;  %v4786_v56 = vld [vmem:[#allocation7 + $0xc0] sm:$0xf]  ;;  %v6839_v58 = vld [vmem:[#allocation7 + $0x2ec] sm:$0xf0]  ;;  %v4683_v3 = vor.u32 %v6742_v52, %v4680_v53  ;;  %v172_v8 = vmul.f32 %v7621_v27, %v7621_v27 }
  0x2d   :  { %269 = vmatpush.bf16.msra.mxu2 %v4659_v32  ;;  %282 = vmatpush.bf16.msra.mxu3 %v4663_v33  ;;  %v5058_v57 = vld [vmem:[#allocation7 + $0x2e0] sm:$0xf]  ;;  %v6871_v62 = vld [vmem:[#allocation7 + $0x3ec] sm:$0xf0] }
  0x2e   :  { %v5186_v61 = vld [vmem:[#allocation7 + $0x3e0] sm:$0xf]  ;;  %v6771_v63 = vld [vmem:[#allocation7 + $0xcc] sm:$0xf0]  ;;  %v5059_v4 = vor.u32 %v6839_v58, %v5058_v57  ;;  %v173_v9 = vpack.c.bf16 %v172_v8, %v172_v8 }
  0x2f   :  { %4664 = vmatmul.msk.bf16.vlgmr.msra.gmra.mxu0 %vm219_vm1, %v171_v41  ;;  %4665 = vmatmul.msk.bf16.vlgmr.msra.gmra.mxu1 %vm219_vm1, %v171_v41  ;;  %v4914_v0 = vld [vmem:[#allocation7 + $0x1c0] sm:$0xf]  ;;  %v6803_v1 = vld [vmem:[#allocation7 + $0x1cc] sm:$0xf0]  ;;  %v5187_v5 = vor.u32 %v6871_v62, %v5186_v61  ;;  %v4787_v6 = vor.u32 %v6771_v63, %v4786_v56 }
  0x30   :  { %354 = vmatpush.bf16.msrb.mxu0 %v337_v42  ;;  %367 = vmatpush.bf16.msrb.mxu1 %v340_v45  ;;  %v4915_v7 = vor.u32 %v6803_v1, %v4914_v0  ;;  %v4770_v10 = vld [vmem:[#allocation7 + $0xa0] sm:$0xf]  ;;  %v6767_v11 = vld [vmem:[#allocation7 + $0xac] sm:$0xf0] }
  0x31   :  { %4666 = vmatmul.msk.bf16.vlgmr.msra.gmra.mxu2 %vm219_vm1, %v171_v41  ;;  %4667 = vmatmul.msk.bf16.vlgmr.msra.gmra.mxu3 %vm219_vm1, %v171_v41  ;;  %v4898_v12 = vld [vmem:[#allocation7 + $0x1a0] sm:$0xf]  ;;  %v4771_v13 = vor.u32 %v6767_v11, %v4770_v10  ;;  %v6799_v14 = vld [vmem:[#allocation7 + $0x1ac] sm:$0xf0]  ;;  %v6773_v11 = vld [vmem:[#allocation7 + $0xe4] sm:$0xf] }
  0x32   :  { %380 = vmatpush.bf16.msrb.mxu2 %v343_v50  ;;  %393 = vmatpush.bf16.msrb.mxu3 %v346_v51  ;;  %v4899_v15 = vor.u32 %v6799_v14, %v4898_v12  ;;  %v5042_v16 = vld [vmem:[#allocation7 + $0x2c0] sm:$0xf]  ;;  %v6835_v17 = vld [vmem:[#allocation7 + $0x2cc] sm:$0xf0]  ;;  %v4804_v12 = vld [vmem:[#allocation7 + $0xf0] sm:$0xf0] }
  0x33   :  { %v5170_v18 = vld [vmem:[#allocation7 + $0x3c0] sm:$0xf]  ;;  %v5043_v19 = vor.u32 %v6835_v17, %v5042_v16  ;;  %v6867_v20 = vld [vmem:[#allocation7 + $0x3cc] sm:$0xf0]  ;;  %v4807_v14 = vor.u32 %v6773_v11, %v4804_v12  ;;  %v4932_v16 = vld [vmem:[#allocation7 + $0x1f0] sm:$0xf0] }
  0x34   :  { %355 = vmatpush.bf16.msrb.mxu0 %v4671_v54  ;;  %368 = vmatpush.bf16.msrb.mxu1 %v4675_v55  ;;  %v4754_v21 = vld [vmem:[#allocation7 + $0x80] sm:$0xf]  ;;  %v5171_v22 = vor.u32 %v6867_v20, %v5170_v18  ;;  %v6763_v23 = vld [vmem:[#allocation7 + $0x8c] sm:$0xf0] }
  0x35   :  { %v4882_v24 = vld [vmem:[#allocation7 + $0x180] sm:$0xf]  ;;  %v6795_v25 = vld [vmem:[#allocation7 + $0x18c] sm:$0xf0]  ;;  %v4755_v26 = vor.u32 %v6763_v23, %v4754_v21 }
  0x36   :  { %381 = vmatpush.bf16.msrb.mxu2 %v4679_v2  ;;  %394 = vmatpush.bf16.msrb.mxu3 %v4683_v3  ;;  %v4883_v27 = vor.u32 %v6795_v25, %v4882_v24  ;;  %v5026_v28 = vld [vmem:[#allocation7 + $0x2a0] sm:$0xf]  ;;  %v6831_v29 = vld [vmem:[#allocation7 + $0x2ac] sm:$0xf0]  ;;  %v6769_v24 = vld [vmem:[#allocation7 + $0xc4] sm:$0xf] }
  0x37   :  { %v5154_v30 = vld [vmem:[#allocation7 + $0x3a0] sm:$0xf]  ;;  %v5027_v31 = vor.u32 %v6831_v29, %v5026_v28  ;;  %v6863_v32 = vld [vmem:[#allocation7 + $0x3ac] sm:$0xf0]  ;;  %v4788_v25 = vld [vmem:[#allocation7 + $0xd0] sm:$0xf0] }
  0x38   :  { %1261 = vmatpush.bf16.msra.mxu0 %v4803_v59  ;;  %1274 = vmatpush.bf16.msra.mxu1 %v4931_v60  ;;  %v5155_v33 = vor.u32 %v6863_v32, %v5154_v30  ;;  %v4738_v34 = vld [vmem:[#allocation7 + $0x60] sm:$0xf]  ;;  %v6759_v35 = vld [vmem:[#allocation7 + $0x6c] sm:$0xf0]  ;;  %v4916_v28 = vld [vmem:[#allocation7 + $0x1d0] sm:$0xf0] }
  0x39   :  { %v4866_v36 = vld [vmem:[#allocation7 + $0x160] sm:$0xf]  ;;  %v4739_v37 = vor.u32 %v6759_v35, %v4738_v34  ;;  %v6791_v38 = vld [vmem:[#allocation7 + $0x16c] sm:$0xf0]  ;;  %v6837_v35 = vld [vmem:[#allocation7 + $0x2e4] sm:$0xf] }
  0x3a   :  { %1287 = vmatpush.bf16.msra.mxu2 %v5059_v4  ;;  %1300 = vmatpush.bf16.msra.mxu3 %v5187_v5  ;;  %v4867_v39 = vor.u32 %v6791_v38, %v4866_v36  ;;  %v5010_v40 = vld [vmem:[#allocation7 + $0x280] sm:$0xf]  ;;  %v6827_v41 = vld [vmem:[#allocation7 + $0x28c] sm:$0xf0]  ;;  %v6869_v38 = vld [vmem:[#allocation7 + $0x3e4] sm:$0xf] }
  0x3b   :  { %v5011_v42 = vor.u32 %v6827_v41, %v5010_v40  ;;  %v5138_v43 = vld [vmem:[#allocation7 + $0x380] sm:$0xf]  ;;  %v6859_v44 = vld [vmem:[#allocation7 + $0x38c] sm:$0xf0] }
  0x3c   :  { %1262 = vmatpush.bf16.msra.mxu0 %v4787_v6  ;;  %1275 = vmatpush.bf16.msra.mxu1 %v4915_v7  ;;  %v4722_v45 = vld [vmem:[#allocation7 + $0x40] sm:$0xf]  ;;  %v5139_v46 = vor.u32 %v6859_v44, %v5138_v43  ;;  %v6755_v47 = vld [vmem:[#allocation7 + $0x4c] sm:$0xf0]  ;;  %v4772_v43 = vld [vmem:[#allocation7 + $0xb0] sm:$0xf0] }
  0x3d   :  { %v4850_v48 = vld [vmem:[#allocation7 + $0x140] sm:$0xf]  ;;  %v6787_v49 = vld [vmem:[#allocation7 + $0x14c] sm:$0xf0]  ;;  %v4723_v50 = vor.u32 %v6755_v47, %v4722_v45  ;;  %v6797_v44 = vld [vmem:[#allocation7 + $0x1a4] sm:$0xf] }
  0x3e   :  { %1288 = vmatpush.bf16.msra.mxu2 %v5043_v19  ;;  %1301 = vmatpush.bf16.msra.mxu3 %v5171_v22  ;;  %v4851_v51 = vor.u32 %v6787_v49, %v4850_v48  ;;  %v4994_v52 = vld [vmem:[#allocation7 + $0x260] sm:$0xf]  ;;  %v6823_v53 = vld [vmem:[#allocation7 + $0x26c] sm:$0xf0]  ;;  %v6833_v48 = vld [vmem:[#allocation7 + $0x2c4] sm:$0xf] }
  0x3f   :  { %4684 = vmatmul.msk.bf16.vlgmr.msrb.gmra.mxu0 %vm219_vm1, %v173_v9  ;;  %4685 = vmatmul.msk.bf16.vlgmr.msrb.gmra.mxu1 %vm219_vm1, %v173_v9  ;;  %v5122_v54 = vld [vmem:[#allocation7 + $0x360] sm:$0xf]  ;;  %v4995_v55 = vor.u32 %v6823_v53, %v4994_v52  ;;  %v6855_v56 = vld [vmem:[#allocation7 + $0x36c] sm:$0xf0]  ;;  %v5044_v49 = vld [vmem:[#allocation7 + $0x2d0] sm:$0xf0] }
  0x40   :  { %1263 = vmatpush.bf16.msra.mxu0 %v4771_v13  ;;  %1276 = vmatpush.bf16.msra.mxu1 %v4899_v15  ;;  %v5123_v57 = vor.u32 %v6855_v56, %v5122_v54  ;;  %v4706_v58 = vld [vmem:[#allocation7 + $0x20] sm:$0xf]  ;;  %v6751_v59 = vld [vmem:[#allocation7 + $0x2c] sm:$0xf0]  ;;  %v6805_v15 = vld [vmem:[#allocation7 + $0x1e4] sm:$0xf] }
  0x41   :  { %4686 = vmatmul.msk.bf16.vlgmr.msrb.gmra.mxu2 %vm219_vm1, %v173_v9  ;;  %4687 = vmatmul.msk.bf16.vlgmr.msrb.gmra.mxu3 %vm219_vm1, %v173_v9  ;;  %v4834_v60 = vld [vmem:[#allocation7 + $0x120] sm:$0xf]  ;;  %v4707_v61 = vor.u32 %v6751_v59, %v4706_v58  ;;  %v6783_v62 = vld [vmem:[#allocation7 + $0x12c] sm:$0xf0]  ;;  %v4935_v17 = vor.u32 %v6805_v15, %v4932_v16  ;;  %v5172_v52 = vld [vmem:[#allocation7 + $0x3d0] sm:$0xf0] }
  0x42   :  { %1289 = vmatpush.bf16.msra.mxu2 %v5027_v31  ;;  %1302 = vmatpush.bf16.msra.mxu3 %v5155_v33  ;;  %v4835_v63 = vor.u32 %v6783_v62, %v4834_v60  ;;  %v4978_v0 = vld [vmem:[#allocation7 + $0x240] sm:$0xf]  ;;  %v6819_v1 = vld [vmem:[#allocation7 + $0x24c] sm:$0xf0]  ;;  %v6761_v56 = vld [vmem:[#allocation7 + $0x84] sm:$0xf] }
  0x43   :  { %v4979_v2 = vor.u32 %v6819_v1, %v4978_v0  ;;  %v5106_v3 = vld [vmem:[#allocation7 + $0x340] sm:$0xf]  ;;  %v6851_v4 = vld [vmem:[#allocation7 + $0x34c] sm:$0xf0]  ;;  %v6793_v58 = vld [vmem:[#allocation7 + $0x184] sm:$0xf] }
  0x44   :  { %1264 = vmatpush.bf16.msra.mxu0 %v4755_v26  ;;  %1277 = vmatpush.bf16.msra.mxu1 %v4883_v27  ;;  %v5107_v5 = vor.u32 %v6851_v4, %v5106_v3  ;;  %v4690_v6 = vld [vmem:[#allocation7] sm:$0xf]  ;;  %v6747_v7 = vld [vmem:[#allocation7 + $0xc] sm:$0xf0]  ;;  %v6801_v26 = vld [vmem:[#allocation7 + $0x1c4] sm:$0xf]  ;;  %v4791_v27 = vor.u32 %v6769_v24, %v4788_v25 }
  0x45   :  { %v4818_v8 = vld [vmem:[#allocation7 + $0x100] sm:$0xf]  ;;  %v4691_v9 = vor.u32 %v6747_v7, %v4690_v6  ;;  %v6779_v10 = vld [vmem:[#allocation7 + $0x10c] sm:$0xf0]  ;;  %v4919_v31 = vor.u32 %v6801_v26, %v4916_v28  ;;  %v4884_v60 = vld [vmem:[#allocation7 + $0x190] sm:$0xf0] }
  0x46   :  { %1290 = vmatpush.bf16.msra.mxu2 %v5011_v42  ;;  %1303 = vmatpush.bf16.msra.mxu3 %v5139_v46  ;;  %v4819_v13 = vor.u32 %v6779_v10, %v4818_v8  ;;  %v4962_v18 = vld [vmem:[#allocation7 + $0x220] sm:$0xf]  ;;  %v6815_v19 = vld [vmem:[#allocation7 + $0x22c] sm:$0xf0]  ;;  %v6765_v42 = vld [vmem:[#allocation7 + $0xa4] sm:$0xf] }
  0x47   :  { %v5090_v20 = vld [vmem:[#allocation7 + $0x320] sm:$0xf]  ;;  %v4963_v21 = vor.u32 %v6815_v19, %v4962_v18  ;;  %v6847_v22 = vld [vmem:[#allocation7 + $0x32c] sm:$0xf0]  ;;  %v4775_v45 = vor.u32 %v6765_v42, %v4772_v43  ;;  %v4900_v46 = vld [vmem:[#allocation7 + $0x1b0] sm:$0xf0] }
  0x48   :  { %1265 = vmatpush.bf16.msra.mxu0 %v4739_v37  ;;  %1278 = vmatpush.bf16.msra.mxu1 %v4867_v39  ;;  %v5091_v23 = vor.u32 %v6847_v22, %v5090_v20  ;;  %v4946_v29 = vld [vmem:[#allocation7 + $0x200] sm:$0xf]  ;;  %v6811_v30 = vld [vmem:[#allocation7 + $0x20c] sm:$0xf0]  ;;  %v5060_v37 = vld [vmem:[#allocation7 + $0x2f0] sm:$0xf0]  ;;  %v4903_v47 = vor.u32 %v6797_v44, %v4900_v46 }
  0x49   :  { %v4947_v32 = vor.u32 %v6811_v30, %v4946_v29  ;;  %v5074_v33 = vld [vmem:[#allocation7 + $0x300] sm:$0xf]  ;;  %v6843_v34 = vld [vmem:[#allocation7 + $0x30c] sm:$0xf0]  ;;  %v5188_v39 = vld [vmem:[#allocation7 + $0x3f0] sm:$0xf0]  ;;  %v5063_v40 = vor.u32 %v6837_v35, %v5060_v37 }
  0x4a   :  { %1291 = vmatpush.bf16.msra.mxu2 %v4995_v55  ;;  %1304 = vmatpush.bf16.msra.mxu3 %v5123_v57  ;;  %v5075_v36 = vor.u32 %v6843_v34, %v5074_v33  ;;  %v5191_v41 = vor.u32 %v6869_v38, %v5188_v39  ;;  %v4756_v57 = vld [vmem:[#allocation7 + $0x90] sm:$0xf0]  ;;  %v6829_v62 = vld [vmem:[#allocation7 + $0x2a4] sm:$0xf] }
  0x4b   :  { %v4759_v59 = vor.u32 %v6761_v56, %v4756_v57  ;;  %v6861_v0 = vld [vmem:[#allocation7 + $0x3a4] sm:$0xf]  ;;  %v4868_v8 = vld [vmem:[#allocation7 + $0x170] sm:$0xf0] }
  0x4c   :  { %1266 = vmatpush.bf16.msra.mxu0 %v4723_v50  ;;  %1279 = vmatpush.bf16.msra.mxu1 %v4851_v51  ;;  %v6865_v50 = vld [vmem:[#allocation7 + $0x3c4] sm:$0xf]  ;;  %v5047_v51 = vor.u32 %v6833_v48, %v5044_v49  ;;  %v5012_v10 = vld [vmem:[#allocation7 + $0x290] sm:$0xf0] }
  0x4d   :  { %v5175_v55 = vor.u32 %v6865_v50, %v5172_v52  ;;  %v6757_v4 = vld [vmem:[#allocation7 + $0x64] sm:$0xf]  ;;  %v4724_v19 = vld [vmem:[#allocation7 + $0x50] sm:$0xf0] }
  0x4e   :  { %1292 = vmatpush.bf16.msra.mxu2 %v4979_v2  ;;  %1305 = vmatpush.bf16.msra.mxu3 %v5107_v5  ;;  %v5156_v2 = vld [vmem:[#allocation7 + $0x3b0] sm:$0xf0]  ;;  %v6789_v6 = vld [vmem:[#allocation7 + $0x164] sm:$0xf] }
  0x4f   :  { %v5159_v3 = vor.u32 %v6861_v0, %v5156_v2  ;;  %v4740_v5 = vld [vmem:[#allocation7 + $0x70] sm:$0xf0]  ;;  %v4871_v11 = vor.u32 %v6789_v6, %v4868_v8  ;;  %v6753_v15 = vld [vmem:[#allocation7 + $0x44] sm:$0xf] }
  0x50   :  { %1267 = vmatpush.bf16.msra.mxu0 %v4707_v61  ;;  %1280 = vmatpush.bf16.msra.mxu1 %v4835_v63  ;;  %v4887_v61 = vor.u32 %v6793_v58, %v4884_v60  ;;  %v5028_v63 = vld [vmem:[#allocation7 + $0x2b0] sm:$0xf0]  ;;  %v4743_v7 = vor.u32 %v6757_v4, %v4740_v5  ;;  %v6785_v20 = vld [vmem:[#allocation7 + $0x144] sm:$0xf]  ;;  %v4727_v25 = vor.u32 %v6753_v15, %v4724_v19 }
  0x51   :  { %v5031_v1 = vor.u32 %v6829_v62, %v5028_v63  ;;  %v7647_v24 = vld [vmem:[#allocation13 + $0x1] ss:$8 sm:$0xf]  ;;  %v4996_v28 = vld [vmem:[#allocation7 + $0x270] sm:$0xf0] }
  0x52   :  { %1293 = vmatpush.bf16.msra.mxu2 %v4963_v21  ;;  %1306 = vmatpush.bf16.msra.mxu3 %v5091_v23  ;;  %v4852_v21 = vld [vmem:[#allocation7 + $0x150] sm:$0xf0]  ;;  %v6853_v29 = vld [vmem:[#allocation7 + $0x364] sm:$0xf]  ;;  %v296_v46 = vperm.slane %v7647_v24, 1  ;;  %v297_v2 = vperm.slane %v7647_v24, 2 }
  0x53   :  { %v4855_v26 = vor.u32 %v6785_v20, %v4852_v21  ;;  %v5124_v30 = vld [vmem:[#allocation7 + $0x370] sm:$0xf0]  ;;  %v6781_v35 = vld [vmem:[#allocation7 + $0x124] sm:$0xf] }
  0x54   :  { %1268 = vmatpush.bf16.msra.mxu0 %v4691_v9  ;;  %1281 = vmatpush.bf16.msra.mxu1 %v4819_v13  ;;  %v6825_v9 = vld [vmem:[#allocation7 + $0x284] sm:$0xf]  ;;  %v5127_v34 = vor.u32 %v6853_v29, %v5124_v30  ;;  %v4980_v39 = vld [vmem:[#allocation7 + $0x250] sm:$0xf0] }
  0x55   :  { %v5015_v12 = vor.u32 %v6825_v9, %v5012_v10  ;;  %v6857_v13 = vld [vmem:[#allocation7 + $0x384] sm:$0xf]  ;;  %v4692_v44 = vld [vmem:[#allocation7 + $0x10] sm:$0xf0] }
  0x56   :  { %1294 = vmatpush.bf16.msra.mxu2 %v4947_v32  ;;  %1307 = vmatpush.bf16.msra.mxu3 %v5075_v36  ;;  %v4708_v32 = vld [vmem:[#allocation7 + $0x30] sm:$0xf0]  ;;  %v6817_v37 = vld [vmem:[#allocation7 + $0x244] sm:$0xf] }
  0x57   :  { %v4836_v36 = vld [vmem:[#allocation7 + $0x130] sm:$0xf0]  ;;  %v6745_v43 = vld [vmem:[#allocation7 + $0x4] sm:$0xf]  ;;  %v4983_v49 = vor.u32 %v6817_v37, %v4980_v39 }
  0x58   :  { %1313 = vmatpush.bf16.msrb.mxu0 %v4807_v14  ;;  %1326 = vmatpush.bf16.msrb.mxu1 %v4935_v17  ;;  %v5140_v14 = vld [vmem:[#allocation7 + $0x390] sm:$0xf0]  ;;  %v4839_v42 = vor.u32 %v6781_v35, %v4836_v36  ;;  %v6845_v4 = vld [vmem:[#allocation7 + $0x324] sm:$0xf] }
  0x59   :  { %v5143_v18 = vor.u32 %v6857_v13, %v5140_v14  ;;  %v4820_v48 = vld [vmem:[#allocation7 + $0x110] sm:$0xf0]  ;;  %v6809_v9 = vld [vmem:[#allocation7 + $0x204] sm:$0xf] }
  0x5a   :  { %1339 = vmatpush.bf16.msrb.mxu2 %v5063_v40  ;;  %1352 = vmatpush.bf16.msrb.mxu3 %v5191_v41  ;;  %v6849_v40 = vld [vmem:[#allocation7 + $0x344] sm:$0xf]  ;;  %v5108_v41 = vld [vmem:[#allocation7 + $0x350] sm:$0xf0] }
  0x5b   :  { %v5111_v50 = vor.u32 %v6849_v40, %v5108_v41  ;;  %v4964_v62 = vld [vmem:[#allocation7 + $0x230] sm:$0xf0] }
  0x5c   :  { %1314 = vmatpush.bf16.msrb.mxu0 %v4791_v27  ;;  %1327 = vmatpush.bf16.msrb.mxu1 %v4919_v31  ;;  %v6821_v27 = vld [vmem:[#allocation7 + $0x264] sm:$0xf]  ;;  %v5092_v5 = vld [vmem:[#allocation7 + $0x330] sm:$0xf0] }
  0x5d   :  { %v6749_v31 = vld [vmem:[#allocation7 + $0x24] sm:$0xf]  ;;  %v4999_v33 = vor.u32 %v6821_v27, %v4996_v28  ;;  %v5095_v8 = vor.u32 %v6845_v4, %v5092_v5  ;;  %v4948_v10 = vld [vmem:[#allocation7 + $0x210] sm:$0xf0] }
  0x5e   :  { %1340 = vmatpush.bf16.msrb.mxu2 %v5047_v51  ;;  %1353 = vmatpush.bf16.msrb.mxu3 %v5175_v55  ;;  %v4711_v38 = vor.u32 %v6749_v31, %v4708_v32  ;;  %v4695_v55 = vor.u32 %v6745_v43, %v4692_v44  ;;  %v5076_v19 = vld [vmem:[#allocation7 + $0x310] sm:$0xf0] }
  0x60   :  { %1315 = vmatpush.bf16.msrb.mxu0 %v4775_v45  ;;  %1328 = vmatpush.bf16.msrb.mxu1 %v4903_v47  ;;  %v295_v45 = vperm.slane %v7647_v24, 0  ;;  %v6777_v47 = vld [vmem:[#allocation7 + $0x104] sm:$0xf] }
  0x61   :  { %v4823_v58 = vor.u32 %v6777_v47, %v4820_v48  ;;  %v167_v47 = vld [vmem:[#allocation2] sm:$0xff] }
  0x62   :  { %1341 = vmatpush.bf16.msrb.mxu2 %v5031_v1  ;;  %1354 = vmatpush.bf16.msrb.mxu3 %v5159_v3  ;;  %v298_v3 = vperm.slane %v7647_v24, 3 }
  0x64   :  { %1316 = vmatpush.bf16.msrb.mxu0 %v4759_v59  ;;  %1329 = vmatpush.bf16.msrb.mxu1 %v4887_v61  ;;  %v6813_v61 = vld [vmem:[#allocation7 + $0x224] sm:$0xf] }
  0x65   :  { %v4967_v1 = vor.u32 %v6813_v61, %v4964_v62 }
  0x66   :  { %1342 = vmatpush.bf16.msrb.mxu2 %v5015_v12  ;;  %1355 = vmatpush.bf16.msrb.mxu3 %v5143_v18  ;;  %v4951_v18 = vor.u32 %v6809_v9, %v4948_v10 }
  0x68   :  { %1317 = vmatpush.bf16.msrb.mxu0 %v4743_v7  ;;  %1330 = vmatpush.bf16.msrb.mxu1 %v4871_v11  ;;  %v6841_v11 = vld [vmem:[#allocation7 + $0x304] sm:$0xf] }
  0x69   :  { %v5079_v20 = vor.u32 %v6841_v11, %v5076_v19 }
  0x6a   :  { %1343 = vmatpush.bf16.msrb.mxu2 %v4999_v33  ;;  %1356 = vmatpush.bf16.msrb.mxu3 %v5127_v34 }
  0x6c   :  { %1318 = vmatpush.bf16.msrb.mxu0 %v4727_v25  ;;  %1331 = vmatpush.bf16.msrb.mxu1 %v4855_v26 }
  0x6e   :  { %1344 = vmatpush.bf16.msrb.mxu2 %v4983_v49  ;;  %1357 = vmatpush.bf16.msrb.mxu3 %v5111_v50 }
  0x70   :  { %1319 = vmatpush.bf16.msrb.mxu0 %v4711_v38  ;;  %1332 = vmatpush.bf16.msrb.mxu1 %v4839_v42  ;;  %v7668_v38 = vld [vmem:[#allocation13] ss:$8 sm:$0xf] }
  0x71   :  { %v181_v41 = vperm.slane %v7668_v38, 0  ;;  %v182_v44 = vperm.slane %v7668_v38, 1  ;;  %v184_v9 = vperm.slane %v7668_v38, 3 }
  0x72   :  { %1345 = vmatpush.bf16.msrb.mxu2 %v4967_v1  ;;  %1358 = vmatpush.bf16.msrb.mxu3 %v5095_v8 }
  0x74   :  { %1320 = vmatpush.bf16.msrb.mxu0 %v4695_v55  ;;  %1333 = vmatpush.bf16.msrb.mxu1 %v4823_v58 }
  0x76   :  { %1346 = vmatpush.bf16.msrb.mxu2 %v4951_v18  ;;  %1359 = vmatpush.bf16.msrb.mxu3 %v5079_v20 }
  0xac   :  { %v7639_v53 = vpop.f32.mrf.mxu0  ;;  %v7641_v54 = vpop.f32.mrf.mxu1 }
  0xad   :  { %v246_v62 = vadd.f32 %v7639_v53, %v181_v41  ;;  %v259_v5 = vadd.f32 %v7641_v54, %v182_v44  ;;  %v6768_v44 = vld [vmem:[#allocation7 + $0xb4] sm:$0xf0] }
  0xb4   :  { %v7643_v16 = vpop.f32.mrf.mxu2  ;;  %v7645_v17 = vpop.f32.mrf.mxu3 }
  0xb5   :  { %v247_v22 = vpop.f32.mrf.mxu0  ;;  %v260_v23 = vpop.f32.mrf.mxu1 }
  0xbc   :  { %v273_v51 = vpop.f32.mrf.mxu2  ;;  %v286_v52 = vpop.f32.mrf.mxu3 }
  0xbd   :  { %v357_v56 = vpop.f32.mrf.mxu0  ;;  %v370_v57 = vpop.f32.mrf.mxu1  ;;  %v168_v52 = vld [vmem:[#allocation2 + $0x8] sm:$0xff] }
  0xbe   :  { %v358_v59 = vadd.f32 %v357_v56, %v295_v45  ;;  %v371_v60 = vadd.f32 %v370_v57, %v296_v46 }
  0xc0   :  { %v7651_v63 = vadd.f32 1e-16, %v358_v59  ;;  %v7653_v0 = vadd.f32 1e-16, %v371_v60  ;;  %v4810_v59 = vld [vmem:[#allocation7 + $0xe8] sm:$0xf] }
  0xc1   :  { %v6776_v60 = vld [vmem:[#allocation7 + $0xf4] sm:$0xf0] }
  0xc2   :  { %7269 = vrsqrt.f32 %v7651_v63  ;;  %vm411_vm2 = vcmp.eq.f32.partialorder %v7651_v63, inf  ;;  %vm413_vm3 = vcmp.eq.f32.partialorder %v7651_v63, 0.0  ;;  %v414_v48 = vand.u32 2147483648, %v7651_v63 }
  0xc3   :  { %7271 = vrsqrt.f32 %v7653_v0  ;;  %vm423_vm4 = vcmp.eq.f32.partialorder %v7653_v0, inf  ;;  %v426_v55 = vand.u32 2147483648, %v7653_v0  ;;  %vm425_vm5 = vcmp.eq.f32.partialorder %v7653_v0, 0.0 }
  0xc4   :  { %v383_v6 = vpop.f32.mrf.mxu2  ;;  %v396_v7 = vpop.f32.mrf.mxu3 }
  0xc5   :  { %v384_v12 = vadd.f32 %v383_v6, %v297_v2  ;;  %v397_v13 = vadd.f32 %v396_v7, %v298_v3  ;;  %v359_v14 = vpop.f32.mrf.mxu0  ;;  %v372_v15 = vpop.f32.mrf.mxu1  ;;  %v4938_v3 = vld [vmem:[#allocation7 + $0x1e8] sm:$0xf]  ;;  %v183_v6 = vperm.slane %v7668_v38, 2 }
  0xc6   :  { %v169_v15 = vld [vmem:[#allocation2 + $0x10] sm:$0xff]  ;;  %v5066_v38 = vld [vmem:[#allocation7 + $0x2e8] sm:$0xf] }
  0xc7   :  { %v7659_v21 = vadd.f32 1e-16, %v384_v12  ;;  %v7661_v22 = vadd.f32 1e-16, %v397_v13 }
  0xc8   :  { %v7270_v23 = vpop.eup %7269 }
  0xc9   :  { %v7272_v24 = vpop.eup %7271  ;;  %v405_v25 = vmul.f32 %v7270_v23, %v7651_v63  ;;  %7273 = vrsqrt.f32 %v7659_v21  ;;  %vm435_vm6 = vcmp.eq.f32.partialorder %v7659_v21, inf  ;;  %vm437_vm7 = vcmp.eq.f32.partialorder %v7659_v21, 0.0 }
  0xca   :  { %v417_v26 = vmul.f32 %v7272_v24, %v7653_v0  ;;  %7275 = vrsqrt.f32 %v7661_v22  ;;  %v438_v54 = vand.u32 2147483648, %v7659_v21  ;;  %vm447_vm8 = vcmp.eq.f32.partialorder %v7661_v22, inf }
  0xcb   :  { %v406_v27 = vmul.f32 %v7270_v23, %v405_v25  ;;  %vm449_vm9 = vcmp.eq.f32.partialorder %v7661_v22, 0.0 }
  0xcc   :  { %v385_v28 = vpop.f32.mrf.mxu2  ;;  %v398_v29 = vpop.f32.mrf.mxu3  ;;  %v418_v30 = vmul.f32 %v7272_v24, %v417_v26  ;;  %v4794_v26 = vld [vmem:[#allocation7 + $0xc8] sm:$0xf] }
  0xcd   :  { %v407_v31 = vmul.f32 0.5, %v406_v27  ;;  %v6772_v27 = vld [vmem:[#allocation7 + $0xd4] sm:$0xf0] }
  0xce   :  { %v419_v32 = vmul.f32 0.5, %v418_v30  ;;  %v272_v30 = vadd.f32 %v7643_v16, %v183_v6  ;;  %v6840_v16 = vld [vmem:[#allocation7 + $0x2f4] sm:$0xf0] }
  0xcf   :  { %v7274_v33 = vpop.eup %7273  ;;  %v408_v34 = vsub.f32 1.5, %v407_v31  ;;  %v4922_v31 = vld [vmem:[#allocation7 + $0x1c8] sm:$0xf] }
  0xd0   :  { %v7276_v35 = vpop.eup %7275  ;;  %v429_v36 = vmul.f32 %v7274_v33, %v7659_v21  ;;  %v420_v37 = vsub.f32 1.5, %v419_v32  ;;  %v6804_v32 = vld [vmem:[#allocation7 + $0x1d4] sm:$0xf0] }
  0xd1   :  { %v441_v39 = vmul.f32 %v7276_v35, %v7661_v22  ;;  %v409_v40 = vmul.f32 %v7270_v23, %v408_v34  ;;  %v170_v23 = vld [vmem:[#allocation2 + $0x18] sm:$0xff] }
  0xd2   :  { %v421_v42 = vmul.f32 %v7272_v24, %v420_v37  ;;  %v430_v43 = vmul.f32 %v7274_v33, %v429_v36  ;;  %v450_v24 = vand.u32 2147483648, %v7661_v22  ;;  %v4795_v37 = vor.u32 %v6772_v27, %v4794_v26  ;;  %v6756_v26 = vld [vmem:[#allocation7 + $0x54] sm:$0xf0]  ;;  %v4858_v27 = vld [vmem:[#allocation7 + $0x148] sm:$0xf] }
  0xd3   :  { %v410_v45 = vmul.f32 %v409_v40, %v7651_v63  ;;  %v442_v46 = vmul.f32 %v7276_v35, %v441_v39  ;;  %v5194_v39 = vld [vmem:[#allocation7 + $0x3e8] sm:$0xf]  ;;  %v4923_v40 = vor.u32 %v6804_v32, %v4922_v31  ;;  %v6824_v32 = vld [vmem:[#allocation7 + $0x274] sm:$0xf0] }
  0xd4   :  { %v422_v49 = vmul.f32 %v421_v42, %v7653_v0  ;;  %v431_v50 = vmul.f32 0.5, %v430_v43  ;;  %v6872_v42 = vld [vmem:[#allocation7 + $0x3f4] sm:$0xf0]  ;;  %v4778_v43 = vld [vmem:[#allocation7 + $0xa8] sm:$0xf] }
  0xd5   :  { %v412_v51 = vsel %vm411_vm2, %v7651_v63, %v410_v45  ;;  %v443_v56 = vmul.f32 0.5, %v442_v46  ;;  %v6808_v63 = vld [vmem:[#allocation7 + $0x1f4] sm:$0xf0]  ;;  %v5002_v31 = vld [vmem:[#allocation7 + $0x268] sm:$0xf] }
  0xd6   :  { %v415_v57 = vsel %vm413_vm3, %v414_v48, %v412_v51  ;;  %v424_v58 = vsel %vm423_vm4, %v7653_v0, %v422_v49  ;;  %v432_v61 = vsub.f32 1.5, %v431_v50  ;;  %v4811_v0 = vor.u32 %v6776_v60, %v4810_v59  ;;  %v6800_v46 = vld [vmem:[#allocation7 + $0x1b4] sm:$0xf0]  ;;  %v4762_v60 = vld [vmem:[#allocation7 + $0x88] sm:$0xf] }
  0xd7   :  { %v452_v1 = vmul.f32 %v415_v57, %v167_v47  ;;  %v427_v2 = vsel %vm425_vm5, %v426_v55, %v424_v58  ;;  %v444_v4 = vsub.f32 1.5, %v443_v56  ;;  %v4939_v13 = vor.u32 %v6808_v63, %v4938_v3  ;;  %v6836_v55 = vld [vmem:[#allocation7 + $0x2d4] sm:$0xf0]  ;;  %v5178_v56 = vld [vmem:[#allocation7 + $0x3c8] sm:$0xf] }
  0xd8   :  { %v453_v7 = vmul.f32 %v427_v2, %v168_v52  ;;  %v433_v8 = vmul.f32 %v7274_v33, %v432_v61  ;;  %v5067_v48 = vor.u32 %v6840_v16, %v5066_v38  ;;  %v5195_v50 = vor.u32 %v6872_v42, %v5194_v39  ;;  %v5050_v52 = vld [vmem:[#allocation7 + $0x2c8] sm:$0xf]  ;;  %v6868_v59 = vld [vmem:[#allocation7 + $0x3d4] sm:$0xf0] }
  0xd9   :  { %v456_v10 = vadd.f32 %v452_v1, %v246_v62  ;;  %v445_v11 = vmul.f32 %v7276_v35, %v444_v4  ;;  %v285_v35 = vadd.f32 %v7645_v17, %v184_v9  ;;  %v4906_v17 = vld [vmem:[#allocation7 + $0x1a8] sm:$0xf]  ;;  %v4779_v51 = vor.u32 %v6768_v44, %v4778_v43  ;;  %v6764_v61 = vld [vmem:[#allocation7 + $0x94] sm:$0xf0] }
  0xda   :  { %v457_v12 = vadd.f32 %v453_v7, %v259_v5  ;;  %v434_v53 = vmul.f32 %v433_v8, %v7659_v21  ;;  %v4907_v58 = vor.u32 %v6800_v46, %v4906_v17  ;;  %v4890_v62 = vld [vmem:[#allocation7 + $0x188] sm:$0xf]  ;;  %v6796_v1 = vld [vmem:[#allocation7 + $0x194] sm:$0xf0]  ;;  %v5051_v2 = vor.u32 %v6836_v55, %v5050_v52  ;;  %v6774_v55 = vld [vmem:[#allocation7 + $0xec] sm:$0xf] }
  0xdb   :  { %v7689_v14 = vmax.f32 %v456_v10, 0.0  ;;  %v446_v18 = vmul.f32 %v445_v11, %v7661_v22  ;;  %v5179_v3 = vor.u32 %v6868_v59, %v5178_v56  ;;  %v4763_v63 = vor.u32 %v6764_v61, %v4762_v60  ;;  %v5034_v4 = vld [vmem:[#allocation7 + $0x2a8] sm:$0xf]  ;;  %v6832_v5 = vld [vmem:[#allocation7 + $0x2b4] sm:$0xf0] }
  0xdc   :  { %v7694_v19 = vmax.f32 %v457_v12, 0.0  ;;  %v436_v20 = vsel %vm435_vm6, %v7659_v21, %v434_v53  ;;  %v4891_v6 = vor.u32 %v6796_v1, %v4890_v62  ;;  %v5162_v7 = vld [vmem:[#allocation7 + $0x3a8] sm:$0xf]  ;;  %v6864_v8 = vld [vmem:[#allocation7 + $0x3b4] sm:$0xf0]  ;;  %v5035_v12 = vor.u32 %v6832_v5, %v5034_v4 }
  0xdd   :  { %v7701_v25 = vpack.c.bf16 %v7689_v14, %v7689_v14  ;;  %v439_v28 = vsel %vm437_vm7, %v438_v54, %v436_v20  ;;  %v448_v29 = vsel %vm447_vm8, %v7661_v22, %v446_v18  ;;  %v4746_v9 = vld [vmem:[#allocation7 + $0x68] sm:$0xf]  ;;  %v6760_v10 = vld [vmem:[#allocation7 + $0x74] sm:$0xf0]  ;;  %v5003_v39 = vor.u32 %v6824_v32, %v5002_v31  ;;  %v6806_v59 = vld [vmem:[#allocation7 + $0x1ec] sm:$0xf] }
  0xde   :  { %v7708_v21 = vpack.c.bf16 %v7694_v19, %v7694_v19  ;;  %v454_v33 = vmul.f32 %v439_v28, %v169_v15  ;;  %v451_v34 = vsel %vm449_vm9, %v450_v24, %v448_v29  ;;  %v6792_v11 = vld [vmem:[#allocation7 + $0x174] sm:$0xf0]  ;;  %v5018_v53 = vld [vmem:[#allocation7 + $0x288] sm:$0xf]  ;;  %v4747_v54 = vor.u32 %v6760_v10, %v4746_v9  ;;  %v4940_v60 = vld [vmem:[#allocation7 + $0x1f8] sm:$0xf0] }
  0xdf   :  { %1269 = vmatmul.bf16.vlgmr.msra.gmra.mxu0 %v7701_v25  ;;  %v455_v36 = vmul.f32 %v451_v34, %v170_v23  ;;  %v6828_v15 = vld [vmem:[#allocation7 + $0x294] sm:$0xf0]  ;;  %v5146_v20 = vld [vmem:[#allocation7 + $0x388] sm:$0xf]  ;;  %v4796_v9 = vld [vmem:[#allocation7 + $0xd8] sm:$0xf0] }
  0xe0   :  { %1282 = vmatmul.bf16.vlgmr.msra.gmra.mxu1 %v7708_v21  ;;  %1365 = vmatpush.bf16.msra.mxu0 %v4811_v0  ;;  %v458_v22 = vadd.f32 %v454_v33, %v272_v30  ;;  %v4874_v0 = vld [vmem:[#allocation7 + $0x168] sm:$0xf]  ;;  %v6860_v23 = vld [vmem:[#allocation7 + $0x394] sm:$0xf0]  ;;  %v5019_v29 = vor.u32 %v6828_v15, %v5018_v53  ;;  %v6802_v10 = vld [vmem:[#allocation7 + $0x1cc] sm:$0xf] }
  0xe1   :  { %1378 = vmatpush.bf16.msra.mxu1 %v4939_v13  ;;  %v459_v41 = vadd.f32 %v455_v36, %v285_v35  ;;  %v5163_v13 = vor.u32 %v6864_v8, %v5162_v7  ;;  %v4875_v18 = vor.u32 %v6792_v11, %v4874_v0  ;;  %v4730_v24 = vld [vmem:[#allocation7 + $0x48] sm:$0xf]  ;;  %v6788_v28 = vld [vmem:[#allocation7 + $0x154] sm:$0xf0]  ;;  %v5147_v30 = vor.u32 %v6860_v23, %v5146_v20  ;;  %v6770_v7 = vld [vmem:[#allocation7 + $0xcc] sm:$0xf] }
  0xe2   :  { %v7713_v45 = vmax.f32 %v458_v22, 0.0  ;;  %v4731_v33 = vor.u32 %v6756_v26, %v4730_v24  ;;  %v4859_v34 = vor.u32 %v6788_v28, %v4858_v27  ;;  %v5130_v35 = vld [vmem:[#allocation7 + $0x368] sm:$0xf]  ;;  %v6856_v36 = vld [vmem:[#allocation7 + $0x374] sm:$0xf0]  ;;  %v4799_v20 = vor.u32 %v6770_v7, %v4796_v9 }
  0xe3   :  { %v7715_v47 = vmax.f32 %v459_v41, 0.0  ;;  %v6752_v22 = vld [vmem:[#allocation7 + $0x34] sm:$0xf0]  ;;  %v4842_v38 = vld [vmem:[#allocation7 + $0x128] sm:$0xf] }
  0xe4   :  { %1366 = vmatpush.bf16.msra.mxu0 %v4795_v37  ;;  %v7719_v49 = vpack.c.bf16 %v7713_v45, %v7713_v45  ;;  %v4714_v37 = vld [vmem:[#allocation7 + $0x28] sm:$0xf]  ;;  %v6784_v16 = vld [vmem:[#allocation7 + $0x134] sm:$0xf0]  ;;  %v4924_v0 = vld [vmem:[#allocation7 + $0x1d8] sm:$0xf0] }
  0xe5   :  { %1379 = vmatpush.bf16.msra.mxu1 %v4923_v40  ;;  %v7723_v57 = vpack.c.bf16 %v7715_v47, %v7715_v47  ;;  %v5131_v40 = vor.u32 %v6856_v36, %v5130_v35  ;;  %v4986_v41 = vld [vmem:[#allocation7 + $0x248] sm:$0xf]  ;;  %v6820_v42 = vld [vmem:[#allocation7 + $0x254] sm:$0xf0]  ;;  %v4715_v44 = vor.u32 %v6752_v22, %v4714_v37  ;;  %v4843_v17 = vor.u32 %v6784_v16, %v4842_v38  ;;  %v6870_v24 = vld [vmem:[#allocation7 + $0x3ec] sm:$0xf] }
  0xe6   :  { %1295 = vmatmul.bf16.vlgmr.msra.gmra.mxu2 %v7719_v49  ;;  %v5114_v43 = vld [vmem:[#allocation7 + $0x348] sm:$0xf]  ;;  %v6852_v46 = vld [vmem:[#allocation7 + $0x354] sm:$0xf0]  ;;  %v4987_v56 = vor.u32 %v6820_v42, %v4986_v41  ;;  %v4927_v23 = vor.u32 %v6802_v10, %v4924_v0  ;;  %v5196_v26 = vld [vmem:[#allocation7 + $0x3f8] sm:$0xf0] }
  0xe7   :  { %1308 = vmatmul.bf16.vlgmr.msra.gmra.mxu3 %v7723_v57  ;;  %1391 = vmatpush.bf16.msra.mxu2 %v5067_v48  ;;  %v4698_v48 = vld [vmem:[#allocation7 + $0x8] sm:$0xf]  ;;  %v6780_v52 = vld [vmem:[#allocation7 + $0x114] sm:$0xf0]  ;;  %v5115_v61 = vor.u32 %v6852_v46, %v5114_v43  ;;  %v6766_v27 = vld [vmem:[#allocation7 + $0xac] sm:$0xf] }
  0xe8   :  { %1404 = vmatpush.bf16.msra.mxu3 %v5195_v50  ;;  %1367 = vmatpush.bf16.msra.mxu0 %v4779_v51  ;;  %v6748_v50 = vld [vmem:[#allocation7 + $0x14] sm:$0xf0]  ;;  %v4826_v51 = vld [vmem:[#allocation7 + $0x108] sm:$0xf]  ;;  %v4908_v31 = vld [vmem:[#allocation7 + $0x1b8] sm:$0xf0] }
  0xe9   :  { %1380 = vmatpush.bf16.msra.mxu1 %v4907_v58  ;;  %v4812_v58 = vld [vmem:[#allocation7 + $0xf8] sm:$0xf0]  ;;  %v4970_v62 = vld [vmem:[#allocation7 + $0x228] sm:$0xf]  ;;  %v6816_v1 = vld [vmem:[#allocation7 + $0x234] sm:$0xf0] }
  0xea   :  { %v6848_v4 = vld [vmem:[#allocation7 + $0x334] sm:$0xf0]  ;;  %v4815_v5 = vor.u32 %v6774_v55, %v4812_v58  ;;  %v4971_v8 = vor.u32 %v6816_v1, %v4970_v62  ;;  %v5082_v53 = vld [vmem:[#allocation7 + $0x308] sm:$0xf]  ;;  %v6834_v35 = vld [vmem:[#allocation7 + $0x2cc] sm:$0xf] }
  0xeb   :  { %1392 = vmatpush.bf16.msra.mxu2 %v5051_v2  ;;  %v4699_v2 = vor.u32 %v6748_v50, %v4698_v48  ;;  %v6844_v15 = vld [vmem:[#allocation7 + $0x314] sm:$0xf0]  ;;  %v5052_v36 = vld [vmem:[#allocation7 + $0x2d8] sm:$0xf0]  ;;  %v6866_v38 = vld [vmem:[#allocation7 + $0x3cc] sm:$0xf] }
  0xec   :  { %1405 = vmatpush.bf16.msra.mxu3 %v5179_v3  ;;  %1368 = vmatpush.bf16.msra.mxu0 %v4763_v63  ;;  %v4827_v3 = vor.u32 %v6780_v52, %v4826_v51  ;;  %v5098_v63 = vld [vmem:[#allocation7 + $0x328] sm:$0xf]  ;;  %v5083_v32 = vor.u32 %v6844_v15, %v5082_v53  ;;  %v5180_v16 = vld [vmem:[#allocation7 + $0x3d8] sm:$0xf0]  ;;  %v6794_v41 = vld [vmem:[#allocation7 + $0x18c] sm:$0xf]  ;;  %v5055_v43 = vor.u32 %v6834_v35, %v5052_v36 }
  0xed   :  { %1381 = vmatpush.bf16.msra.mxu1 %v4891_v6  ;;  %v4943_v6 = vor.u32 %v6806_v59, %v4940_v60  ;;  %v5099_v11 = vor.u32 %v6848_v4, %v5098_v63  ;;  %v4892_v42 = vld [vmem:[#allocation7 + $0x198] sm:$0xf0]  ;;  %v6862_v51 = vld [vmem:[#allocation7 + $0x3ac] sm:$0xf] }
  0xee   :  { %v5036_v46 = vld [vmem:[#allocation7 + $0x2b8] sm:$0xf0]  ;;  %v4895_v50 = vor.u32 %v6794_v41, %v4892_v42  ;;  %v6758_v55 = vld [vmem:[#allocation7 + $0x6c] sm:$0xf] }
  0xef   :  { %1393 = vmatpush.bf16.msra.mxu2 %v5035_v12  ;;  %1321 = vmatmul.bf16.vlgmr.msrb.gmra.mxu0 %v7701_v25  ;;  %v4954_v12 = vld [vmem:[#allocation7 + $0x208] sm:$0xf]  ;;  %v5164_v52 = vld [vmem:[#allocation7 + $0x3b8] sm:$0xf0]  ;;  %v6790_v58 = vld [vmem:[#allocation7 + $0x16c] sm:$0xf] }
  0xf0   :  { %1406 = vmatpush.bf16.msra.mxu3 %v5163_v13  ;;  %1334 = vmatmul.bf16.vlgmr.msrb.gmra.mxu1 %v7708_v21  ;;  %v6812_v13 = vld [vmem:[#allocation7 + $0x214] sm:$0xf0]  ;;  %v4876_v59 = vld [vmem:[#allocation7 + $0x178] sm:$0xf0]  ;;  %v6826_v62 = vld [vmem:[#allocation7 + $0x28c] sm:$0xf] }
  0xf1   :  { %1369 = vmatpush.bf16.msra.mxu0 %v4747_v54  ;;  %1382 = vmatpush.bf16.msra.mxu1 %v4875_v18  ;;  %v6838_v54 = vld [vmem:[#allocation7 + $0x2ec] sm:$0xf]  ;;  %v5068_v18 = vld [vmem:[#allocation7 + $0x2f8] sm:$0xf0]  ;;  %v4955_v28 = vor.u32 %v6812_v13, %v4954_v12 }
  0xf2   :  { %v5020_v1 = vld [vmem:[#allocation7 + $0x298] sm:$0xf0]  ;;  %v6858_v63 = vld [vmem:[#allocation7 + $0x38c] sm:$0xf] }
  0xf3   :  { %1394 = vmatpush.bf16.msra.mxu2 %v5019_v29  ;;  %v4780_v29 = vld [vmem:[#allocation7 + $0xb8] sm:$0xf0]  ;;  %v6786_v7 = vld [vmem:[#allocation7 + $0x14c] sm:$0xf]  ;;  %v5023_v9 = vor.u32 %v6826_v62, %v5020_v1 }
  0xf4   :  { %1407 = vmatpush.bf16.msra.mxu3 %v5147_v30  ;;  %v6798_v30 = vld [vmem:[#allocation7 + $0x1ac] sm:$0xf]  ;;  %v4783_v37 = vor.u32 %v6766_v27, %v4780_v29  ;;  %v5148_v4 = vld [vmem:[#allocation7 + $0x398] sm:$0xf0] }
  0xf5   :  { %1370 = vmatpush.bf16.msra.mxu0 %v4731_v33  ;;  %1383 = vmatpush.bf16.msra.mxu1 %v4859_v34  ;;  %v5071_v33 = vor.u32 %v6838_v54, %v5068_v18  ;;  %v5199_v34 = vor.u32 %v6870_v24, %v5196_v26  ;;  %v4911_v22 = vor.u32 %v6798_v30, %v4908_v31  ;;  %v6822_v0 = vld [vmem:[#allocation7 + $0x26c] sm:$0xf]  ;;  %v5132_v15 = vld [vmem:[#allocation7 + $0x378] sm:$0xf0] }
  0xf6   :  { %1347 = vmatmul.bf16.vlgmr.msrb.gmra.mxu2 %v7719_v49  ;;  %v5151_v10 = vor.u32 %v6858_v63, %v5148_v4  ;;  %v6854_v53 = vld [vmem:[#allocation7 + $0x36c] sm:$0xf]  ;;  %v4716_v18 = vld [vmem:[#allocation7 + $0x38] sm:$0xf0] }
  0xf7   :  { %1360 = vmatmul.bf16.vlgmr.msrb.gmra.mxu3 %v7723_v57  ;;  %1395 = vmatpush.bf16.msra.mxu2 %v5003_v39  ;;  %v6762_v39 = vld [vmem:[#allocation7 + $0x8c] sm:$0xf]  ;;  %v5135_v26 = vor.u32 %v6854_v53, %v5132_v15  ;;  %v4828_v36 = vld [vmem:[#allocation7 + $0x118] sm:$0xf0]  ;;  %v5554_v53 = vld [vmem:[#allocation9 + $0x2c0] sm:$0xf] }
  0xf8   :  { %1408 = vmatpush.bf16.msra.mxu3 %v5131_v40  ;;  %v4764_v40 = vld [vmem:[#allocation7 + $0x98] sm:$0xf0]  ;;  %v6750_v54 = vld [vmem:[#allocation7 + $0x2c] sm:$0xf]  ;;  %v6963_v15 = vld [vmem:[#allocation9 + $0x2cc] sm:$0xf0] }
  0xf9   :  { %1371 = vmatpush.bf16.msra.mxu0 %v4715_v44  ;;  %1384 = vmatpush.bf16.msra.mxu1 %v4843_v17  ;;  %v5183_v44 = vor.u32 %v6866_v38, %v5180_v16  ;;  %v6830_v17 = vld [vmem:[#allocation7 + $0x2ac] sm:$0xf]  ;;  %v4767_v48 = vor.u32 %v6762_v39, %v4764_v40  ;;  %v4719_v30 = vor.u32 %v6750_v54, %v4716_v18  ;;  %v6903_v38 = vld [vmem:[#allocation9 + $0xec] sm:$0xf0]  ;;  %v5442_v16 = vld [vmem:[#allocation9 + $0x1e0] sm:$0xf] }
  0xfa   :  { %v5039_v60 = vor.u32 %v6830_v17, %v5036_v46  ;;  %v6818_v27 = vld [vmem:[#allocation7 + $0x24c] sm:$0xf]  ;;  %v6935_v39 = vld [vmem:[#allocation9 + $0x1ec] sm:$0xf0]  ;;  %v4972_v42 = vld [vmem:[#allocation7 + $0x238] sm:$0xf0] }
  0xfb   :  { %1396 = vmatpush.bf16.msra.mxu2 %v4987_v56  ;;  %v4748_v56 = vld [vmem:[#allocation7 + $0x78] sm:$0xf0]  ;;  %v6850_v29 = vld [vmem:[#allocation7 + $0x34c] sm:$0xf]  ;;  %v5682_v18 = vld [vmem:[#allocation9 + $0x3c0] sm:$0xf] }
  0xfc   :  { %1409 = vmatpush.bf16.msra.mxu3 %v5115_v61  ;;  %v5167_v61 = vor.u32 %v6862_v51, %v5164_v52  ;;  %v6778_v35 = vld [vmem:[#allocation7 + $0x10c] sm:$0xf]  ;;  %v5100_v46 = vld [vmem:[#allocation7 + $0x338] sm:$0xf0]  ;;  %v5298_v51 = vld [vmem:[#allocation9 + $0xc0] sm:$0xf] }
  0xfd   :  { %1372 = vmatpush.bf16.msra.mxu0 %v4699_v2  ;;  %1385 = vmatpush.bf16.msra.mxu1 %v4827_v3  ;;  %v4751_v2 = vor.u32 %v6758_v55, %v4748_v56  ;;  %v4879_v3 = vor.u32 %v6790_v58, %v4876_v59  ;;  %v6814_v41 = vld [vmem:[#allocation7 + $0x22c] sm:$0xf]  ;;  %v6899_v55 = vld [vmem:[#allocation9 + $0xcc] sm:$0xf0]  ;;  %v5426_v56 = vld [vmem:[#allocation9 + $0x1c0] sm:$0xf] }
  0xfe   :  { %v6846_v17 = vld [vmem:[#allocation7 + $0x32c] sm:$0xf]  ;;  %v4975_v52 = vor.u32 %v6814_v41, %v4972_v42  ;;  %v6931_v58 = vld [vmem:[#allocation9 + $0x1cc] sm:$0xf0]  ;;  %v5084_v1 = vld [vmem:[#allocation7 + $0x318] sm:$0xf0]  ;;  %v5299_v63 = vor.u32 %v6899_v55, %v5298_v51 }
  0xff   :  { %1397 = vmatpush.bf16.msra.mxu2 %v4971_v8  ;;  %v4860_v8 = vld [vmem:[#allocation7 + $0x158] sm:$0xf0]  ;;  %v5103_v59 = vor.u32 %v6846_v17, %v5100_v46  ;;  %v6842_v62 = vld [vmem:[#allocation7 + $0x30c] sm:$0xf]  ;;  %v5427_v4 = vor.u32 %v6931_v58, %v5426_v56  ;;  %v5650_v41 = vld [vmem:[#allocation9 + $0x380] sm:$0xf] }
 0x100   :  { %1410 = vmatpush.bf16.msra.mxu3 %v5099_v11  ;;  %1373 = vmatmul.bf16.vlgmr.msra.gmra.mxu0 %v7701_v25  ;;  %v5004_v11 = vld [vmem:[#allocation7 + $0x278] sm:$0xf0]  ;;  %v4863_v13 = vor.u32 %v6786_v7, %v4860_v8  ;;  %v5282_v8 = vld [vmem:[#allocation9 + $0xa0] sm:$0xf]  ;;  %v6987_v42 = vld [vmem:[#allocation9 + $0x38c] sm:$0xf0] }
 0x101   :  { %1417 = vmatpush.bf16.msrb.mxu0 %v4815_v5  ;;  %1430 = vmatpush.bf16.msrb.mxu1 %v4943_v6  ;;  %v6754_v5 = vld [vmem:[#allocation7 + $0x4c] sm:$0xf]  ;;  %v4732_v6 = vld [vmem:[#allocation7 + $0x58] sm:$0xf0]  ;;  %v5007_v24 = vor.u32 %v6822_v0, %v5004_v11  ;;  %v5410_v11 = vld [vmem:[#allocation9 + $0x1a0] sm:$0xf] }
 0x102   :  { %1386 = vmatmul.bf16.vlgmr.msra.gmra.mxu1 %v7708_v21  ;;  %v4735_v12 = vor.u32 %v6754_v5, %v4732_v6  ;;  %v5698_v5 = vld [vmem:[#allocation9 + $0x3e0] sm:$0xf]  ;;  %v6999_v6 = vld [vmem:[#allocation9 + $0x3ec] sm:$0xf0] }
 0x103   :  { %1398 = vmatpush.bf16.msra.mxu2 %v4955_v28  ;;  %v4988_v28 = vld [vmem:[#allocation7 + $0x258] sm:$0xf0]  ;;  %v5362_v46 = vld [vmem:[#allocation9 + $0x140] sm:$0xf]  ;;  %v6983_v58 = vld [vmem:[#allocation9 + $0x36c] sm:$0xf0] }
 0x104   :  { %1411 = vmatpush.bf16.msra.mxu3 %v5083_v32  ;;  %v5116_v32 = vld [vmem:[#allocation7 + $0x358] sm:$0xf0]  ;;  %v5506_v51 = vld [vmem:[#allocation9 + $0x260] sm:$0xf] }
 0x105   :  { %1418 = vmatpush.bf16.msrb.mxu0 %v4799_v20  ;;  %1431 = vmatpush.bf16.msrb.mxu1 %v4927_v23  ;;  %v6782_v20 = vld [vmem:[#allocation7 + $0x12c] sm:$0xf]  ;;  %v4844_v23 = vld [vmem:[#allocation7 + $0x138] sm:$0xf0]  ;;  %v5119_v40 = vor.u32 %v6850_v29, %v5116_v32  ;;  %v5666_v32 = vld [vmem:[#allocation9 + $0x3a0] sm:$0xf] }
 0x106   :  { %1399 = vmatmul.bf16.vlgmr.msra.gmra.mxu2 %v7719_v49  ;;  %v4847_v31 = vor.u32 %v6782_v20, %v4844_v23  ;;  %v6995_v20 = vld [vmem:[#allocation9 + $0x3cc] sm:$0xf0]  ;;  %v5634_v56 = vld [vmem:[#allocation9 + $0x360] sm:$0xf] }
 0x107   :  { %1443 = vmatpush.bf16.msrb.mxu2 %v5071_v33  ;;  %1412 = vmatmul.bf16.vlgmr.msra.gmra.mxu3 %v7723_v57  ;;  %v6746_v33 = vld [vmem:[#allocation7 + $0xc] sm:$0xf]  ;;  %v5683_v29 = vor.u32 %v6995_v20, %v5682_v18  ;;  %v5444_v18 = vld [vmem:[#allocation9 + $0x1f0] sm:$0xf0]  ;;  %v5474_v20 = vld [vmem:[#allocation9 + $0x220] sm:$0xf] }
 0x108   :  { %1456 = vmatpush.bf16.msrb.mxu3 %v5199_v34  ;;  %v4700_v34 = vld [vmem:[#allocation7 + $0x18] sm:$0xf0] }
 0x109   :  { %1419 = vmatpush.bf16.msrb.mxu0 %v4783_v37  ;;  %1432 = vmatpush.bf16.msrb.mxu1 %v4911_v22  ;;  %v5314_v37 = vld [vmem:[#allocation9 + $0xe0] sm:$0xf]  ;;  %v4991_v22 = vor.u32 %v6818_v27, %v4988_v28  ;;  %v6923_v28 = vld [vmem:[#allocation9 + $0x18c] sm:$0xf0] }
 0x10a   :  { %v5394_v27 = vld [vmem:[#allocation9 + $0x180] sm:$0xf] }
 0x10b   :  { %1444 = vmatpush.bf16.msrb.mxu2 %v5055_v43  ;;  %v4703_v43 = vor.u32 %v6746_v33, %v4700_v34  ;;  %v6991_v33 = vld [vmem:[#allocation9 + $0x3ac] sm:$0xf0]  ;;  %v5395_v34 = vor.u32 %v6923_v28, %v5394_v27 }
 0x10c   :  { %1457 = vmatpush.bf16.msrb.mxu3 %v5183_v44  ;;  %v4831_v44 = vor.u32 %v6778_v35, %v4828_v36  ;;  %v5250_v35 = vld [vmem:[#allocation9 + $0x60] sm:$0xf]  ;;  %v6887_v36 = vld [vmem:[#allocation9 + $0x6c] sm:$0xf0] }
 0x10d   :  { %1420 = vmatpush.bf16.msrb.mxu0 %v4767_v48  ;;  %1433 = vmatpush.bf16.msrb.mxu1 %v4895_v50  ;;  %v5315_v48 = vor.u32 %v6903_v38, %v5314_v37  ;;  %v5443_v50 = vor.u32 %v6935_v39, %v5442_v16  ;;  %v6919_v38 = vld [vmem:[#allocation9 + $0x16c] sm:$0xf0]  ;;  %v5667_v16 = vor.u32 %v6991_v33, %v5666_v32  ;;  %v5522_v39 = vld [vmem:[#allocation9 + $0x280] sm:$0xf]  ;;  %v5300_v33 = vld [vmem:[#allocation9 + $0xd0] sm:$0xf0] }
 0x10e   :  { %v477_v32 = vmul.f32 %v7694_v19, %v7694_v19 }
 0x10f   :  { %1445 = vmatpush.bf16.msrb.mxu2 %v5039_v60  ;;  %v6810_v60 = vld [vmem:[#allocation7 + $0x20c] sm:$0xf] }
 0x110   :  { %1458 = vmatpush.bf16.msrb.mxu3 %v5167_v61  ;;  %v4956_v61 = vld [vmem:[#allocation7 + $0x218] sm:$0xf0]  ;;  %v7745_v19 = vpack.c.bf16 %v477_v32, %v477_v32 }
 0x111   :  { %1421 = vmatpush.bf16.msrb.mxu0 %v4751_v2  ;;  %1434 = vmatpush.bf16.msrb.mxu1 %v4879_v3  ;;  %v5570_v2 = vld [vmem:[#allocation9 + $0x2e0] sm:$0xf]  ;;  %v6967_v3 = vld [vmem:[#allocation9 + $0x2ec] sm:$0xf0]  ;;  %v4959_v7 = vor.u32 %v6810_v60, %v4956_v61 }
 0x112   :  { %v5571_v0 = vor.u32 %v6967_v3, %v5570_v2  ;;  %v5218_v60 = vld [vmem:[#allocation9 + $0x20] sm:$0xf]  ;;  %v6879_v61 = vld [vmem:[#allocation9 + $0x2c] sm:$0xf0]  ;;  %v5635_v3 = vor.u32 %v6983_v58, %v5634_v56  ;;  %v479_v56 = vmul.f32 %v7715_v47, %v7715_v47  ;;  %v6961_v58 = vld [vmem:[#allocation9 + $0x2c4] sm:$0xf] }
 0x113   :  { %1446 = vmatpush.bf16.msrb.mxu2 %v5023_v9  ;;  %v6895_v9 = vld [vmem:[#allocation9 + $0xac] sm:$0xf0] }
 0x114   :  { %1459 = vmatpush.bf16.msrb.mxu3 %v5151_v10  ;;  %v5087_v10 = vor.u32 %v6842_v62, %v5084_v1  ;;  %v5283_v54 = vor.u32 %v6895_v9, %v5282_v8  ;;  %v5346_v1 = vld [vmem:[#allocation9 + $0x120] sm:$0xf]  ;;  %v6911_v2 = vld [vmem:[#allocation9 + $0x12c] sm:$0xf0]  ;;  %v7755_v47 = vpack.c.bf16 %v479_v56, %v479_v56  ;;  %v5322_v56 = vld [vmem:[#allocation9 + $0xe8] sm:$0xf] }
 0x115   :  { %1422 = vmatpush.bf16.msrb.mxu0 %v4735_v12  ;;  %1435 = vmatpush.bf16.msrb.mxu1 %v4863_v13  ;;  %v6927_v12 = vld [vmem:[#allocation9 + $0x1ac] sm:$0xf0]  ;;  %v5699_v13 = vor.u32 %v6999_v6, %v5698_v5  ;;  %v5219_v5 = vor.u32 %v6879_v61, %v5218_v60  ;;  %v5618_v6 = vld [vmem:[#allocation9 + $0x340] sm:$0xf]  ;;  %v5347_v9 = vor.u32 %v6911_v2, %v5346_v1  ;;  %v6993_v61 = vld [vmem:[#allocation9 + $0x3c4] sm:$0xf] }
 0x116   :  { %v5411_v23 = vor.u32 %v6927_v12, %v5410_v11  ;;  %v5202_v8 = vld [vmem:[#allocation9] sm:$0xf]  ;;  %v6907_v11 = vld [vmem:[#allocation9 + $0x10c] sm:$0xf0]  ;;  %v6889_v2 = vld [vmem:[#allocation9 + $0x84] sm:$0xf] }
 0x117   :  { %1447 = vmatpush.bf16.msrb.mxu2 %v5007_v24  ;;  %v5266_v24 = vld [vmem:[#allocation9 + $0x80] sm:$0xf] }
 0x118   :  { %1460 = vmatpush.bf16.msrb.mxu3 %v5135_v26  ;;  %v6891_v26 = vld [vmem:[#allocation9 + $0x8c] sm:$0xf0] }
 0x119   :  { %1423 = vmatpush.bf16.msrb.mxu0 %v4719_v30  ;;  %1436 = vmatpush.bf16.msrb.mxu1 %v4847_v31  ;;  %v6959_v30 = vld [vmem:[#allocation9 + $0x2ac] sm:$0xf0]  ;;  %v5267_v31 = vor.u32 %v6891_v26, %v5266_v24  ;;  %v5602_v26 = vld [vmem:[#allocation9 + $0x320] sm:$0xf] }
 0x11b   :  { %1448 = vmatpush.bf16.msrb.mxu2 %v4991_v22  ;;  %v5378_v22 = vld [vmem:[#allocation9 + $0x160] sm:$0xf] }
 0x11c   :  { %1461 = vmatpush.bf16.msrb.mxu3 %v5119_v40  ;;  %v6955_v40 = vld [vmem:[#allocation9 + $0x28c] sm:$0xf0] }
 0x11d   :  { %1424 = vmatpush.bf16.msrb.mxu0 %v4703_v43  ;;  %1437 = vmatpush.bf16.msrb.mxu1 %v4831_v44  ;;  %v5379_v43 = vor.u32 %v6919_v38, %v5378_v22  ;;  %v5234_v44 = vld [vmem:[#allocation9 + $0x40] sm:$0xf]  ;;  %v5523_v17 = vor.u32 %v6955_v40, %v5522_v39  ;;  %v6939_v22 = vld [vmem:[#allocation9 + $0x20c] sm:$0xf0]  ;;  %v6965_v39 = vld [vmem:[#allocation9 + $0x2e4] sm:$0xf] }
 0x11e   :  { %v5586_v38 = vld [vmem:[#allocation9 + $0x300] sm:$0xf]  ;;  %v5572_v40 = vld [vmem:[#allocation9 + $0x2f0] sm:$0xf0] }
 0x11f   :  { %1449 = vmatpush.bf16.msrb.mxu2 %v4975_v52  ;;  %v6951_v52 = vld [vmem:[#allocation9 + $0x26c] sm:$0xf0] }
 0x120   :  { %1462 = vmatpush.bf16.msrb.mxu3 %v5103_v59  ;;  %1425 = vmatmul.bf16.vlgmr.msrb.gmra.mxu0 %v7701_v25  ;;  %v5555_v25 = vor.u32 %v6963_v15, %v5554_v53  ;;  %v5507_v62 = vor.u32 %v6951_v52, %v5506_v51  ;;  %v5316_v53 = vld [vmem:[#allocation9 + $0xf0] sm:$0xf0]  ;;  %v6933_v15 = vld [vmem:[#allocation9 + $0x1e4] sm:$0xf] }
 0x121   :  { %2246 = vmatpush.bf16.msra.mxu0 %v5315_v48  ;;  %2259 = vmatpush.bf16.msra.mxu1 %v5443_v50  ;;  %v6915_v48 = vld [vmem:[#allocation9 + $0x14c] sm:$0xf0]  ;;  %v5651_v50 = vor.u32 %v6987_v42, %v5650_v41  ;;  %v6997_v41 = vld [vmem:[#allocation9 + $0x3e4] sm:$0xf]  ;;  %v5700_v42 = vld [vmem:[#allocation9 + $0x3f0] sm:$0xf0] }
 0x122   :  { %1438 = vmatmul.bf16.vlgmr.msrb.gmra.mxu1 %v7708_v21  ;;  %v5538_v21 = vld [vmem:[#allocation9 + $0x2a0] sm:$0xf]  ;;  %v5363_v59 = vor.u32 %v6915_v48, %v5362_v46  ;;  %v5575_v48 = vor.u32 %v6965_v39, %v5572_v40  ;;  %v6925_v51 = vld [vmem:[#allocation9 + $0x1a4] sm:$0xf]  ;;  %v5412_v52 = vld [vmem:[#allocation9 + $0x1b0] sm:$0xf0] }
 0x123   :  { %1450 = vmatpush.bf16.msrb.mxu2 %v4959_v7  ;;  %v5539_v37 = vor.u32 %v6959_v30, %v5538_v21  ;;  %v6979_v7 = vld [vmem:[#allocation9 + $0x34c] sm:$0xf0]  ;;  %v6897_v21 = vld [vmem:[#allocation9 + $0xc4] sm:$0xf]  ;;  %v5447_v30 = vor.u32 %v6933_v15, %v5444_v18  ;;  %v5415_v1 = vor.u32 %v6925_v51, %v5412_v52  ;;  %v5332_v52 = vld [vmem:[#allocation9 + $0x110] sm:$0xf0] }
 0x124   :  { %1463 = vmatpush.bf16.msrb.mxu3 %v5087_v10  ;;  %v6875_v10 = vld [vmem:[#allocation9 + $0xc] sm:$0xf0]  ;;  %v6917_v15 = vld [vmem:[#allocation9 + $0x164] sm:$0xf] }
 0x125   :  { %2247 = vmatpush.bf16.msra.mxu0 %v5299_v63  ;;  %2260 = vmatpush.bf16.msra.mxu1 %v5427_v4  ;;  %v5490_v63 = vld [vmem:[#allocation9 + $0x240] sm:$0xf]  ;;  %v6947_v4 = vld [vmem:[#allocation9 + $0x24c] sm:$0xf0]  ;;  %v5203_v24 = vor.u32 %v6875_v10, %v5202_v8  ;;  %v5540_v8 = vld [vmem:[#allocation9 + $0x2b0] sm:$0xf0] }
 0x126   :  { %1451 = vmatmul.bf16.vlgmr.msrb.gmra.mxu2 %v7719_v49  ;;  %v5251_v49 = vor.u32 %v6887_v36, %v5250_v35  ;;  %v5491_v12 = vor.u32 %v6947_v4, %v5490_v63  ;;  %v5428_v35 = vld [vmem:[#allocation9 + $0x1d0] sm:$0xf0]  ;;  %v6921_v4 = vld [vmem:[#allocation9 + $0x184] sm:$0xf] }
 0x127   :  { %2272 = vmatpush.bf16.msra.mxu2 %v5571_v0  ;;  %1464 = vmatmul.bf16.vlgmr.msrb.gmra.mxu3 %v7723_v57  ;;  %v6883_v57 = vld [vmem:[#allocation9 + $0x4c] sm:$0xf0]  ;;  %v5330_v0 = vld [vmem:[#allocation9 + $0x100] sm:$0xf]  ;;  %v6989_v10 = vld [vmem:[#allocation9 + $0x3a4] sm:$0xf] }
 0x128   :  { %2285 = vmatpush.bf16.msra.mxu3 %v5699_v13  ;;  %v5235_v55 = vor.u32 %v6883_v57, %v5234_v44  ;;  %v6901_v13 = vld [vmem:[#allocation9 + $0xe4] sm:$0xf]  ;;  %v5331_v27 = vor.u32 %v6907_v11, %v5330_v0  ;;  %v5668_v0 = vld [vmem:[#allocation9 + $0x3b0] sm:$0xf0] }
 0x129   :  { %2248 = vmatpush.bf16.msra.mxu0 %v5283_v54  ;;  %2261 = vmatpush.bf16.msra.mxu1 %v5411_v23  ;;  %v5619_v54 = vor.u32 %v6979_v7, %v5618_v6  ;;  %v6943_v23 = vld [vmem:[#allocation9 + $0x22c] sm:$0xf0]  ;;  %v5319_v28 = vor.u32 %v6901_v13, %v5316_v53  ;;  %v6893_v57 = vld [vmem:[#allocation9 + $0xa4] sm:$0xf]  ;;  %v5252_v13 = vld [vmem:[#allocation9 + $0x70] sm:$0xf0]  ;;  %v5671_v18 = vor.u32 %v6989_v10, %v5668_v0 }
 0x12a   :  { %v6957_v7 = vld [vmem:[#allocation9 + $0x2a4] sm:$0xf]  ;;  %v5434_v10 = vld [vmem:[#allocation9 + $0x1c8] sm:$0xf]  ;;  %v6932_v0 = vld [vmem:[#allocation9 + $0x1d4] sm:$0xf0] }
 0x12b   :  { %2273 = vmatpush.bf16.msra.mxu2 %v5555_v25  ;;  %v6975_v25 = vld [vmem:[#allocation9 + $0x32c] sm:$0xf0]  ;;  %v5543_v53 = vor.u32 %v6957_v7, %v5540_v8  ;;  %v6909_v40 = vld [vmem:[#allocation9 + $0x124] sm:$0xf] }
 0x12c   :  { %2286 = vmatpush.bf16.msra.mxu3 %v5683_v29  ;;  %v476_v29 = vmul.f32 %v7689_v14, %v7689_v14  ;;  %v5603_v36 = vor.u32 %v6975_v25, %v5602_v26  ;;  %v6985_v26 = vld [vmem:[#allocation9 + $0x384] sm:$0xf]  ;;  %v5652_v25 = vld [vmem:[#allocation9 + $0x390] sm:$0xf0] }
 0x12d   :  { %2249 = vmatpush.bf16.msra.mxu0 %v5267_v31  ;;  %2262 = vmatpush.bf16.msra.mxu1 %v5395_v34  ;;  %v5475_v31 = vor.u32 %v6943_v23, %v5474_v20  ;;  %v6929_v34 = vld [vmem:[#allocation9 + $0x1c4] sm:$0xf]  ;;  %v5524_v23 = vld [vmem:[#allocation9 + $0x290] sm:$0xf0]  ;;  %v5655_v32 = vor.u32 %v6985_v26, %v5652_v25  ;;  %v5290_v26 = vld [vmem:[#allocation9 + $0xa8] sm:$0xf]  ;;  %v5435_v25 = vor.u32 %v6932_v0, %v5434_v10 }
 0x12e   :  { %v7743_v14 = vpack.c.bf16 %v476_v29, %v476_v29  ;;  %v6953_v20 = vld [vmem:[#allocation9 + $0x284] sm:$0xf]  ;;  %v5236_v29 = vld [vmem:[#allocation9 + $0x50] sm:$0xf0]  ;;  %v5370_v10 = vld [vmem:[#allocation9 + $0x148] sm:$0xf] }
 0x12f   :  { %2274 = vmatpush.bf16.msra.mxu2 %v5539_v37  ;;  %v5458_v37 = vld [vmem:[#allocation9 + $0x200] sm:$0xf]  ;;  %v6905_v51 = vld [vmem:[#allocation9 + $0x104] sm:$0xf]  ;;  %v6916_v0 = vld [vmem:[#allocation9 + $0x154] sm:$0xf0] }
 0x130   :  { %2287 = vmatpush.bf16.msra.mxu3 %v5667_v16  ;;  %v6971_v16 = vld [vmem:[#allocation9 + $0x30c] sm:$0xf0]  ;;  %v5459_v44 = vor.u32 %v6939_v22, %v5458_v37  ;;  %v5636_v37 = vld [vmem:[#allocation9 + $0x370] sm:$0xf0] }
 0x131   :  { %2250 = vmatpush.bf16.msra.mxu0 %v5251_v49  ;;  %2263 = vmatpush.bf16.msra.mxu1 %v5379_v43  ;;  %v5303_v49 = vor.u32 %v6897_v21, %v5300_v33  ;;  %v5431_v43 = vor.u32 %v6929_v34, %v5428_v35  ;;  %v5587_v46 = vor.u32 %v6971_v16, %v5586_v38  ;;  %v6949_v33 = vld [vmem:[#allocation9 + $0x264] sm:$0xf]  ;;  %v5508_v34 = vld [vmem:[#allocation9 + $0x270] sm:$0xf0] }
 0x132   :  { %v5527_v21 = vor.u32 %v6953_v20, %v5524_v23  ;;  %v6877_v38 = vld [vmem:[#allocation9 + $0x24] sm:$0xf]  ;;  %v5220_v16 = vld [vmem:[#allocation9 + $0x30] sm:$0xf0]  ;;  %v5511_v39 = vor.u32 %v6949_v33, %v5508_v34  ;;  %v5706_v23 = vld [vmem:[#allocation9 + $0x3e8] sm:$0xf] }
 0x133   :  { %2275 = vmatpush.bf16.msra.mxu2 %v5523_v17  ;;  %v5284_v17 = vld [vmem:[#allocation9 + $0xb0] sm:$0xf0]  ;;  %v5562_v34 = vld [vmem:[#allocation9 + $0x2c8] sm:$0xf] }
 0x134   :  { %2288 = vmatpush.bf16.msra.mxu3 %v5651_v50  ;;  %v478_v50 = vmul.f32 %v7713_v45, %v7713_v45  ;;  %v5287_v60 = vor.u32 %v6893_v57, %v5284_v17  ;;  %v6977_v57 = vld [vmem:[#allocation9 + $0x344] sm:$0xf]  ;;  %v5620_v17 = vld [vmem:[#allocation9 + $0x350] sm:$0xf0] }
 0x135   :  { %2251 = vmatpush.bf16.msra.mxu0 %v5235_v55  ;;  %2264 = vmatpush.bf16.msra.mxu1 %v5363_v59  ;;  %v5703_v55 = vor.u32 %v6997_v41, %v5700_v42  ;;  %v5556_v59 = vld [vmem:[#allocation9 + $0x2d0] sm:$0xf0]  ;;  %v6945_v42 = vld [vmem:[#allocation9 + $0x244] sm:$0xf] }
 0x136   :  { %v7753_v45 = vpack.c.bf16 %v478_v50, %v478_v50  ;;  %v5559_v63 = vor.u32 %v6961_v58, %v5556_v59  ;;  %v5204_v50 = vld [vmem:[#allocation9 + $0x10] sm:$0xf0]  ;;  %v6904_v58 = vld [vmem:[#allocation9 + $0xf4] sm:$0xf0]  ;;  %v5450_v59 = vld [vmem:[#allocation9 + $0x1e8] sm:$0xf] }
 0x137   :  { %2276 = vmatpush.bf16.msra.mxu2 %v5507_v62  ;;  %v5684_v62 = vld [vmem:[#allocation9 + $0x3d0] sm:$0xf0] }
 0x138   :  { %2289 = vmatpush.bf16.msra.mxu3 %v5635_v3  ;;  %v5268_v3 = vld [vmem:[#allocation9 + $0x90] sm:$0xf0]  ;;  %v5687_v6 = vor.u32 %v6993_v61, %v5684_v62  ;;  %v6936_v61 = vld [vmem:[#allocation9 + $0x1f4] sm:$0xf0]  ;;  %v6941_v62 = vld [vmem:[#allocation9 + $0x224] sm:$0xf] }
 0x139   :  { %2252 = vmatpush.bf16.msra.mxu0 %v5219_v5  ;;  %2265 = vmatpush.bf16.msra.mxu1 %v5347_v9  ;;  %v5396_v5 = vld [vmem:[#allocation9 + $0x190] sm:$0xf0]  ;;  %v5271_v9 = vor.u32 %v6889_v2, %v5268_v3  ;;  %v6973_v3 = vld [vmem:[#allocation9 + $0x324] sm:$0xf]  ;;  %v5451_v7 = vor.u32 %v6936_v61, %v5450_v59  ;;  %v5386_v61 = vld [vmem:[#allocation9 + $0x168] sm:$0xf] }
 0x13a   :  { %v5399_v11 = vor.u32 %v6921_v4, %v5396_v5  ;;  %v5335_v4 = vor.u32 %v6905_v51, %v5332_v52  ;;  %v5323_v5 = vor.u32 %v6904_v58, %v5322_v56  ;;  %v5674_v51 = vld [vmem:[#allocation9 + $0x3a8] sm:$0xf]  ;;  %v6992_v52 = vld [vmem:[#allocation9 + $0x3b4] sm:$0xf0] }
 0x13b   :  { %2277 = vmatpush.bf16.msra.mxu2 %v5491_v12  ;;  %v6885_v12 = vld [vmem:[#allocation9 + $0x64] sm:$0xf]  ;;  %v5258_v56 = vld [vmem:[#allocation9 + $0x68] sm:$0xf]  ;;  %v6888_v58 = vld [vmem:[#allocation9 + $0x74] sm:$0xf0] }
 0x13c   :  { %2290 = vmatpush.bf16.msra.mxu3 %v5619_v54  ;;  %v5380_v54 = vld [vmem:[#allocation9 + $0x170] sm:$0xf0] }
 0x13d   :  { %2253 = vmatpush.bf16.msra.mxu0 %v5203_v24  ;;  %2266 = vmatpush.bf16.msra.mxu1 %v5331_v27  ;;  %v5255_v24 = vor.u32 %v6885_v12, %v5252_v13  ;;  %v5383_v27 = vor.u32 %v6917_v15, %v5380_v54  ;;  %v6937_v12 = vld [vmem:[#allocation9 + $0x204] sm:$0xf]  ;;  %v5460_v13 = vld [vmem:[#allocation9 + $0x210] sm:$0xf0]  ;;  %v5578_v54 = vld [vmem:[#allocation9 + $0x2e8] sm:$0xf] }
 0x13e   :  { %v5588_v15 = vld [vmem:[#allocation9 + $0x310] sm:$0xf0] }
 0x13f   :  { %2278 = vmatpush.bf16.msra.mxu2 %v5475_v31  ;;  %v5364_v31 = vld [vmem:[#allocation9 + $0x150] sm:$0xf0] }
 0x140   :  { %2291 = vmatpush.bf16.msra.mxu3 %v5603_v36  ;;  %2254 = vmatmul.bf16.vlgmr.msra.gmra.mxu0 %v7743_v14  ;;  %v6981_v36 = vld [vmem:[#allocation9 + $0x364] sm:$0xf] }
 0x141   :  { %2298 = vmatpush.bf16.msrb.mxu0 %v5319_v28  ;;  %2311 = vmatpush.bf16.msrb.mxu1 %v5447_v30  ;;  %v6881_v28 = vld [vmem:[#allocation9 + $0x44] sm:$0xf]  ;;  %v5639_v41 = vor.u32 %v6981_v36, %v5636_v37 }
 0x142   :  { %2267 = vmatmul.bf16.vlgmr.msra.gmra.mxu1 %v7745_v19  ;;  %v6913_v30 = vld [vmem:[#allocation9 + $0x144] sm:$0xf]  ;;  %v5239_v35 = vor.u32 %v6881_v28, %v5236_v29  ;;  %v6896_v28 = vld [vmem:[#allocation9 + $0xb4] sm:$0xf0] }
 0x143   :  { %2279 = vmatpush.bf16.msra.mxu2 %v5459_v44  ;;  %v5367_v22 = vor.u32 %v6913_v30, %v5364_v31  ;;  %v5223_v44 = vor.u32 %v6877_v38, %v5220_v16  ;;  %v7759_v29 = vld [vmem:[#allocation13 + $0x2] ss:$8 sm:$0xf]  ;;  %v5291_v36 = vor.u32 %v6896_v28, %v5290_v26 }
 0x144   :  { %2292 = vmatpush.bf16.msra.mxu3 %v5587_v46  ;;  %v6873_v46 = vld [vmem:[#allocation9 + $0x4] sm:$0xf]  ;;  %v5418_v31 = vld [vmem:[#allocation9 + $0x1a8] sm:$0xf]  ;;  %v613_v37 = vperm.slane %v7759_v29, 0 }
 0x145   :  { %2299 = vmatpush.bf16.msrb.mxu0 %v5303_v49  ;;  %2312 = vmatpush.bf16.msrb.mxu1 %v5431_v43  ;;  %v5348_v49 = vld [vmem:[#allocation9 + $0x130] sm:$0xf0]  ;;  %v5207_v2 = vor.u32 %v6873_v46, %v5204_v50  ;;  %v6996_v38 = vld [vmem:[#allocation9 + $0x3d4] sm:$0xf0] }
 0x146   :  { %2280 = vmatmul.bf16.vlgmr.msra.gmra.mxu2 %v7753_v45  ;;  %v5492_v43 = vld [vmem:[#allocation9 + $0x250] sm:$0xf0]  ;;  %v6880_v26 = vld [vmem:[#allocation9 + $0x34] sm:$0xf0] }
 0x147   :  { %2324 = vmatpush.bf16.msrb.mxu2 %v5575_v48  ;;  %2293 = vmatmul.bf16.vlgmr.msra.gmra.mxu3 %v7755_v47  ;;  %v5351_v48 = vor.u32 %v6909_v40, %v5348_v49  ;;  %v6892_v40 = vld [vmem:[#allocation9 + $0x94] sm:$0xf0] }
 0x148   :  { %2337 = vmatpush.bf16.msrb.mxu3 %v5703_v55  ;;  %v5495_v55 = vor.u32 %v6945_v42, %v5492_v43  ;;  %v6924_v42 = vld [vmem:[#allocation9 + $0x194] sm:$0xf0] }
 0x149   :  { %2300 = vmatpush.bf16.msrb.mxu0 %v5287_v60  ;;  %2313 = vmatpush.bf16.msrb.mxu1 %v5415_v1  ;;  %v5623_v60 = vor.u32 %v6977_v57, %v5620_v17  ;;  %v5476_v1 = vld [vmem:[#allocation9 + $0x230] sm:$0xf0]  ;;  %v5546_v57 = vld [vmem:[#allocation9 + $0x2a8] sm:$0xf]  ;;  %v6960_v17 = vld [vmem:[#allocation9 + $0x2b4] sm:$0xf0] }
 0x14a   :  { %v5479_v8 = vor.u32 %v6941_v62, %v5476_v1  ;;  %v6920_v62 = vld [vmem:[#allocation9 + $0x174] sm:$0xf0]  ;;  %v5675_v1 = vor.u32 %v6992_v52, %v5674_v51 }
 0x14b   :  { %2325 = vmatpush.bf16.msrb.mxu2 %v5559_v63  ;;  %v5604_v63 = vld [vmem:[#allocation9 + $0x330] sm:$0xf0]  ;;  %v6912_v28 = vld [vmem:[#allocation9 + $0x134] sm:$0xf0] }
 0x14c   :  { %2338 = vmatpush.bf16.msrb.mxu3 %v5687_v6  ;;  %v5306_v6 = vld [vmem:[#allocation9 + $0xc8] sm:$0xf]  ;;  %v6944_v51 = vld [vmem:[#allocation9 + $0x234] sm:$0xf0] }
 0x14d   :  { %2301 = vmatpush.bf16.msrb.mxu0 %v5271_v9  ;;  %2314 = vmatpush.bf16.msrb.mxu1 %v5399_v11  ;;  %v6900_v9 = vld [vmem:[#allocation9 + $0xd4] sm:$0xf0]  ;;  %v5607_v11 = vor.u32 %v6973_v3, %v5604_v63  ;;  %v5259_v63 = vor.u32 %v6888_v58, %v5258_v56  ;;  %v5610_v58 = vld [vmem:[#allocation9 + $0x328] sm:$0xf] }
 0x14e   :  { %v5307_v20 = vor.u32 %v6900_v9, %v5306_v6  ;;  %v6956_v3 = vld [vmem:[#allocation9 + $0x294] sm:$0xf0]  ;;  %v5387_v6 = vor.u32 %v6920_v62, %v5386_v61  ;;  %v6898_v62 = vld [vmem:[#allocation9 + $0xcc] sm:$0xf] }
 0x14f   :  { %2326 = vmatpush.bf16.msrb.mxu2 %v5543_v53  ;;  %v6969_v53 = vld [vmem:[#allocation9 + $0x304] sm:$0xf] }
 0x150   :  { %2339 = vmatpush.bf16.msrb.mxu3 %v5671_v18  ;;  %v6968_v18 = vld [vmem:[#allocation9 + $0x2f4] sm:$0xf0] }
 0x151   :  { %2302 = vmatpush.bf16.msrb.mxu0 %v5255_v24  ;;  %2315 = vmatpush.bf16.msrb.mxu1 %v5383_v27  ;;  %v7000_v24 = vld [vmem:[#allocation9 + $0x3f4] sm:$0xf0]  ;;  %v5463_v27 = vor.u32 %v6937_v12, %v5460_v13  ;;  %v5579_v30 = vor.u32 %v6968_v18, %v5578_v54  ;;  %v5514_v13 = vld [vmem:[#allocation9 + $0x268] sm:$0xf] }
 0x152   :  { %v5707_v33 = vor.u32 %v7000_v24, %v5706_v23  ;;  %v5642_v18 = vld [vmem:[#allocation9 + $0x368] sm:$0xf]  ;;  %v5371_v23 = vor.u32 %v6916_v0, %v5370_v10  ;;  %v6972_v0 = vld [vmem:[#allocation9 + $0x314] sm:$0xf0] }
 0x153   :  { %2327 = vmatpush.bf16.msrb.mxu2 %v5527_v21  ;;  %v5591_v21 = vor.u32 %v6969_v53, %v5588_v15  ;;  %v6952_v53 = vld [vmem:[#allocation9 + $0x274] sm:$0xf0]  ;;  %v5226_v24 = vld [vmem:[#allocation9 + $0x28] sm:$0xf] }
 0x154   :  { %2340 = vmatpush.bf16.msrb.mxu3 %v5655_v32  ;;  %v6928_v32 = vld [vmem:[#allocation9 + $0x1b4] sm:$0xf0] }
 0x155   :  { %2303 = vmatpush.bf16.msrb.mxu0 %v5239_v35  ;;  %2316 = vmatpush.bf16.msrb.mxu1 %v5367_v22  ;;  %v6964_v35 = vld [vmem:[#allocation9 + $0x2d4] sm:$0xf0]  ;;  %v5690_v22 = vld [vmem:[#allocation9 + $0x3c8] sm:$0xf]  ;;  %v5419_v16 = vor.u32 %v6928_v32, %v5418_v31 }
 0x156   :  { %v5563_v49 = vor.u32 %v6964_v35, %v5562_v34  ;;  %v6948_v31 = vld [vmem:[#allocation9 + $0x254] sm:$0xf0]  ;;  %v5626_v32 = vld [vmem:[#allocation9 + $0x348] sm:$0xf]  ;;  %v5227_v34 = vor.u32 %v6880_v26, %v5226_v24  ;;  %v614_v35 = vperm.slane %v7759_v29, 1 }
 0x157   :  { %2328 = vmatpush.bf16.msrb.mxu2 %v5511_v39  ;;  %v5274_v39 = vld [vmem:[#allocation9 + $0x88] sm:$0xf]  ;;  %v5292_v24 = vld [vmem:[#allocation9 + $0xb8] sm:$0xf0] }
 0x158   :  { %2341 = vmatpush.bf16.msrb.mxu3 %v5639_v41  ;;  %v5402_v41 = vld [vmem:[#allocation9 + $0x188] sm:$0xf]  ;;  %v5275_v50 = vor.u32 %v6892_v40, %v5274_v39  ;;  %v6876_v39 = vld [vmem:[#allocation9 + $0x14] sm:$0xf0] }
 0x159   :  { %2304 = vmatpush.bf16.msrb.mxu0 %v5223_v44  ;;  %2317 = vmatpush.bf16.msrb.mxu1 %v5351_v48  ;;  %v5691_v44 = vor.u32 %v6996_v38, %v5690_v22  ;;  %v5338_v40 = vld [vmem:[#allocation9 + $0x108] sm:$0xf] }
 0x15b   :  { %2329 = vmatpush.bf16.msrb.mxu2 %v5495_v55  ;;  %v5403_v55 = vor.u32 %v6924_v42, %v5402_v41  ;;  %v6902_v42 = vld [vmem:[#allocation9 + $0xec] sm:$0xf] }
 0x15c   :  { %2342 = vmatpush.bf16.msrb.mxu3 %v5623_v60  ;;  %v1270_v43 = vpop.f32.mrf.mxu0  ;;  %v5547_v60 = vor.u32 %v6960_v17, %v5546_v57 }
 0x15d   :  { %2305 = vmatpush.bf16.msrb.mxu0 %v5207_v2  ;;  %2318 = vmatpush.bf16.msrb.mxu1 %v5335_v4  ;;  %v1271_v46 = vadd.f32 %v1270_v43, %v613_v37  ;;  %v1283_v48 = vpop.f32.mrf.mxu1  ;;  %v5530_v2 = vld [vmem:[#allocation9 + $0x288] sm:$0xf]  ;;  %v5324_v43 = vld [vmem:[#allocation9 + $0xf8] sm:$0xf0] }
 0x15e   :  { %v5658_v4 = vld [vmem:[#allocation9 + $0x388] sm:$0xf]  ;;  %v5531_v9 = vor.u32 %v6956_v3, %v5530_v2  ;;  %v5327_v61 = vor.u32 %v6902_v42, %v5324_v43  ;;  %v6958_v42 = vld [vmem:[#allocation9 + $0x2ac] sm:$0xf]  ;;  %v5548_v43 = vld [vmem:[#allocation9 + $0x2b8] sm:$0xf0] }
 0x15f   :  { %2330 = vmatpush.bf16.msrb.mxu2 %v5479_v8  ;;  %v1284_v59 = vadd.f32 %v1283_v48, %v1271_v46  ;;  %v6884_v8 = vld [vmem:[#allocation9 + $0x54] sm:$0xf0]  ;;  %v5210_v37 = vld [vmem:[#allocation9 + $0x8] sm:$0xf]  ;;  %v5452_v48 = vld [vmem:[#allocation9 + $0x1f8] sm:$0xf0] }
 0x160   :  { %2343 = vmatpush.bf16.msrb.mxu3 %v5607_v11  ;;  %2306 = vmatmul.bf16.vlgmr.msrb.gmra.mxu0 %v7743_v14  ;;  %v5211_v56 = vor.u32 %v6876_v39, %v5210_v37  ;;  %v6922_v39 = vld [vmem:[#allocation9 + $0x18c] sm:$0xf] }
 0x161   :  { %2350 = vmatpush.bf16.msra.mxu0 %v5323_v5  ;;  %2363 = vmatpush.bf16.msra.mxu1 %v5451_v7  ;;  %v6988_v5 = vld [vmem:[#allocation9 + $0x394] sm:$0xf0]  ;;  %v5242_v7 = vld [vmem:[#allocation9 + $0x48] sm:$0xf] }
 0x162   :  { %2319 = vmatmul.bf16.vlgmr.msrb.gmra.mxu1 %v7745_v19  ;;  %v5659_v12 = vor.u32 %v6988_v5, %v5658_v4  ;;  %v5243_v54 = vor.u32 %v6884_v8, %v5242_v7  ;;  %v6930_v4 = vld [vmem:[#allocation9 + $0x1cc] sm:$0xf]  ;;  %v5436_v5 = vld [vmem:[#allocation9 + $0x1d8] sm:$0xf0]  ;;  %v5466_v7 = vld [vmem:[#allocation9 + $0x208] sm:$0xf] }
 0x163   :  { %2331 = vmatpush.bf16.msrb.mxu2 %v5463_v27  ;;  %v5354_v27 = vld [vmem:[#allocation9 + $0x128] sm:$0xf]  ;;  %v6940_v8 = vld [vmem:[#allocation9 + $0x214] sm:$0xf0] }
 0x164   :  { %2344 = vmatpush.bf16.msrb.mxu3 %v5591_v21  ;;  %v1272_v11 = vpop.f32.mrf.mxu0 }
 0x165   :  { %2351 = vmatpush.bf16.msra.mxu0 %v5307_v20  ;;  %2364 = vmatpush.bf16.msra.mxu1 %v5435_v25  ;;  %v1285_v15 = vpop.f32.mrf.mxu1  ;;  %v6984_v20 = vld [vmem:[#allocation9 + $0x374] sm:$0xf0]  ;;  %v5515_v25 = vor.u32 %v6952_v53, %v5514_v13  ;;  %v6966_v11 = vld [vmem:[#allocation9 + $0x2ec] sm:$0xf] }
 0x166   :  { %2332 = vmatmul.bf16.vlgmr.msrb.gmra.mxu2 %v7753_v45  ;;  %v5643_v21 = vor.u32 %v6984_v20, %v5642_v18  ;;  %v6998_v15 = vld [vmem:[#allocation9 + $0x3ec] sm:$0xf]  ;;  %v5439_v18 = vor.u32 %v6930_v4, %v5436_v5  ;;  %v5467_v20 = vor.u32 %v6940_v8, %v5466_v7  ;;  %v5660_v7 = vld [vmem:[#allocation9 + $0x398] sm:$0xf0] }
 0x167   :  { %2376 = vmatpush.bf16.msra.mxu2 %v5579_v30  ;;  %2345 = vmatmul.bf16.vlgmr.msrb.gmra.mxu3 %v7755_v47  ;;  %v5498_v30 = vld [vmem:[#allocation9 + $0x248] sm:$0xf] }
 0x168   :  { %2389 = vmatpush.bf16.msra.mxu3 %v5707_v33  ;;  %v5499_v41 = vor.u32 %v6948_v31, %v5498_v30 }
 0x169   :  { %2352 = vmatpush.bf16.msra.mxu0 %v5291_v36  ;;  %2365 = vmatpush.bf16.msra.mxu1 %v5419_v16  ;;  %v1296_v33 = vpop.f32.mrf.mxu2  ;;  %v6980_v36 = vld [vmem:[#allocation9 + $0x354] sm:$0xf0]  ;;  %v5355_v16 = vor.u32 %v6912_v28, %v5354_v27  ;;  %v6926_v28 = vld [vmem:[#allocation9 + $0x1ac] sm:$0xf] }
 0x16a   :  { %v1297_v22 = vadd.f32 %v1296_v33, %v1284_v59  ;;  %v1309_v38 = vpop.f32.mrf.mxu3  ;;  %v5627_v46 = vor.u32 %v6980_v36, %v5626_v32  ;;  %v6976_v59 = vld [vmem:[#allocation9 + $0x334] sm:$0xf0]  ;;  %v6962_v32 = vld [vmem:[#allocation9 + $0x2cc] sm:$0xf]  ;;  %v5564_v33 = vld [vmem:[#allocation9 + $0x2d8] sm:$0xf0] }
 0x16b   :  { %2377 = vmatpush.bf16.msra.mxu2 %v5563_v49  ;;  %v6908_v49 = vld [vmem:[#allocation9 + $0x114] sm:$0xf0]  ;;  %v5692_v36 = vld [vmem:[#allocation9 + $0x3d8] sm:$0xf0] }
 0x16c   :  { %2390 = vmatpush.bf16.msra.mxu3 %v5691_v44  ;;  %v6934_v44 = vld [vmem:[#allocation9 + $0x1ec] sm:$0xf]  ;;  %v7767_v57 = vadd.f32 %v1309_v38, %v1297_v22  ;;  %v1322_v17 = vpop.f32.mrf.mxu0  ;;  %v5276_v38 = vld [vmem:[#allocation9 + $0x98] sm:$0xf0] }
 0x16d   :  { %2353 = vmatpush.bf16.msra.mxu0 %v5275_v50  ;;  %2366 = vmatpush.bf16.msra.mxu1 %v5403_v55  ;;  %v5482_v50 = vld [vmem:[#allocation9 + $0x228] sm:$0xf]  ;;  %v1323_v52 = vadd.f32 %v1322_v17, %v614_v35  ;;  %v1335_v55 = vpop.f32.mrf.mxu1  ;;  %v5455_v2 = vor.u32 %v6934_v44, %v5452_v48  ;;  %v6994_v35 = vld [vmem:[#allocation9 + $0x3cc] sm:$0xf] }
 0x16e   :  { %v5483_v3 = vor.u32 %v6944_v51, %v5482_v50  ;;  %v6890_v22 = vld [vmem:[#allocation9 + $0x8c] sm:$0xf]  ;;  %v5676_v51 = vld [vmem:[#allocation9 + $0x3b8] sm:$0xf0] }
 0x16f   :  { %2378 = vmatpush.bf16.msra.mxu2 %v5547_v60  ;;  %v5339_v60 = vor.u32 %v6908_v49, %v5338_v40  ;;  %v5404_v40 = vld [vmem:[#allocation9 + $0x198] sm:$0xf0]  ;;  %v5279_v48 = vor.u32 %v6890_v22, %v5276_v38  ;;  %v6990_v50 = vld [vmem:[#allocation9 + $0x3ac] sm:$0xf] }
 0x170   :  { %2391 = vmatpush.bf16.msra.mxu3 %v5675_v1  ;;  %v1336_v1 = vadd.f32 %v1335_v55, %v1323_v52  ;;  %v5407_v52 = vor.u32 %v6922_v39, %v5404_v40  ;;  %v6886_v55 = vld [vmem:[#allocation9 + $0x6c] sm:$0xf]  ;;  %v5628_v38 = vld [vmem:[#allocation9 + $0x358] sm:$0xf0] }
 0x171   :  { %2354 = vmatpush.bf16.msra.mxu0 %v5259_v63  ;;  %2367 = vmatpush.bf16.msra.mxu1 %v5387_v6  ;;  %v5308_v63 = vld [vmem:[#allocation9 + $0xd8] sm:$0xf0]  ;;  %v5611_v6 = vor.u32 %v6976_v59, %v5610_v58  ;;  %v1298_v10 = vpop.f32.mrf.mxu2  ;;  %v5551_v59 = vor.u32 %v6958_v42, %v5548_v43  ;;  %v6978_v22 = vld [vmem:[#allocation9 + $0x34c] sm:$0xf] }
 0x172   :  { %v1311_v13 = vpop.f32.mrf.mxu3  ;;  %v5311_v53 = vor.u32 %v6898_v62, %v5308_v63  ;;  %v5244_v10 = vld [vmem:[#allocation9 + $0x58] sm:$0xf0]  ;;  %v6874_v39 = vld [vmem:[#allocation9 + $0xc] sm:$0xf] }
 0x173   :  { %2379 = vmatpush.bf16.msra.mxu2 %v5531_v9  ;;  %v5594_v9 = vld [vmem:[#allocation9 + $0x308] sm:$0xf]  ;;  %v5372_v13 = vld [vmem:[#allocation9 + $0x158] sm:$0xf0]  ;;  %v6942_v43 = vld [vmem:[#allocation9 + $0x22c] sm:$0xf] }
 0x174   :  { %2392 = vmatpush.bf16.msra.mxu3 %v5659_v12  ;;  %v5580_v12 = vld [vmem:[#allocation9 + $0x2f8] sm:$0xf0]  ;;  %v1324_v26 = vpop.f32.mrf.mxu0 }
 0x175   :  { %2355 = vmatpush.bf16.msra.mxu0 %v5243_v54  ;;  %2368 = vmatpush.bf16.msra.mxu1 %v5371_v23  ;;  %v5708_v54 = vld [vmem:[#allocation9 + $0x3f8] sm:$0xf0]  ;;  %v6894_v23 = vld [vmem:[#allocation9 + $0xac] sm:$0xf]  ;;  %v5583_v27 = vor.u32 %v6966_v11, %v5580_v12  ;;  %v1337_v30 = vpop.f32.mrf.mxu1 }
 0x176   :  { %v5711_v31 = vor.u32 %v6998_v15, %v5708_v54  ;;  %v6914_v12 = vld [vmem:[#allocation9 + $0x14c] sm:$0xf]  ;;  %v5644_v26 = vld [vmem:[#allocation9 + $0x378] sm:$0xf0] }
 0x177   :  { %2380 = vmatpush.bf16.msra.mxu2 %v5515_v25  ;;  %v5595_v25 = vor.u32 %v6972_v0, %v5594_v9  ;;  %v6882_v9 = vld [vmem:[#allocation9 + $0x4c] sm:$0xf]  ;;  %v5212_v40 = vld [vmem:[#allocation9 + $0x18] sm:$0xf0] }
 0x178   :  { %2393 = vmatpush.bf16.msra.mxu3 %v5643_v21  ;;  %v5420_v21 = vld [vmem:[#allocation9 + $0x1b8] sm:$0xf0]  ;;  %v6950_v54 = vld [vmem:[#allocation9 + $0x26c] sm:$0xf] }
 0x179   :  { %2356 = vmatpush.bf16.msra.mxu0 %v5227_v34  ;;  %2369 = vmatpush.bf16.msra.mxu1 %v5355_v16  ;;  %v5295_v34 = vor.u32 %v6894_v23, %v5292_v24  ;;  %v5423_v37 = vor.u32 %v6926_v28, %v5420_v21  ;;  %v5567_v16 = vor.u32 %v6962_v32, %v5564_v33  ;;  %v1348_v49 = vpop.f32.mrf.mxu2  ;;  %v6982_v24 = vld [vmem:[#allocation9 + $0x36c] sm:$0xf]  ;;  %v5228_v28 = vld [vmem:[#allocation9 + $0x38] sm:$0xf0] }
 0x17a   :  { %v1349_v44 = vadd.f32 %v1348_v49, %v1336_v1  ;;  %v1361_v17 = vpop.f32.mrf.mxu3  ;;  %v5679_v1 = vor.u32 %v6990_v50, %v5676_v51  ;;  %v5247_v23 = vor.u32 %v6882_v9, %v5244_v10  ;;  %v6910_v30 = vld [vmem:[#allocation9 + $0x12c] sm:$0xf]  ;;  %v5647_v33 = vor.u32 %v6982_v24, %v5644_v26  ;;  %v5340_v42 = vld [vmem:[#allocation9 + $0x118] sm:$0xf0]  ;;  %v5794_v10 = vld [vmem:[#allocation10 + $0xa0] sm:$0xf] }
 0x17b   :  { %2381 = vmatpush.bf16.msra.mxu2 %v5499_v41  ;;  %v5695_v41 = vor.u32 %v6994_v35, %v5692_v36  ;;  %v5500_v35 = vld [vmem:[#allocation9 + $0x258] sm:$0xf0]  ;;  %v7015_v24 = vld [vmem:[#allocation10 + $0x6c] sm:$0xf0] }
 0x17c   :  { %2394 = vmatpush.bf16.msra.mxu3 %v5627_v46  ;;  %v615_v46 = vperm.slane %v7759_v29, 2  ;;  %v7774_v58 = vadd.f32 %v1361_v17, %v1349_v44  ;;  %v5631_v44 = vor.u32 %v6978_v22, %v5628_v38  ;;  %v5484_v17 = vld [vmem:[#allocation9 + $0x238] sm:$0xf0]  ;;  %v5954_v38 = vld [vmem:[#allocation10 + $0x1e0] sm:$0xf] }
 0x17d   :  { %2357 = vmatpush.bf16.msra.mxu0 %v5211_v56  ;;  %2370 = vmatpush.bf16.msra.mxu1 %v5339_v60  ;;  %v5260_v56 = vld [vmem:[#allocation9 + $0x78] sm:$0xf0]  ;;  %v6918_v60 = vld [vmem:[#allocation9 + $0x16c] sm:$0xf]  ;;  %v1374_v62 = vpop.f32.mrf.mxu0 }
 0x17e   :  { %v1375_v63 = vadd.f32 %v1374_v62, %v615_v46  ;;  %v5263_v5 = vor.u32 %v6886_v55, %v5260_v56  ;;  %v5826_v46 = vld [vmem:[#allocation10 + $0xe0] sm:$0xf]  ;;  %v6974_v55 = vld [vmem:[#allocation9 + $0x32c] sm:$0xf]  ;;  %v5612_v56 = vld [vmem:[#allocation9 + $0x338] sm:$0xf0]  ;;  %v5487_v62 = vor.u32 %v6942_v43, %v5484_v17 }
 0x17f   :  { %2382 = vmatpush.bf16.msra.mxu2 %v5483_v3  ;;  %v5532_v3 = vld [vmem:[#allocation9 + $0x298] sm:$0xf0]  ;;  %v1387_v4 = vpop.f32.mrf.mxu1  ;;  %v5938_v43 = vld [vmem:[#allocation10 + $0x1c0] sm:$0xf]  ;;  %v7025_v17 = vld [vmem:[#allocation10 + $0xc4] sm:$0xf] }
 0x180   :  { %2395 = vmatpush.bf16.msra.mxu3 %v5611_v6  ;;  %2358 = vmatmul.bf16.vlgmr.msra.gmra.mxu0 %v7743_v14  ;;  %v6986_v6 = vld [vmem:[#allocation9 + $0x38c] sm:$0xf]  ;;  %v1388_v0 = vadd.f32 %v1387_v4, %v1375_v63  ;;  %v5468_v63 = vld [vmem:[#allocation9 + $0x218] sm:$0xf0] }
 0x181   :  { %2402 = vmatpush.bf16.msrb.mxu0 %v5327_v61  ;;  %2415 = vmatpush.bf16.msrb.mxu1 %v5455_v2  ;;  %v5388_v61 = vld [vmem:[#allocation9 + $0x178] sm:$0xf0]  ;;  %v6954_v2 = vld [vmem:[#allocation9 + $0x28c] sm:$0xf]  ;;  %v5663_v15 = vor.u32 %v6986_v6, %v5660_v7  ;;  %v5810_v6 = vld [vmem:[#allocation10 + $0xc0] sm:$0xf] }
 0x182   :  { %2371 = vmatmul.bf16.vlgmr.msra.gmra.mxu1 %v7745_v19  ;;  %v5391_v8 = vor.u32 %v6918_v60, %v5388_v61  ;;  %v5535_v11 = vor.u32 %v6954_v2, %v5532_v3  ;;  %v5615_v2 = vor.u32 %v6974_v55, %v5612_v56  ;;  %v6938_v3 = vld [vmem:[#allocation9 + $0x20c] sm:$0xf]  ;;  %v7027_v7 = vld [vmem:[#allocation10 + $0xcc] sm:$0xf0]  ;;  %v5922_v55 = vld [vmem:[#allocation10 + $0x1a0] sm:$0xf] }
 0x183   :  { %2383 = vmatpush.bf16.msra.mxu2 %v5467_v20  ;;  %v1363_v20 = vpop.f32.mrf.mxu3  ;;  %v6970_v4 = vld [vmem:[#allocation9 + $0x30c] sm:$0xf]  ;;  %v5811_v9 = vor.u32 %v7027_v7, %v5810_v6  ;;  %v7055_v56 = vld [vmem:[#allocation10 + $0x1ac] sm:$0xf0] }
 0x184   :  { %2396 = vmatpush.bf16.msra.mxu3 %v5595_v25  ;;  %v5375_v25 = vor.u32 %v6914_v12, %v5372_v13  ;;  %v7785_v6 = vld [vmem:[#allocation13 + $0x3] ss:$8 sm:$0xf] }
 0x185   :  { %2403 = vmatpush.bf16.msrb.mxu0 %v5311_v53  ;;  %2416 = vmatpush.bf16.msrb.mxu1 %v5439_v18  ;;  %v1350_v53 = vpop.f32.mrf.mxu2  ;;  %v5516_v18 = vld [vmem:[#allocation9 + $0x278] sm:$0xf0]  ;;  %v1376_v32 = vpop.f32.mrf.mxu0 }
 0x186   :  { %2384 = vmatmul.bf16.vlgmr.msra.gmra.mxu2 %v7753_v45  ;;  %v5519_v21 = vor.u32 %v6950_v54, %v5516_v18  ;;  %v5778_v54 = vld [vmem:[#allocation10 + $0x80] sm:$0xf]  ;;  %v7019_v18 = vld [vmem:[#allocation10 + $0x8c] sm:$0xf0] }
 0x187   :  { %2428 = vmatpush.bf16.msrb.mxu2 %v5583_v27  ;;  %2397 = vmatmul.bf16.vlgmr.msra.gmra.mxu3 %v7755_v47  ;;  %v6878_v27 = vld [vmem:[#allocation9 + $0x2c] sm:$0xf]  ;;  %v1389_v36 = vpop.f32.mrf.mxu1  ;;  %v5779_v20 = vor.u32 %v7019_v18, %v5778_v54  ;;  %v7007_v32 = vld [vmem:[#allocation10 + $0x2c] sm:$0xf0]  ;;  %v5874_v54 = vld [vmem:[#allocation10 + $0x140] sm:$0xf] }
 0x188   :  { %2441 = vmatpush.bf16.msrb.mxu3 %v5711_v31  ;;  %v5356_v31 = vld [vmem:[#allocation9 + $0x138] sm:$0xf0]  ;;  %v5714_v36 = vld [vmem:[#allocation10] sm:$0xf]  ;;  %v7043_v18 = vld [vmem:[#allocation10 + $0x14c] sm:$0xf0] }
 0x189   :  { %2404 = vmatpush.bf16.msrb.mxu0 %v5295_v34  ;;  %2417 = vmatpush.bf16.msrb.mxu1 %v5423_v37  ;;  %v6946_v34 = vld [vmem:[#allocation9 + $0x24c] sm:$0xf]  ;;  %v5231_v37 = vor.u32 %v6878_v27, %v5228_v28  ;;  %v5746_v28 = vld [vmem:[#allocation10 + $0x40] sm:$0xf] }
 0x18a   :  { %v5503_v49 = vor.u32 %v6946_v34, %v5500_v35 }
 0x18b   :  { %2429 = vmatpush.bf16.msrb.mxu2 %v5567_v16  ;;  %v5359_v16 = vor.u32 %v6910_v30, %v5356_v31  ;;  %v1413_v51 = vpop.f32.mrf.mxu3  ;;  %v5730_v31 = vld [vmem:[#allocation10 + $0x20] sm:$0xf] }
 0x18c   :  { %2442 = vmatpush.bf16.msrb.mxu3 %v5695_v41  ;;  %v6906_v41 = vld [vmem:[#allocation9 + $0x10c] sm:$0xf] }
 0x18d   :  { %2405 = vmatpush.bf16.msrb.mxu0 %v5279_v48  ;;  %2418 = vmatpush.bf16.msrb.mxu1 %v5407_v52  ;;  %v7031_v48 = vld [vmem:[#allocation10 + $0xec] sm:$0xf0]  ;;  %v1400_v50 = vpop.f32.mrf.mxu2  ;;  %v5215_v52 = vor.u32 %v6874_v39, %v5212_v40  ;;  %v5343_v60 = vor.u32 %v6906_v41, %v5340_v42  ;;  %v7029_v39 = vld [vmem:[#allocation10 + $0xe4] sm:$0xf]  ;;  %v5828_v41 = vld [vmem:[#allocation10 + $0xf0] sm:$0xf0] }
 0x18e   :  { %v5827_v61 = vor.u32 %v7031_v48, %v5826_v46  ;;  %v5831_v42 = vor.u32 %v7029_v39, %v5828_v41  ;;  %v5812_v48 = vld [vmem:[#allocation10 + $0xd0] sm:$0xf0] }
 0x18f   :  { %2430 = vmatpush.bf16.msrb.mxu2 %v5551_v59  ;;  %v1401_v59 = vadd.f32 %v1400_v50, %v1388_v0  ;;  %v7023_v0 = vld [vmem:[#allocation10 + $0xac] sm:$0xf0] }
 0x190   :  { %2443 = vmatpush.bf16.msrb.mxu3 %v5679_v1  ;;  %v5795_v53 = vor.u32 %v7023_v0, %v5794_v10  ;;  %v7047_v10 = vld [vmem:[#allocation10 + $0x16c] sm:$0xf0]  ;;  %v7013_v0 = vld [vmem:[#allocation10 + $0x64] sm:$0xf] }
 0x191   :  { %2406 = vmatpush.bf16.msrb.mxu0 %v5263_v5  ;;  %2419 = vmatpush.bf16.msrb.mxu1 %v5391_v8  ;;  %v7776_v1 = vadd.f32 %v1413_v51, %v1401_v59  ;;  %v5596_v5 = vld [vmem:[#allocation9 + $0x318] sm:$0xf0]  ;;  %v5471_v8 = vor.u32 %v6938_v3, %v5468_v63  ;;  %v5815_v51 = vor.u32 %v7025_v17, %v5812_v48  ;;  %v7021_v59 = vld [vmem:[#allocation10 + $0xa4] sm:$0xf]  ;;  %v7051_v3 = vld [vmem:[#allocation10 + $0x18c] sm:$0xf0] }
 0x192   :  { %v7017_v63 = vld [vmem:[#allocation10 + $0x84] sm:$0xf]  ;;  %v7091_v48 = vld [vmem:[#allocation10 + $0x2cc] sm:$0xf0] }
 0x193   :  { %2431 = vmatpush.bf16.msrb.mxu2 %v5535_v11  ;;  %v5599_v11 = vor.u32 %v6970_v4, %v5596_v5  ;;  %v1415_v13 = vpop.f32.mrf.mxu3  ;;  %v5780_v5 = vld [vmem:[#allocation10 + $0x90] sm:$0xf0] }
 0x194   :  { %2444 = vmatpush.bf16.msrb.mxu3 %v5663_v15  ;;  %v616_v15 = vperm.slane %v7759_v29, 3  ;;  %v5783_v7 = vor.u32 %v7017_v63, %v5780_v5  ;;  %v5764_v13 = vld [vmem:[#allocation10 + $0x70] sm:$0xf0] }
 0x195   :  { %2407 = vmatpush.bf16.msrb.mxu0 %v5247_v23  ;;  %2420 = vmatpush.bf16.msrb.mxu1 %v5375_v25  ;;  %v1402_v12 = vpop.f32.mrf.mxu2  ;;  %v5762_v23 = vld [vmem:[#allocation10 + $0x60] sm:$0xf] }
 0x196   :  { %v5763_v25 = vor.u32 %v7015_v24, %v5762_v23  ;;  %v5748_v23 = vld [vmem:[#allocation10 + $0x50] sm:$0xf0] }
 0x197   :  { %2432 = vmatpush.bf16.msrb.mxu2 %v5519_v21  ;;  %v7011_v21 = vld [vmem:[#allocation10 + $0x4c] sm:$0xf0] }
 0x198   :  { %2445 = vmatpush.bf16.msrb.mxu3 %v5647_v33  ;;  %v5731_v33 = vor.u32 %v7007_v32, %v5730_v31 }
 0x199   :  { %2408 = vmatpush.bf16.msrb.mxu0 %v5231_v37  ;;  %2421 = vmatpush.bf16.msrb.mxu1 %v5359_v16  ;;  %v7003_v37 = vld [vmem:[#allocation10 + $0xc] sm:$0xf0] }
 0x19a   :  { %v5715_v22 = vor.u32 %v7003_v37, %v5714_v36  ;;  %v7063_v16 = vld [vmem:[#allocation10 + $0x1ec] sm:$0xf0]  ;;  %v7001_v36 = vld [vmem:[#allocation10 + $0x4] sm:$0xf] }
 0x19b   :  { %2433 = vmatpush.bf16.msrb.mxu2 %v5503_v49  ;;  %v5955_v49 = vor.u32 %v7063_v16, %v5954_v38  ;;  %v6082_v38 = vld [vmem:[#allocation10 + $0x2e0] sm:$0xf]  ;;  %v7095_v16 = vld [vmem:[#allocation10 + $0x2ec] sm:$0xf0] }
 0x19c   :  { %2446 = vmatpush.bf16.msrb.mxu3 %v5631_v44  ;;  %v7059_v44 = vld [vmem:[#allocation10 + $0x1cc] sm:$0xf0]  ;;  %v6083_v41 = vor.u32 %v7095_v16, %v6082_v38  ;;  %v7037_v38 = vld [vmem:[#allocation10 + $0x124] sm:$0xf] }
 0x19d   :  { %2409 = vmatpush.bf16.msrb.mxu0 %v5215_v52  ;;  %2422 = vmatpush.bf16.msrb.mxu1 %v5343_v60  ;;  %v5939_v46 = vor.u32 %v7059_v44, %v5938_v43  ;;  %v5923_v60 = vor.u32 %v7055_v56, %v5922_v55  ;;  %v5956_v43 = vld [vmem:[#allocation10 + $0x1f0] sm:$0xf0] }
 0x19f   :  { %2434 = vmatpush.bf16.msrb.mxu2 %v5487_v62  ;;  %v1439_v26 = vpop.f32.mrf.mxu1 }
 0x1a0   :  { %2447 = vmatpush.bf16.msrb.mxu3 %v5615_v2  ;;  %2410 = vmatmul.bf16.vlgmr.msrb.gmra.mxu0 %v7743_v14  ;;  %v1426_v14 = vpop.f32.mrf.mxu0  ;;  %v5906_v2 = vld [vmem:[#allocation10 + $0x180] sm:$0xf] }
 0x1a1   :  { %3315 = vmatpush.bf16.msra.mxu0 %v5827_v61  ;;  %2423 = vmatmul.bf16.vlgmr.msrb.gmra.mxu1 %v7745_v19  ;;  %v1427_v19 = vadd.f32 %v1426_v14, %v616_v15  ;;  %v5796_v61 = vld [vmem:[#allocation10 + $0xb0] sm:$0xf0]  ;;  %v5907_v4 = vor.u32 %v7051_v3, %v5906_v2  ;;  %v1598_v15 = vperm.slane %v7785_v6, 0  ;;  %v5875_v14 = vor.u32 %v7043_v18, %v5874_v54 }
 0x1a2   :  { %3328 = vmatpush.bf16.msra.mxu1 %v5955_v49  ;;  %v5799_v62 = vor.u32 %v7021_v59, %v5796_v61  ;;  %v7087_v61 = vld [vmem:[#allocation10 + $0x2ac] sm:$0xf0]  ;;  %v5924_v3 = vld [vmem:[#allocation10 + $0x1b0] sm:$0xf0] }
 0x1a3   :  { %2435 = vmatpush.bf16.msrb.mxu2 %v5471_v8  ;;  %v1440_v27 = vadd.f32 %v1439_v26, %v1427_v19 }
 0x1a4   :  { %2448 = vmatpush.bf16.msrb.mxu3 %v5599_v11 }
 0x1a5   :  { %3316 = vmatpush.bf16.msra.mxu0 %v5811_v9  ;;  %v5890_v9 = vld [vmem:[#allocation10 + $0x160] sm:$0xf] }
 0x1a6   :  { %2436 = vmatmul.bf16.vlgmr.msrb.gmra.mxu2 %v7753_v45  ;;  %v5747_v45 = vor.u32 %v7011_v21, %v5746_v28  ;;  %3329 = vmatpush.bf16.msra.mxu1 %v5939_v46  ;;  %v5891_v12 = vor.u32 %v7047_v10, %v5890_v9  ;;  %v7039_v28 = vld [vmem:[#allocation10 + $0x12c] sm:$0xf0]  ;;  %v7005_v21 = vld [vmem:[#allocation10 + $0x24] sm:$0xf]  ;;  %v6066_v46 = vld [vmem:[#allocation10 + $0x2c0] sm:$0xf] }
 0x1a7   :  { %2449 = vmatmul.bf16.vlgmr.msrb.gmra.mxu3 %v7755_v47  ;;  %v1441_v29 = vpop.f32.mrf.mxu1  ;;  %3341 = vmatpush.bf16.msra.mxu2 %v6083_v41  ;;  %v6067_v55 = vor.u32 %v7091_v48, %v6066_v46  ;;  %v7049_v9 = vld [vmem:[#allocation10 + $0x184] sm:$0xf]  ;;  %v5834_v46 = vld [vmem:[#allocation10 + $0xe8] sm:$0xf]  ;;  %v7032_v48 = vld [vmem:[#allocation10 + $0xf4] sm:$0xf0] }
 0x1a8   :  { %v1428_v30 = vpop.f32.mrf.mxu0 }
 0x1a9   :  { %3317 = vmatpush.bf16.msra.mxu0 %v5795_v53  ;;  %v1452_v47 = vpop.f32.mrf.mxu2  ;;  %v5767_v53 = vor.u32 %v7013_v0, %v5764_v13  ;;  %v5732_v30 = vld [vmem:[#allocation10 + $0x30] sm:$0xf0] }
 0x1aa   :  { %v1453_v34 = vadd.f32 %v1452_v47, %v1440_v27  ;;  %v1465_v35 = vpop.f32.mrf.mxu3  ;;  %3330 = vmatpush.bf16.msra.mxu1 %v5923_v60  ;;  %v5858_v27 = vld [vmem:[#allocation10 + $0x120] sm:$0xf]  ;;  %v5735_v31 = vor.u32 %v7005_v21, %v5732_v30  ;;  %v5908_v0 = vld [vmem:[#allocation10 + $0x190] sm:$0xf0]  ;;  %v7041_v21 = vld [vmem:[#allocation10 + $0x144] sm:$0xf] }
 0x1ab   :  { %3342 = vmatpush.bf16.msra.mxu2 %v6067_v55  ;;  %v6050_v60 = vld [vmem:[#allocation10 + $0x2a0] sm:$0xf]  ;;  %v5876_v30 = vld [vmem:[#allocation10 + $0x150] sm:$0xf0]  ;;  %v7067_v55 = vld [vmem:[#allocation10 + $0x20c] sm:$0xf0] }
 0x1ac   :  { %v7783_v40 = vadd.f32 %v1465_v35, %v1453_v34  ;;  %v5842_v34 = vld [vmem:[#allocation10 + $0x100] sm:$0xf]  ;;  %v7035_v35 = vld [vmem:[#allocation10 + $0x10c] sm:$0xf0]  ;;  %v6051_v2 = vor.u32 %v7087_v61, %v6050_v60  ;;  %v5844_v60 = vld [vmem:[#allocation10 + $0x110] sm:$0xf0] }
 0x1ad   :  { %3318 = vmatpush.bf16.msra.mxu0 %v5779_v20  ;;  %v7009_v20 = vld [vmem:[#allocation10 + $0x44] sm:$0xf]  ;;  %v5843_v37 = vor.u32 %v7035_v35, %v5842_v34 }
 0x1ae   :  { %3331 = vmatpush.bf16.msra.mxu1 %v5907_v4  ;;  %v5751_v19 = vor.u32 %v7009_v20, %v5748_v23  ;;  %v5892_v23 = vld [vmem:[#allocation10 + $0x170] sm:$0xf0] }
 0x1af   :  { %3343 = vmatpush.bf16.msra.mxu2 %v6051_v2 }
 0x1b1   :  { %3319 = vmatpush.bf16.msra.mxu0 %v5763_v25  ;;  %v1454_v50 = vpop.f32.mrf.mxu2 }
 0x1b2   :  { %v1467_v52 = vpop.f32.mrf.mxu3  ;;  %3332 = vmatpush.bf16.msra.mxu1 %v5891_v12  ;;  %v7057_v50 = vld [vmem:[#allocation10 + $0x1c4] sm:$0xf]  ;;  %v5911_v12 = vor.u32 %v7049_v9, %v5908_v0  ;;  %v7028_v0 = vld [vmem:[#allocation10 + $0xd4] sm:$0xf0] }
 0x1b5   :  { %3320 = vmatpush.bf16.msra.mxu0 %v5747_v45  ;;  %v5859_v45 = vor.u32 %v7039_v28, %v5858_v27  ;;  %v6002_v27 = vld [vmem:[#allocation10 + $0x240] sm:$0xf]  ;;  %v7075_v28 = vld [vmem:[#allocation10 + $0x24c] sm:$0xf0] }
 0x1b6   :  { %3333 = vmatpush.bf16.msra.mxu1 %v5875_v14  ;;  %v7045_v14 = vld [vmem:[#allocation10 + $0x164] sm:$0xf] }
 0x1b9   :  { %3321 = vmatpush.bf16.msra.mxu0 %v5731_v33 }
 0x1ba   :  { %3334 = vmatpush.bf16.msra.mxu1 %v5859_v45  ;;  %v6003_v45 = vor.u32 %v7075_v28, %v6002_v27  ;;  %v7085_v27 = vld [vmem:[#allocation10 + $0x2a4] sm:$0xf] }
 0x1bd   :  { %3322 = vmatpush.bf16.msra.mxu0 %v5715_v22  ;;  %v2255_v8 = vpop.f32.mrf.mxu0  ;;  %v5716_v22 = vld [vmem:[#allocation10 + $0x10] sm:$0xf0] }
 0x1be   :  { %v2256_v24 = vadd.f32 %v2255_v8, %v1598_v15  ;;  %v5719_v49 = vor.u32 %v7001_v36, %v5716_v22  ;;  %3335 = vmatpush.bf16.msra.mxu1 %v5843_v37  ;;  %v7083_v8 = vld [vmem:[#allocation10 + $0x28c] sm:$0xf0]  ;;  %v5986_v37 = vld [vmem:[#allocation10 + $0x220] sm:$0xf] }
 0x1bf   :  { %v2268_v11 = vpop.f32.mrf.mxu1  ;;  %v7079_v15 = vld [vmem:[#allocation10 + $0x26c] sm:$0xf0] }
 0x1c0   :  { %v2269_v29 = vadd.f32 %v2268_v11, %v2256_v24  ;;  %v5895_v24 = vor.u32 %v7045_v14, %v5892_v23  ;;  %v7071_v22 = vld [vmem:[#allocation10 + $0x22c] sm:$0xf0]  ;;  %v5802_v23 = vld [vmem:[#allocation10 + $0xa8] sm:$0xf] }
 0x1c1   :  { %3367 = vmatpush.bf16.msrb.mxu0 %v5831_v42  ;;  %v7061_v42 = vld [vmem:[#allocation10 + $0x1e4] sm:$0xf] }
 0x1c2   :  { %v5959_v44 = vor.u32 %v7061_v42, %v5956_v43 }
 0x1c4   :  { %3380 = vmatpush.bf16.msrb.mxu1 %v5959_v44 }
 0x1c5   :  { %3368 = vmatpush.bf16.msrb.mxu0 %v5815_v51  ;;  %v2257_v26 = vpop.f32.mrf.mxu0  ;;  %v5940_v51 = vld [vmem:[#allocation10 + $0x1d0] sm:$0xf0] }
 0x1c6   :  { %v5943_v56 = vor.u32 %v7057_v50, %v5940_v51 }
 0x1c7   :  { %v2270_v25 = vpop.f32.mrf.mxu1 }
 0x1c8   :  { %3381 = vmatpush.bf16.msrb.mxu1 %v5943_v56  ;;  %v7033_v56 = vld [vmem:[#allocation10 + $0x104] sm:$0xf] }
 0x1c9   :  { %3369 = vmatpush.bf16.msrb.mxu0 %v5799_v62  ;;  %v2281_v32 = vpop.f32.mrf.mxu2  ;;  %v7053_v62 = vld [vmem:[#allocation10 + $0x1a4] sm:$0xf]  ;;  %v5847_v2 = vor.u32 %v7033_v56, %v5844_v60  ;;  %v7012_v60 = vld [vmem:[#allocation10 + $0x54] sm:$0xf0] }
 0x1ca   :  { %v2282_v33 = vadd.f32 %v2281_v32, %v2269_v29  ;;  %v2294_v47 = vpop.f32.mrf.mxu3  ;;  %v5927_v63 = vor.u32 %v7053_v62, %v5924_v3  ;;  %v5879_v32 = vor.u32 %v7041_v21, %v5876_v30  ;;  %v6210_v3 = vld [vmem:[#allocation10 + $0x3e0] sm:$0xf]  ;;  %v6052_v21 = vld [vmem:[#allocation10 + $0x2b0] sm:$0xf0] }
 0x1cb   :  { %v6055_v30 = vor.u32 %v7085_v27, %v6052_v21  ;;  %v7004_v21 = vld [vmem:[#allocation10 + $0x14] sm:$0xf0] }
 0x1cc   :  { %v2295_v39 = vadd.f32 %v2294_v47, %v2282_v33  ;;  %3382 = vmatpush.bf16.msrb.mxu1 %v5927_v63  ;;  %v468_v47 = vld [vmem:[#allocation2 + $0x20] sm:$0xff]  ;;  %v7127_v63 = vld [vmem:[#allocation10 + $0x3ec] sm:$0xf0] }
 0x1cd   :  { %3370 = vmatpush.bf16.msrb.mxu0 %v5783_v7  ;;  %v6034_v7 = vld [vmem:[#allocation10 + $0x280] sm:$0xf] }
 0x1ce   :  { %v7788_v17 = vadd.f32 1e-16, %v2295_v39  ;;  %v6035_v10 = vor.u32 %v7083_v8, %v6034_v7  ;;  %v5987_v39 = vor.u32 %v7071_v22, %v5986_v37  ;;  %v7093_v7 = vld [vmem:[#allocation10 + $0x2e4] sm:$0xf]  ;;  %v6084_v8 = vld [vmem:[#allocation10 + $0x2f0] sm:$0xf0] }
 0x1cf   :  { %v6036_v37 = vld [vmem:[#allocation10 + $0x290] sm:$0xf0] }
 0x1d0   :  { %7277 = vrsqrt.f32 %v7788_v17  ;;  %3344 = vmatpush.bf16.msra.mxu2 %v6035_v10  ;;  %3383 = vmatpush.bf16.msrb.mxu1 %v5911_v12  ;;  %vm2465_vm10 = vcmp.eq.f32.partialorder %v7788_v17, inf  ;;  %vm2467_vm11 = vcmp.eq.f32.partialorder %v7788_v17, 0.0  ;;  %v2468_v34 = vand.u32 2147483648, %v7788_v17  ;;  %v5818_v10 = vld [vmem:[#allocation10 + $0xc8] sm:$0xf] }
 0x1d1   :  { %3371 = vmatpush.bf16.msrb.mxu0 %v5767_v53  ;;  %v2283_v52 = vpop.f32.mrf.mxu2  ;;  %v6018_v53 = vld [vmem:[#allocation10 + $0x260] sm:$0xf] }
 0x1d2   :  { %v2296_v59 = vpop.f32.mrf.mxu3  ;;  %v6019_v20 = vor.u32 %v7079_v15, %v6018_v53  ;;  %v6194_v12 = vld [vmem:[#allocation10 + $0x3c0] sm:$0xf]  ;;  %v7089_v53 = vld [vmem:[#allocation10 + $0x2c4] sm:$0xf] }
 0x1d4   :  { %3345 = vmatpush.bf16.msra.mxu2 %v6019_v20  ;;  %3384 = vmatpush.bf16.msrb.mxu1 %v5895_v24  ;;  %v6068_v20 = vld [vmem:[#allocation10 + $0x2d0] sm:$0xf0]  ;;  %v7024_v24 = vld [vmem:[#allocation10 + $0xb4] sm:$0xf0] }
 0x1d5   :  { %3372 = vmatpush.bf16.msrb.mxu0 %v5751_v19  ;;  %v1599_v19 = vperm.slane %v7785_v6, 1 }
 0x1d6   :  { %v7278_v4 = vpop.eup %7277 }
 0x1d7   :  { %v2459_v5 = vmul.f32 %v7278_v4, %v7788_v17 }
 0x1d8   :  { %3346 = vmatpush.bf16.msra.mxu2 %v6003_v45  ;;  %3385 = vmatpush.bf16.msrb.mxu1 %v5879_v32  ;;  %v5803_v45 = vor.u32 %v7024_v24, %v5802_v23  ;;  %v7020_v32 = vld [vmem:[#allocation10 + $0x94] sm:$0xf0]  ;;  %v7069_v23 = vld [vmem:[#allocation10 + $0x224] sm:$0xf] }
 0x1d9   :  { %3373 = vmatpush.bf16.msrb.mxu0 %v5735_v31  ;;  %v2460_v11 = vmul.f32 %v7278_v4, %v2459_v5  ;;  %v6211_v5 = vor.u32 %v7127_v63, %v6210_v3  ;;  %v7107_v3 = vld [vmem:[#allocation10 + $0x34c] sm:$0xf0]  ;;  %v7073_v63 = vld [vmem:[#allocation10 + $0x244] sm:$0xf] }
 0x1db   :  { %v2461_v18 = vmul.f32 0.5, %v2460_v11  ;;  %v6087_v11 = vor.u32 %v7093_v7, %v6084_v8  ;;  %3354 = vmatpush.bf16.msra.mxu3 %v6211_v5  ;;  %v6004_v5 = vld [vmem:[#allocation10 + $0x250] sm:$0xf0] }
 0x1dc   :  { %3347 = vmatpush.bf16.msra.mxu2 %v5987_v39 }
 0x1dd   :  { %3374 = vmatpush.bf16.msrb.mxu0 %v5719_v49  ;;  %v2307_v13 = vpop.f32.mrf.mxu0  ;;  %v2462_v26 = vsub.f32 1.5, %v2461_v18  ;;  %v5860_v49 = vld [vmem:[#allocation10 + $0x130] sm:$0xf0] }
 0x1de   :  { %v2308_v29 = vadd.f32 %v2307_v13, %v1599_v19  ;;  %v5863_v43 = vor.u32 %v7037_v38, %v5860_v49  ;;  %v7123_v13 = vld [vmem:[#allocation10 + $0x3cc] sm:$0xf0]  ;;  %v6071_v19 = vor.u32 %v7089_v53, %v6068_v20  ;;  %v5770_v38 = vld [vmem:[#allocation10 + $0x68] sm:$0xf]  ;;  %v6114_v20 = vld [vmem:[#allocation10 + $0x320] sm:$0xf] }
 0x1df   :  { %v2320_v54 = vpop.f32.mrf.mxu1  ;;  %v2463_v25 = vmul.f32 %v7278_v4, %v2462_v26  ;;  %v5835_v4 = vor.u32 %v7032_v48, %v5834_v46  ;;  %v6195_v18 = vor.u32 %v7123_v13, %v6194_v12  ;;  %v6178_v26 = vld [vmem:[#allocation10 + $0x3a0] sm:$0xf]  ;;  %v7008_v13 = vld [vmem:[#allocation10 + $0x34] sm:$0xf0]  ;;  %v469_v53 = vld [vmem:[#allocation2 + $0x28] sm:$0xff] }
 0x1e0   :  { %v2321_v41 = vadd.f32 %v2320_v54, %v2308_v29  ;;  %3386 = vmatpush.bf16.msrb.mxu1 %v5863_v43  ;;  %v5819_v54 = vor.u32 %v7028_v0, %v5818_v10  ;;  %v7111_v43 = vld [vmem:[#allocation10 + $0x36c] sm:$0xf0]  ;;  %v5738_v10 = vld [vmem:[#allocation10 + $0x28] sm:$0xf] }
 0x1e1   :  { %v2464_v31 = vmul.f32 %v2463_v25, %v7788_v17  ;;  %3355 = vmatpush.bf16.msra.mxu3 %v6195_v18  ;;  %v7119_v25 = vld [vmem:[#allocation10 + $0x3ac] sm:$0xf0]  ;;  %v5739_v27 = vor.u32 %v7008_v13, %v5738_v10 }
 0x1e2   :  { %v6179_v28 = vor.u32 %v7119_v25, %v6178_v26  ;;  %v5988_v26 = vld [vmem:[#allocation10 + $0x230] sm:$0xf0] }
 0x1e3   :  { %v2466_v36 = vsel %vm2465_vm10, %v7788_v17, %v2464_v31  ;;  %v5970_v17 = vld [vmem:[#allocation10 + $0x200] sm:$0xf]  ;;  %v5786_v31 = vld [vmem:[#allocation10 + $0x88] sm:$0xf] }
 0x1e4   :  { %v2469_v16 = vsel %vm2467_vm11, %v2468_v34, %v2466_v36  ;;  %v5971_v59 = vor.u32 %v7067_v55, %v5970_v17  ;;  %3387 = vmatpush.bf16.msrb.mxu1 %v5847_v2  ;;  %v7115_v34 = vld [vmem:[#allocation10 + $0x38c] sm:$0xf0]  ;;  %v5787_v22 = vor.u32 %v7020_v32, %v5786_v31  ;;  %v1600_v17 = vperm.slane %v7785_v6, 2  ;;  %v6130_v2 = vld [vmem:[#allocation10 + $0x340] sm:$0xf] }
 0x1e5   :  { %v2309_v33 = vpop.f32.mrf.mxu0  ;;  %v2506_v42 = vmul.f32 %v2469_v16, %v468_v47  ;;  %3356 = vmatpush.bf16.msra.mxu3 %v6179_v28  ;;  %v6162_v47 = vld [vmem:[#allocation10 + $0x380] sm:$0xf]  ;;  %v5722_v28 = vld [vmem:[#allocation10 + $0x8] sm:$0xf]  ;;  %v7064_v32 = vld [vmem:[#allocation10 + $0x1f4] sm:$0xf0] }
 0x1e6   :  { %3348 = vmatpush.bf16.msra.mxu2 %v5971_v59  ;;  %v6163_v36 = vor.u32 %v7115_v34, %v6162_v47  ;;  %v5754_v59 = vld [vmem:[#allocation10 + $0x48] sm:$0xf] }
 0x1e7   :  { %v2322_v35 = vpop.f32.mrf.mxu1  ;;  %v2510_v52 = vadd.f32 %v2506_v42, %v7767_v57  ;;  %v6146_v42 = vld [vmem:[#allocation10 + $0x360] sm:$0xf]  ;;  %v5755_v8 = vor.u32 %v7012_v60, %v5754_v59  ;;  %v7121_v59 = vld [vmem:[#allocation10 + $0x3c4] sm:$0xf] }
 0x1e8   :  { %v7081_v35 = vld [vmem:[#allocation10 + $0x284] sm:$0xf]  ;;  %v6147_v48 = vor.u32 %v7111_v43, %v6146_v42  ;;  %v5946_v42 = vld [vmem:[#allocation10 + $0x1c8] sm:$0xf] }
 0x1e9   :  { %v2333_v44 = vpop.f32.mrf.mxu2  ;;  %v7799_v62 = vmax.f32 %v2510_v52, 0.0  ;;  %v6039_v39 = vor.u32 %v7081_v35, %v6036_v37  ;;  %3357 = vmatpush.bf16.msra.mxu3 %v6163_v36  ;;  %v6098_v36 = vld [vmem:[#allocation10 + $0x300] sm:$0xf]  ;;  %v7099_v37 = vld [vmem:[#allocation10 + $0x30c] sm:$0xf0] }
 0x1ea   :  { %v2334_v50 = vadd.f32 %v2333_v44, %v2321_v41  ;;  %v2346_v51 = vpop.f32.mrf.mxu3  ;;  %3393 = vmatpush.bf16.msrb.mxu2 %v6087_v11  ;;  %v7016_v41 = vld [vmem:[#allocation10 + $0x74] sm:$0xf0]  ;;  %v6007_v11 = vor.u32 %v7073_v63, %v6004_v5  ;;  %v6196_v63 = vld [vmem:[#allocation10 + $0x3d0] sm:$0xf0] }
 0x1eb   :  { %v7805_v57 = vpack.c.bf16 %v7799_v62, %v7799_v62  ;;  %v5771_v55 = vor.u32 %v7016_v41, %v5770_v38  ;;  %v6099_v38 = vor.u32 %v7099_v37, %v6098_v36  ;;  %v7056_v5 = vld [vmem:[#allocation10 + $0x1b4] sm:$0xf0]  ;;  %v6199_v10 = vor.u32 %v7121_v59, %v6196_v63  ;;  %v5882_v37 = vld [vmem:[#allocation10 + $0x148] sm:$0xf]  ;;  %v7006_v59 = vld [vmem:[#allocation10 + $0x2c] sm:$0xf] }
 0x1ec   :  { %v2347_v61 = vadd.f32 %v2346_v51, %v2334_v50  ;;  %v7077_v50 = vld [vmem:[#allocation10 + $0x264] sm:$0xf]  ;;  %v6020_v51 = vld [vmem:[#allocation10 + $0x270] sm:$0xf0] }
 0x1ed   :  { %3323 = vmatmul.bf16.vlgmr.msra.gmra.mxu0 %v7805_v57  ;;  %v6023_v52 = vor.u32 %v7077_v50, %v6020_v51  ;;  %3358 = vmatpush.bf16.msra.mxu3 %v6147_v48  ;;  %v7060_v48 = vld [vmem:[#allocation10 + $0x1d4] sm:$0xf0]  ;;  %v7125_v50 = vld [vmem:[#allocation10 + $0x3e4] sm:$0xf]  ;;  %v6212_v51 = vld [vmem:[#allocation10 + $0x3f0] sm:$0xf0] }
 0x1ee   :  { %v7801_v9 = vadd.f32 1e-16, %v2347_v61  ;;  %3419 = vmatpush.bf16.msra.mxu0 %v5835_v4  ;;  %3394 = vmatpush.bf16.msrb.mxu2 %v6071_v19  ;;  %v6131_v4 = vor.u32 %v7107_v3, %v6130_v2  ;;  %v5930_v3 = vld [vmem:[#allocation10 + $0x1a8] sm:$0xf] }
 0x1f0   :  { %7279 = vrsqrt.f32 %v7801_v9  ;;  %vm2477_vm12 = vcmp.eq.f32.partialorder %v7801_v9, inf  ;;  %vm2479_vm13 = vcmp.eq.f32.partialorder %v7801_v9, 0.0 }
 0x1f1   :  { %v2335_v15 = vpop.f32.mrf.mxu2  ;;  %3359 = vmatpush.bf16.msra.mxu3 %v6131_v4 }
 0x1f2   :  { %v2348_v14 = vpop.f32.mrf.mxu3  ;;  %3420 = vmatpush.bf16.msra.mxu0 %v5819_v54  ;;  %3395 = vmatpush.bf16.msrb.mxu2 %v6055_v30  ;;  %v2480_v15 = vand.u32 2147483648, %v7801_v9  ;;  %v5962_v30 = vld [vmem:[#allocation10 + $0x1e8] sm:$0xf] }
 0x1f3   :  { %v7103_v14 = vld [vmem:[#allocation10 + $0x32c] sm:$0xf0] }
 0x1f4   :  { %v6115_v19 = vor.u32 %v7103_v14, %v6114_v20  ;;  %v5788_v20 = vld [vmem:[#allocation10 + $0x98] sm:$0xf0] }
 0x1f6   :  { %v7280_v29 = vpop.eup %7279  ;;  %3421 = vmatpush.bf16.msra.mxu0 %v5803_v45  ;;  %3396 = vmatpush.bf16.msrb.mxu2 %v6039_v39 }
 0x1f7   :  { %v2471_v33 = vmul.f32 %v7280_v29, %v7801_v9  ;;  %3360 = vmatpush.bf16.msra.mxu3 %v6115_v19  ;;  %v6164_v19 = vld [vmem:[#allocation10 + $0x390] sm:$0xf0] }
 0x1f9   :  { %v2472_v16 = vmul.f32 %v7280_v29, %v2471_v33  ;;  %v7030_v33 = vld [vmem:[#allocation10 + $0xec] sm:$0xf] }
 0x1fa   :  { %3422 = vmatpush.bf16.msra.mxu0 %v5787_v22  ;;  %3397 = vmatpush.bf16.msrb.mxu2 %v6023_v52  ;;  %v7065_v22 = vld [vmem:[#allocation10 + $0x204] sm:$0xf] }
 0x1fb   :  { %v2473_v46 = vmul.f32 0.5, %v2472_v16  ;;  %v5972_v16 = vld [vmem:[#allocation10 + $0x210] sm:$0xf0]  ;;  %3361 = vmatpush.bf16.msra.mxu3 %v6099_v38 }
 0x1fc   :  { %v5975_v43 = vor.u32 %v7065_v22, %v5972_v16  ;;  %v7044_v22 = vld [vmem:[#allocation10 + $0x154] sm:$0xf0]  ;;  %v7010_v16 = vld [vmem:[#allocation10 + $0x4c] sm:$0xf] }
 0x1fd   :  { %v2359_v49 = vpop.f32.mrf.mxu0  ;;  %v2474_v56 = vsub.f32 1.5, %v2473_v46  ;;  %3375 = vmatmul.bf16.vlgmr.msrb.gmra.mxu0 %v7805_v57 }
 0x1fe   :  { %v2360_v7 = vadd.f32 %v2359_v49, %v1600_v17  ;;  %3423 = vmatpush.bf16.msra.mxu0 %v5771_v55  ;;  %3398 = vmatpush.bf16.msrb.mxu2 %v6007_v11  ;;  %v5723_v49 = vor.u32 %v7004_v21, %v5722_v28  ;;  %v7026_v17 = vld [vmem:[#allocation10 + $0xcc] sm:$0xf]  ;;  %v5820_v55 = vld [vmem:[#allocation10 + $0xd8] sm:$0xf0]  ;;  %v6180_v11 = vld [vmem:[#allocation10 + $0x3b0] sm:$0xf0] }
 0x1ff   :  { %v2372_v44 = vpop.f32.mrf.mxu1  ;;  %v2475_v61 = vmul.f32 %v7280_v29, %v2474_v56  ;;  %v5991_v29 = vor.u32 %v7069_v23, %v5988_v26  ;;  %v6215_v56 = vor.u32 %v7125_v50, %v6212_v51  ;;  %v5823_v2 = vor.u32 %v7026_v17, %v5820_v55  ;;  %v5866_v50 = vld [vmem:[#allocation10 + $0x128] sm:$0xf]  ;;  %v7040_v51 = vld [vmem:[#allocation10 + $0x134] sm:$0xf0]  ;;  %v470_v17 = vld [vmem:[#allocation2 + $0x30] sm:$0xff] }
 0x200   :  { %v2373_v25 = vadd.f32 %v2372_v44, %v2360_v7  ;;  %v5963_v44 = vor.u32 %v7064_v32, %v5962_v30  ;;  %v7022_v7 = vld [vmem:[#allocation10 + $0xac] sm:$0xf] }
 0x201   :  { %v2476_v0 = vmul.f32 %v2475_v61, %v7801_v9  ;;  %v5947_v61 = vor.u32 %v7060_v48, %v5946_v42  ;;  %3406 = vmatpush.bf16.msrb.mxu3 %v6215_v56  ;;  %v7014_v30 = vld [vmem:[#allocation10 + $0x6c] sm:$0xf] }
 0x202   :  { %3424 = vmatpush.bf16.msra.mxu0 %v5755_v8  ;;  %3399 = vmatpush.bf16.msrb.mxu2 %v5991_v29  ;;  %v5804_v8 = vld [vmem:[#allocation10 + $0xb8] sm:$0xf0] }
 0x203   :  { %v2478_v18 = vsel %vm2477_vm12, %v7801_v9, %v2476_v0  ;;  %v5836_v9 = vld [vmem:[#allocation10 + $0xf8] sm:$0xf0]  ;;  %v7117_v0 = vld [vmem:[#allocation10 + $0x3a4] sm:$0xf]  ;;  %v5807_v13 = vor.u32 %v7022_v7, %v5804_v8  ;;  %v5867_v7 = vor.u32 %v7040_v51, %v5866_v50  ;;  %v7088_v50 = vld [vmem:[#allocation10 + $0x2b4] sm:$0xf0] }
 0x204   :  { %v2481_v24 = vsel %vm2479_vm13, %v2480_v15, %v2478_v18  ;;  %v5839_v46 = vor.u32 %v7030_v33, %v5836_v9  ;;  %v7018_v18 = vld [vmem:[#allocation10 + $0x8c] sm:$0xf]  ;;  %v6183_v14 = vor.u32 %v7117_v0, %v6180_v11  ;;  %v5772_v29 = vld [vmem:[#allocation10 + $0x78] sm:$0xf0]  ;;  %v7109_v9 = vld [vmem:[#allocation10 + $0x364] sm:$0xf] }
 0x205   :  { %v2361_v12 = vpop.f32.mrf.mxu0  ;;  %v2507_v45 = vmul.f32 %v2481_v24, %v469_v53  ;;  %v5914_v53 = vld [vmem:[#allocation10 + $0x188] sm:$0xf]  ;;  %3407 = vmatpush.bf16.msrb.mxu3 %v6199_v10  ;;  %v7113_v24 = vld [vmem:[#allocation10 + $0x384] sm:$0xf]  ;;  %v5775_v36 = vor.u32 %v7014_v30, %v5772_v29  ;;  %v6306_v51 = vld [vmem:[#allocation12 + $0xa0] sm:$0xf] }
 0x206   :  { %3425 = vmatpush.bf16.msra.mxu0 %v5739_v27  ;;  %3400 = vmatpush.bf16.msrb.mxu2 %v5975_v43  ;;  %v5931_v12 = vor.u32 %v7056_v5, %v5930_v3  ;;  %v5898_v27 = vld [vmem:[#allocation10 + $0x168] sm:$0xf]  ;;  %v7105_v43 = vld [vmem:[#allocation10 + $0x344] sm:$0xf]  ;;  %v6116_v5 = vld [vmem:[#allocation10 + $0x330] sm:$0xf0] }
 0x207   :  { %v2374_v54 = vpop.f32.mrf.mxu1  ;;  %v2511_v35 = vadd.f32 %v2507_v45, %v7774_v58  ;;  %v7048_v45 = vld [vmem:[#allocation10 + $0x174] sm:$0xf0]  ;;  %v5850_v11 = vld [vmem:[#allocation10 + $0x108] sm:$0xf]  ;;  %vm4637_vm12 = vcmask 7168  }
 0x208   :  { %v7052_v54 = vld [vmem:[#allocation10 + $0x194] sm:$0xf0] }
 0x209   :  { %v2385_v31 = vpop.f32.mrf.mxu2  ;;  %v7818_v41 = vmax.f32 %v2511_v35, 0.0  ;;  %v5915_v26 = vor.u32 %v7052_v54, %v5914_v53  ;;  %3408 = vmatpush.bf16.msrb.mxu3 %v6183_v14  ;;  %v5899_v35 = vor.u32 %v7048_v45, %v5898_v27  ;;  %v7036_v53 = vld [vmem:[#allocation10 + $0x114] sm:$0xf0]  ;;  %v5724_v54 = vld [vmem:[#allocation10 + $0x18] sm:$0xf0] }
 0x20a   :  { %v2386_v47 = vadd.f32 %v2385_v31, %v2373_v25  ;;  %v2398_v34 = vpop.f32.mrf.mxu3  ;;  %3426 = vmatpush.bf16.msra.mxu0 %v5723_v49  ;;  %v5791_v25 = vor.u32 %v7018_v18, %v5788_v20  ;;  %v6167_v31 = vor.u32 %v7113_v24, %v6164_v19  ;;  %v7062_v24 = vld [vmem:[#allocation10 + $0x1ec] sm:$0xf]  ;;  %v5964_v19 = vld [vmem:[#allocation10 + $0x1f8] sm:$0xf0]  ;;  %v7159_v27 = vld [vmem:[#allocation12 + $0xec] sm:$0xf0] }
 0x20b   :  { %v7824_v52 = vpack.c.bf16 %v7818_v41, %v7818_v41  ;;  %v5967_v29 = vor.u32 %v7062_v24, %v5964_v19  ;;  %v6010_v24 = vld [vmem:[#allocation10 + $0x248] sm:$0xf]  ;;  %v7042_v19 = vld [vmem:[#allocation10 + $0x14c] sm:$0xf] }
 0x20c   :  { %v2399_v39 = vadd.f32 %v2398_v34, %v2386_v47  ;;  %v6148_v47 = vld [vmem:[#allocation10 + $0x370] sm:$0xf0]  ;;  %v1601_v34 = vperm.slane %v7785_v6, 3 }
 0x20d   :  { %3336 = vmatmul.bf16.vlgmr.msra.gmra.mxu1 %v7824_v52  ;;  %3427 = vmatmul.bf16.vlgmr.msra.gmra.mxu0 %v7805_v57  ;;  %v6151_v49 = vor.u32 %v7109_v9, %v6148_v47 }
 0x20e   :  { %v7820_v58 = vadd.f32 1e-16, %v2399_v39  ;;  %3432 = vmatpush.bf16.msra.mxu1 %v5963_v44  ;;  %3471 = vmatpush.bf16.msrb.mxu0 %v5839_v46  ;;  %v5756_v39 = vld [vmem:[#allocation10 + $0x58] sm:$0xf0]  ;;  %v6132_v44 = vld [vmem:[#allocation10 + $0x350] sm:$0xf0]  ;;  %v5883_v46 = vor.u32 %v7044_v22, %v5882_v37 }
 0x20f   :  { %3409 = vmatpush.bf16.msrb.mxu3 %v6167_v31  ;;  %v5759_v6 = vor.u32 %v7010_v16, %v5756_v39  ;;  %v6074_v31 = vld [vmem:[#allocation10 + $0x2c8] sm:$0xf]  ;;  %v7092_v37 = vld [vmem:[#allocation10 + $0x2d4] sm:$0xf0]  ;;  %v6322_v22 = vld [vmem:[#allocation12 + $0xc0] sm:$0xf] }
 0x210   :  { %7281 = vrsqrt.f32 %v7820_v58  ;;  %vm2489_vm14 = vcmp.eq.f32.partialorder %v7820_v58, inf  ;;  %vm2491_vm15 = vcmp.eq.f32.partialorder %v7820_v58, 0.0 }
 0x211   :  { %v2387_v60 = vpop.f32.mrf.mxu2 }
 0x212   :  { %v2400_v4 = vpop.f32.mrf.mxu3  ;;  %3433 = vmatpush.bf16.msra.mxu1 %v5947_v61  ;;  %3472 = vmatpush.bf16.msrb.mxu0 %v5823_v2  ;;  %v5740_v60 = vld [vmem:[#allocation10 + $0x38] sm:$0xf0]  ;;  %v2492_v61 = vand.u32 2147483648, %v7820_v58  ;;  %v6135_v2 = vor.u32 %v7105_v43, %v6132_v44  ;;  %v6075_v43 = vor.u32 %v7092_v37, %v6074_v31  ;;  %v7072_v31 = vld [vmem:[#allocation10 + $0x234] sm:$0xf0] }
 0x213   :  { %3410 = vmatpush.bf16.msrb.mxu3 %v6151_v49  ;;  %v7101_v4 = vld [vmem:[#allocation10 + $0x324] sm:$0xf]  ;;  %v5743_v0 = vor.u32 %v7006_v59, %v5740_v60 }
 0x214   :  { %v6119_v18 = vor.u32 %v7101_v4, %v6116_v5  ;;  %v7084_v4 = vld [vmem:[#allocation10 + $0x294] sm:$0xf0]  ;;  %v7147_v5 = vld [vmem:[#allocation12 + $0x8c] sm:$0xf0] }
 0x216   :  { %v7282_v15 = vpop.eup %7281  ;;  %3434 = vmatpush.bf16.msra.mxu1 %v5931_v12  ;;  %3473 = vmatpush.bf16.msrb.mxu0 %v5807_v13 }
 0x217   :  { %v2483_v23 = vmul.f32 %v7282_v15, %v7820_v58  ;;  %3411 = vmatpush.bf16.msrb.mxu3 %v6135_v2  ;;  %v7050_v2 = vld [vmem:[#allocation10 + $0x18c] sm:$0xf] }
 0x219   :  { %v2484_v28 = vmul.f32 %v7282_v15, %v2483_v23  ;;  %v6090_v23 = vld [vmem:[#allocation10 + $0x2e8] sm:$0xf] }
 0x21a   :  { %3435 = vmatpush.bf16.msra.mxu1 %v5915_v26  ;;  %3474 = vmatpush.bf16.msrb.mxu0 %v5791_v25  ;;  %v7096_v26 = vld [vmem:[#allocation10 + $0x2f4] sm:$0xf0]  ;;  %v6338_v25 = vld [vmem:[#allocation12 + $0xe0] sm:$0xf] }
 0x21b   :  { %v2485_v33 = vmul.f32 0.5, %v2484_v28  ;;  %3412 = vmatpush.bf16.msrb.mxu3 %v6119_v18  ;;  %v6091_v47 = vor.u32 %v7096_v26, %v6090_v23  ;;  %v5884_v26 = vld [vmem:[#allocation10 + $0x158] sm:$0xf0] }
 0x21d   :  { %v2411_v21 = vpop.f32.mrf.mxu0  ;;  %v2486_v38 = vsub.f32 1.5, %v2485_v33  ;;  %3388 = vmatmul.bf16.vlgmr.msrb.gmra.mxu1 %v7824_v52  ;;  %v6100_v33 = vld [vmem:[#allocation10 + $0x310] sm:$0xf0] }
 0x21e   :  { %v2424_v32 = vpop.f32.mrf.mxu1  ;;  %v2412_v48 = vadd.f32 %v2411_v21, %v1601_v34  ;;  %3436 = vmatpush.bf16.msra.mxu1 %v5899_v35  ;;  %3475 = vmatpush.bf16.msrb.mxu0 %v5775_v36  ;;  %v5851_v21 = vor.u32 %v7036_v53, %v5850_v11  ;;  %v6339_v34 = vor.u32 %v7159_v27, %v6338_v25  ;;  %v7058_v35 = vld [vmem:[#allocation10 + $0x1cc] sm:$0xf]  ;;  %v5948_v36 = vld [vmem:[#allocation10 + $0x1d8] sm:$0xf0]  ;;  %v7076_v25 = vld [vmem:[#allocation10 + $0x254] sm:$0xf0] }
 0x21f   :  { %v2487_v42 = vmul.f32 %v7282_v15, %v2486_v38  ;;  %v7002_v15 = vld [vmem:[#allocation10 + $0xc] sm:$0xf]  ;;  %v7155_v38 = vld [vmem:[#allocation12 + $0xcc] sm:$0xf0]  ;;  %v5951_v49 = vor.u32 %v7058_v35, %v5948_v36  ;;  %v5900_v53 = vld [vmem:[#allocation10 + $0x178] sm:$0xf0] }
 0x220   :  { %v2425_v10 = vadd.f32 %v2424_v32, %v2412_v48  ;;  %v5727_v45 = vor.u32 %v7002_v15, %v5724_v54  ;;  %v7097_v32 = vld [vmem:[#allocation10 + $0x304] sm:$0xf]  ;;  %v6323_v44 = vor.u32 %v7155_v38, %v6322_v22  ;;  %v7054_v48 = vld [vmem:[#allocation10 + $0x1ac] sm:$0xf]  ;;  %v6274_v15 = vld [vmem:[#allocation12 + $0x60] sm:$0xf] }
 0x221   :  { %v2488_v55 = vmul.f32 %v2487_v42, %v7820_v58  ;;  %v6103_v16 = vor.u32 %v7097_v32, %v6100_v33  ;;  %v7143_v54 = vld [vmem:[#allocation12 + $0x6c] sm:$0xf0]  ;;  %v6258_v27 = vld [vmem:[#allocation12 + $0x40] sm:$0xf]  ;;  %v7038_v32 = vld [vmem:[#allocation10 + $0x12c] sm:$0xf] }
 0x222   :  { %3437 = vmatpush.bf16.msra.mxu1 %v5883_v46  ;;  %3476 = vmatpush.bf16.msrb.mxu0 %v5759_v6  ;;  %v6058_v46 = vld [vmem:[#allocation10 + $0x2a8] sm:$0xf]  ;;  %v5932_v6 = vld [vmem:[#allocation10 + $0x1b8] sm:$0xf0]  ;;  %v6275_v23 = vor.u32 %v7143_v54, %v6274_v15  ;;  %v6242_v22 = vld [vmem:[#allocation12 + $0x20] sm:$0xf] }
 0x223   :  { %v2490_v63 = vsel %vm2489_vm14, %v7820_v58, %v2488_v55  ;;  %3413 = vmatpush.bf16.msrb.mxu3 %v6103_v16  ;;  %v5935_v55 = vor.u32 %v7054_v48, %v5932_v6  ;;  %v6059_v59 = vor.u32 %v7088_v50, %v6058_v46  ;;  %v5868_v35 = vld [vmem:[#allocation10 + $0x138] sm:$0xf0]  ;;  %v7135_v38 = vld [vmem:[#allocation12 + $0x2c] sm:$0xf0]  ;;  %v7090_v15 = vld [vmem:[#allocation10 + $0x2cc] sm:$0xf] }
 0x224   :  { %v2493_v8 = vsel %vm2491_vm15, %v2492_v61, %v2490_v63  ;;  %v6042_v61 = vld [vmem:[#allocation10 + $0x288] sm:$0xf]  ;;  %v471_v36 = vld [vmem:[#allocation2 + $0x38] sm:$0xff]  ;;  %v6243_v6 = vor.u32 %v7135_v38, %v6242_v22  ;;  %v7082_v22 = vld [vmem:[#allocation10 + $0x28c] sm:$0xf] }
 0x225   :  { %v2413_v56 = vpop.f32.mrf.mxu0  ;;  %v2508_v12 = vmul.f32 %v2493_v8, %v470_v17  ;;  %v7151_v17 = vld [vmem:[#allocation12 + $0xac] sm:$0xf0]  ;;  %v6026_v8 = vld [vmem:[#allocation10 + $0x268] sm:$0xf]  ;;  %v5852_v50 = vld [vmem:[#allocation10 + $0x118] sm:$0xf0] }
 0x226   :  { %v2426_v3 = vpop.f32.mrf.mxu1  ;;  %3438 = vmatpush.bf16.msra.mxu1 %v5867_v7  ;;  %3477 = vmatpush.bf16.msrb.mxu0 %v5743_v0  ;;  %v6307_v60 = vor.u32 %v7151_v17, %v6306_v51  ;;  %v6043_v0 = vor.u32 %v7084_v4, %v6042_v61  ;;  %v6226_v51 = vld [vmem:[#allocation12] sm:$0xf]  ;;  %v7131_v17 = vld [vmem:[#allocation12 + $0xc] sm:$0xf0]  ;;  %v7157_v4 = vld [vmem:[#allocation12 + $0xe4] sm:$0xf] }
 0x227   :  { %v2512_v58 = vadd.f32 %v2508_v12, %v7776_v1  ;;  %v5916_v3 = vld [vmem:[#allocation10 + $0x198] sm:$0xf0]  ;;  %v7080_v12 = vld [vmem:[#allocation10 + $0x274] sm:$0xf0]  ;;  %v6466_v61 = vld [vmem:[#allocation12 + $0x1e0] sm:$0xf] }
 0x228   :  { %v5919_v7 = vor.u32 %v7050_v2, %v5916_v3  ;;  %v7191_v2 = vld [vmem:[#allocation12 + $0x1ec] sm:$0xf0]  ;;  %v6076_v54 = vld [vmem:[#allocation10 + $0x2d8] sm:$0xf0] }
 0x229   :  { %v2437_v13 = vpop.f32.mrf.mxu2  ;;  %v7838_v30 = vmax.f32 %v2512_v58, 0.0  ;;  %v6027_v58 = vor.u32 %v7080_v12, %v6026_v8  ;;  %v2530_v8 = vmul.f32 %v7799_v62, %v7799_v62  ;;  %v7124_v12 = vld [vmem:[#allocation10 + $0x3d4] sm:$0xf0]  ;;  %v6044_v38 = vld [vmem:[#allocation10 + $0x298] sm:$0xf0] }
 0x22a   :  { %v2438_v20 = vadd.f32 %v2437_v13, %v2425_v10  ;;  %v2450_v14 = vpop.f32.mrf.mxu3  ;;  %3439 = vmatpush.bf16.msra.mxu1 %v5851_v21  ;;  %3478 = vmatpush.bf16.msrb.mxu0 %v5727_v45  ;;  %v7046_v13 = vld [vmem:[#allocation10 + $0x16c] sm:$0xf]  ;;  %v5887_v45 = vor.u32 %v7042_v19, %v5884_v26  ;;  %v6186_v19 = vld [vmem:[#allocation10 + $0x3a8] sm:$0xf]  ;;  %v7120_v26 = vld [vmem:[#allocation10 + $0x3b4] sm:$0xf0] }
 0x22b   :  { %v7844_v1 = vpack.c.bf16 %v7838_v30, %v7838_v30  ;;  %v7867_v62 = vpack.c.bf16 %v2530_v8, %v2530_v8  ;;  %v7171_v8 = vld [vmem:[#allocation12 + $0x14c] sm:$0xf0] }
 0x22c   :  { %v2451_v28 = vadd.f32 %v2450_v14, %v2438_v20  ;;  %v5903_v20 = vor.u32 %v7046_v13, %v5900_v53  ;;  %v6467_v13 = vor.u32 %v7191_v2, %v6466_v61  ;;  %v6138_v61 = vld [vmem:[#allocation10 + $0x348] sm:$0xf]  ;;  %v7108_v2 = vld [vmem:[#allocation10 + $0x354] sm:$0xf0] }
 0x22d   :  { %3349 = vmatmul.bf16.vlgmr.msra.gmra.mxu2 %v7844_v1  ;;  %3479 = vmatmul.bf16.vlgmr.msrb.gmra.mxu0 %v7805_v57  ;;  %v6290_v57 = vld [vmem:[#allocation12 + $0x80] sm:$0xf] }
 0x22e   :  { %v7840_v9 = vadd.f32 1e-16, %v2451_v28  ;;  %3484 = vmatpush.bf16.msrb.mxu1 %v5967_v29  ;;  %3445 = vmatpush.bf16.msra.mxu2 %v6091_v47  ;;  %v6291_v11 = vor.u32 %v7147_v5, %v6290_v57  ;;  %v7139_v28 = vld [vmem:[#allocation12 + $0x4c] sm:$0xf0]  ;;  %v5994_v29 = vld [vmem:[#allocation10 + $0x228] sm:$0xf]  ;;  %v6011_v47 = vor.u32 %v7076_v25, %v6010_v24  ;;  %v6079_v24 = vor.u32 %v7090_v15, %v6076_v54 }
 0x22f   :  { %4300 = vmatpush.bf16.msra.mxu0 %v6339_v34  ;;  %3440 = vmatmul.bf16.vlgmr.msra.gmra.mxu1 %v7824_v52  ;;  %v6259_v34 = vor.u32 %v7139_v28, %v6258_v27  ;;  %v5995_v48 = vor.u32 %v7072_v31, %v5994_v29  ;;  %v6340_v57 = vld [vmem:[#allocation12 + $0xf0] sm:$0xf0]  ;;  %v7086_v28 = vld [vmem:[#allocation10 + $0x2ac] sm:$0xf]  ;;  %v7183_v29 = vld [vmem:[#allocation12 + $0x1ac] sm:$0xf0] }
 0x230   :  { %7283 = vrsqrt.f32 %v7840_v9  ;;  %vm2501_vm0 = vcmp.eq.f32.partialorder %v7840_v9, inf  ;;  %v2504_v37 = vand.u32 2147483648, %v7840_v9  ;;  %vm2503_vm1 = vcmp.eq.f32.partialorder %v7840_v9, 0.0  ;;  %v7149_v31 = vld [vmem:[#allocation12 + $0xa4] sm:$0xf] }
 0x231   :  { %v2439_v39 = vpop.f32.mrf.mxu2  ;;  %v6343_v53 = vor.u32 %v7157_v4, %v6340_v57  ;;  %v7074_v57 = vld [vmem:[#allocation10 + $0x24c] sm:$0xf] }
 0x232   :  { %v2452_v42 = vpop.f32.mrf.mxu3  ;;  %3485 = vmatpush.bf16.msrb.mxu1 %v5951_v49  ;;  %3446 = vmatpush.bf16.msra.mxu2 %v6075_v43  ;;  %v5871_v49 = vor.u32 %v7038_v32, %v5868_v35  ;;  %v7068_v43 = vld [vmem:[#allocation10 + $0x214] sm:$0xf0]  ;;  %v6308_v32 = vld [vmem:[#allocation12 + $0xb0] sm:$0xf0] }
 0x233   :  { %4301 = vmatpush.bf16.msra.mxu0 %v6323_v44  ;;  %v5978_v42 = vld [vmem:[#allocation10 + $0x208] sm:$0xf]  ;;  %v7034_v44 = vld [vmem:[#allocation10 + $0x10c] sm:$0xf]  ;;  %v7116_v35 = vld [vmem:[#allocation10 + $0x394] sm:$0xf0] }
 0x234   :  { %v5855_v3 = vor.u32 %v7034_v44, %v5852_v50  ;;  %v5979_v5 = vor.u32 %v7068_v43, %v5978_v42  ;;  %v6047_v43 = vor.u32 %v7082_v22, %v6044_v38  ;;  %v6154_v44 = vld [vmem:[#allocation10 + $0x368] sm:$0xf]  ;;  %v7078_v50 = vld [vmem:[#allocation10 + $0x26c] sm:$0xf]  ;;  %v7189_v22 = vld [vmem:[#allocation12 + $0x1e4] sm:$0xf] }
 0x236   :  { %v7284_v56 = vpop.eup %7283  ;;  %3486 = vmatpush.bf16.msrb.mxu1 %v5935_v55  ;;  %3447 = vmatpush.bf16.msra.mxu2 %v6059_v59  ;;  %v7128_v59 = vld [vmem:[#allocation10 + $0x3f4] sm:$0xf0] }
 0x237   :  { %v2495_v63 = vmul.f32 %v7284_v56, %v7840_v9  ;;  %4302 = vmatpush.bf16.msra.mxu0 %v6307_v60  ;;  %v7094_v60 = vld [vmem:[#allocation10 + $0x2ec] sm:$0xf] }
 0x239   :  { %v2496_v10 = vmul.f32 %v7284_v56, %v2495_v63 }
 0x23a   :  { %3487 = vmatpush.bf16.msrb.mxu1 %v5919_v7  ;;  %3448 = vmatpush.bf16.msra.mxu2 %v6043_v0  ;;  %v6227_v7 = vor.u32 %v7131_v17, %v6226_v51  ;;  %v6028_v51 = vld [vmem:[#allocation10 + $0x278] sm:$0xf0]  ;;  %v6402_v17 = vld [vmem:[#allocation12 + $0x160] sm:$0xf] }
 0x23b   :  { %v2497_v18 = vmul.f32 0.5, %v2496_v10  ;;  %4303 = vmatpush.bf16.msra.mxu0 %v6291_v11  ;;  %v6202_v11 = vld [vmem:[#allocation10 + $0x3c8] sm:$0xf] }
 0x23d   :  { %v2498_v14 = vsub.f32 1.5, %v2497_v18  ;;  %3401 = vmatmul.bf16.vlgmr.msrb.gmra.mxu2 %v7844_v1  ;;  %v6450_v18 = vld [vmem:[#allocation12 + $0x1c0] sm:$0xf] }
 0x23e   :  { %3488 = vmatpush.bf16.msrb.mxu1 %v5903_v20  ;;  %3449 = vmatpush.bf16.msra.mxu2 %v6027_v58  ;;  %v7187_v20 = vld [vmem:[#allocation12 + $0x1cc] sm:$0xf0]  ;;  %v6324_v58 = vld [vmem:[#allocation12 + $0xd0] sm:$0xf0] }
 0x23f   :  { %v2499_v21 = vmul.f32 %v7284_v56, %v2498_v14  ;;  %4304 = vmatpush.bf16.msra.mxu0 %v6275_v23  ;;  %v6218_v56 = vld [vmem:[#allocation10 + $0x3e8] sm:$0xf]  ;;  %v7153_v14 = vld [vmem:[#allocation12 + $0xc4] sm:$0xf]  ;;  %v6203_v23 = vor.u32 %v7124_v12, %v6202_v11  ;;  %v6451_v25 = vor.u32 %v7187_v20, %v6450_v18  ;;  %v6139_v11 = vor.u32 %v7108_v2, %v6138_v61  ;;  %v7070_v18 = vld [vmem:[#allocation10 + $0x22c] sm:$0xf] }
 0x240   :  { %v6219_v10 = vor.u32 %v7128_v59, %v6218_v56  ;;  %v6327_v27 = vor.u32 %v7153_v14, %v6324_v58  ;;  %v7141_v56 = vld [vmem:[#allocation12 + $0x64] sm:$0xf]  ;;  %v6276_v59 = vld [vmem:[#allocation12 + $0x70] sm:$0xf0]  ;;  %v5996_v20 = vld [vmem:[#allocation10 + $0x238] sm:$0xf0] }
 0x241   :  { %v2500_v33 = vmul.f32 %v2499_v21, %v7840_v9  ;;  %v6060_v21 = vld [vmem:[#allocation10 + $0x2b8] sm:$0xf0]  ;;  %v6279_v4 = vor.u32 %v7141_v56, %v6276_v59  ;;  %v6370_v14 = vld [vmem:[#allocation12 + $0x120] sm:$0xf]  ;;  %v7167_v58 = vld [vmem:[#allocation12 + $0x12c] sm:$0xf0] }
 0x242   :  { %3489 = vmatpush.bf16.msrb.mxu1 %v5887_v45  ;;  %3450 = vmatpush.bf16.msra.mxu2 %v6011_v47  ;;  %v6434_v45 = vld [vmem:[#allocation12 + $0x1a0] sm:$0xf]  ;;  %v6063_v47 = vor.u32 %v7086_v28, %v6060_v21  ;;  %v7066_v28 = vld [vmem:[#allocation10 + $0x20c] sm:$0xf]  ;;  %v5980_v21 = vld [vmem:[#allocation10 + $0x218] sm:$0xf0] }
 0x243   :  { %v2502_v16 = vsel %vm2501_vm0, %v7840_v9, %v2500_v33  ;;  %4305 = vmatpush.bf16.msra.mxu0 %v6259_v34  ;;  %v6092_v9 = vld [vmem:[#allocation10 + $0x2f8] sm:$0xf0]  ;;  %v6187_v33 = vor.u32 %v7120_v26, %v6186_v19  ;;  %v6170_v34 = vld [vmem:[#allocation10 + $0x388] sm:$0xf]  ;;  %v7219_v56 = vld [vmem:[#allocation12 + $0x2cc] sm:$0xf0] }
 0x244   :  { %v2505_v39 = vsel %vm2503_vm1, %v2504_v37, %v2502_v16  ;;  %v6095_v0 = vor.u32 %v7094_v60, %v6092_v9  ;;  %v6311_v37 = vor.u32 %v7149_v31, %v6308_v32  ;;  %v7179_v16 = vld [vmem:[#allocation12 + $0x18c] sm:$0xf0]  ;;  %v6171_v42 = vor.u32 %v7116_v35, %v6170_v34  ;;  %v6106_v19 = vld [vmem:[#allocation10 + $0x308] sm:$0xf]  ;;  %v6354_v31 = vld [vmem:[#allocation12 + $0x100] sm:$0xf] }
 0x245   :  { %v2509_v46 = vmul.f32 %v2505_v39, %v471_v36  ;;  %v6435_v36 = vor.u32 %v7183_v29, %v6434_v45  ;;  %v7145_v39 = vld [vmem:[#allocation12 + $0x84] sm:$0xf]  ;;  %v6031_v9 = vor.u32 %v7078_v50, %v6028_v51  ;;  %v6371_v45 = vor.u32 %v7167_v58, %v6370_v14  ;;  %v7163_v32 = vld [vmem:[#allocation12 + $0x10c] sm:$0xf0]  ;;  %v7126_v34 = vld [vmem:[#allocation10 + $0x3ec] sm:$0xf] }
 0x246   :  { %3490 = vmatpush.bf16.msrb.mxu1 %v5871_v49  ;;  %3451 = vmatpush.bf16.msra.mxu2 %v5995_v48  ;;  %v6292_v49 = vld [vmem:[#allocation12 + $0x90] sm:$0xf0]  ;;  %v6220_v35 = vld [vmem:[#allocation10 + $0x3f8] sm:$0xf0]  ;;  %v7185_v59 = vld [vmem:[#allocation12 + $0x1c4] sm:$0xf] }
 0x247   :  { %v2513_v55 = vadd.f32 %v2509_v46, %v7783_v40  ;;  %4306 = vmatpush.bf16.msra.mxu0 %v6243_v6  ;;  %v7112_v46 = vld [vmem:[#allocation10 + $0x374] sm:$0xf0]  ;;  %v6295_v6 = vor.u32 %v7145_v39, %v6292_v49  ;;  %v6346_v39 = vld [vmem:[#allocation12 + $0xe8] sm:$0xf]  ;;  %v6204_v50 = vld [vmem:[#allocation10 + $0x3d8] sm:$0xf0] }
 0x248   :  { %v6155_v60 = vor.u32 %v7112_v46, %v6154_v44  ;;  %v7160_v49 = vld [vmem:[#allocation12 + $0xf4] sm:$0xf0]  ;;  %v2531_v44 = vmul.f32 %v7818_v41, %v7818_v41  ;;  %v6223_v46 = vor.u32 %v7126_v34, %v6220_v35  ;;  %v7211_v58 = vld [vmem:[#allocation12 + $0x28c] sm:$0xf0]  ;;  %v6404_v34 = vld [vmem:[#allocation12 + $0x170] sm:$0xf0] }
 0x249   :  { %v7858_v63 = vmax.f32 %v2513_v55, 0.0  ;;  %v7175_v55 = vld [vmem:[#allocation12 + $0x16c] sm:$0xf0]  ;;  %v7156_v61 = vld [vmem:[#allocation12 + $0xd4] sm:$0xf0] }
 0x24a   :  { %3491 = vmatpush.bf16.msrb.mxu1 %v5855_v3  ;;  %3452 = vmatpush.bf16.msra.mxu2 %v5979_v5  ;;  %v6403_v3 = vor.u32 %v7175_v55, %v6402_v17  ;;  %v6012_v5 = vld [vmem:[#allocation10 + $0x258] sm:$0xf0]  ;;  %v6347_v17 = vor.u32 %v7160_v49, %v6346_v39  ;;  %v6578_v55 = vld [vmem:[#allocation12 + $0x2c0] sm:$0xf]  ;;  %v7875_v2 = vpack.c.bf16 %v2531_v44, %v2531_v44  ;;  %v6282_v35 = vld [vmem:[#allocation12 + $0x68] sm:$0xf] }
 0x24b   :  { %v7864_v40 = vpack.c.bf16 %v7858_v63, %v7858_v63  ;;  %4307 = vmatpush.bf16.msra.mxu0 %v6227_v7  ;;  %v6386_v7 = vld [vmem:[#allocation12 + $0x140] sm:$0xf]  ;;  %v6015_v12 = vor.u32 %v7074_v57, %v6012_v5  ;;  %v6188_v57 = vld [vmem:[#allocation10 + $0x3b8] sm:$0xf0] }
 0x24c   :  { %v6387_v15 = vor.u32 %v7171_v8, %v6386_v7  ;;  %v6562_v8 = vld [vmem:[#allocation12 + $0x2a0] sm:$0xf] }
 0x24d   :  { %3362 = vmatmul.bf16.vlgmr.msra.gmra.mxu3 %v7864_v40  ;;  %3492 = vmatmul.bf16.vlgmr.msrb.gmra.mxu1 %v7824_v52  ;;  %v6418_v52 = vld [vmem:[#allocation12 + $0x180] sm:$0xf] }
 0x24e   :  { %3458 = vmatpush.bf16.msra.mxu3 %v6219_v10  ;;  %3497 = vmatpush.bf16.msrb.mxu2 %v6095_v0  ;;  %v6419_v48 = vor.u32 %v7179_v16, %v6418_v52  ;;  %v7137_v10 = vld [vmem:[#allocation12 + $0x44] sm:$0xf]  ;;  %v6260_v0 = vld [vmem:[#allocation12 + $0x50] sm:$0xf0]  ;;  %v5983_v52 = vor.u32 %v7066_v28, %v5980_v21  ;;  %v7110_v21 = vld [vmem:[#allocation10 + $0x36c] sm:$0xf] }
 0x24f   :  { %4313 = vmatpush.bf16.msra.mxu1 %v6467_v13  ;;  %4352 = vmatpush.bf16.msrb.mxu0 %v6343_v53  ;;  %v6122_v13 = vld [vmem:[#allocation10 + $0x328] sm:$0xf]  ;;  %v7104_v53 = vld [vmem:[#allocation10 + $0x334] sm:$0xf0]  ;;  %v6263_v54 = vor.u32 %v7137_v10, %v6260_v0  ;;  %v6468_v16 = vld [vmem:[#allocation12 + $0x1f0] sm:$0xf0] }
 0x250   :  { %4308 = vmatmul.bf16.vlgmr.msra.gmra.mxu0 %v7867_v62  ;;  %3453 = vmatmul.bf16.vlgmr.msra.gmra.mxu2 %v7844_v1  ;;  %v6123_v26 = vor.u32 %v7104_v53, %v6122_v13  ;;  %v6471_v51 = vor.u32 %v7189_v22, %v6468_v16  ;;  %v7215_v10 = vld [vmem:[#allocation12 + $0x2ac] sm:$0xf0]  ;;  %v7181_v0 = vld [vmem:[#allocation12 + $0x1a4] sm:$0xf]  ;;  %v7152_v13 = vld [vmem:[#allocation12 + $0xb4] sm:$0xf0] }
 0x251   :  { %v6514_v49 = vld [vmem:[#allocation12 + $0x240] sm:$0xf] }
 0x252   :  { %3459 = vmatpush.bf16.msra.mxu3 %v6203_v23  ;;  %3498 = vmatpush.bf16.msrb.mxu2 %v6079_v24  ;;  %v7133_v23 = vld [vmem:[#allocation12 + $0x24] sm:$0xf]  ;;  %v6244_v24 = vld [vmem:[#allocation12 + $0x30] sm:$0xf0] }
 0x253   :  { %4314 = vmatpush.bf16.msra.mxu1 %v6451_v25  ;;  %4353 = vmatpush.bf16.msrb.mxu0 %v6327_v27  ;;  %v5999_v25 = vor.u32 %v7070_v18, %v5996_v20  ;;  %v7100_v27 = vld [vmem:[#allocation10 + $0x314] sm:$0xf0]  ;;  %v6247_v29 = vor.u32 %v7133_v23, %v6244_v24  ;;  %v6172_v18 = vld [vmem:[#allocation10 + $0x398] sm:$0xf0]  ;;  %v7177_v23 = vld [vmem:[#allocation12 + $0x184] sm:$0xf] }
 0x254   :  { %v6107_v38 = vor.u32 %v7100_v27, %v6106_v19  ;;  %v6420_v19 = vld [vmem:[#allocation12 + $0x190] sm:$0xf0] }
 0x256   :  { %3460 = vmatpush.bf16.msra.mxu3 %v6187_v33  ;;  %3499 = vmatpush.bf16.msrb.mxu2 %v6063_v47  ;;  %v7129_v33 = vld [vmem:[#allocation12 + $0x4] sm:$0xf]  ;;  %v6228_v47 = vld [vmem:[#allocation12 + $0x10] sm:$0xf0] }
 0x257   :  { %4315 = vmatpush.bf16.msra.mxu1 %v6435_v36  ;;  %4354 = vmatpush.bf16.msrb.mxu0 %v6311_v37  ;;  %v6594_v36 = vld [vmem:[#allocation12 + $0x2e0] sm:$0xf]  ;;  %v7223_v37 = vld [vmem:[#allocation12 + $0x2ec] sm:$0xf0] }
 0x25a   :  { %3461 = vmatpush.bf16.msra.mxu3 %v6171_v42  ;;  %3500 = vmatpush.bf16.msrb.mxu2 %v6047_v43  ;;  %v6355_v42 = vor.u32 %v7163_v32, %v6354_v31  ;;  %v6231_v43 = vor.u32 %v7129_v33, %v6228_v47  ;;  %v6530_v32 = vld [vmem:[#allocation12 + $0x260] sm:$0xf]  ;;  %v7207_v33 = vld [vmem:[#allocation12 + $0x26c] sm:$0xf0]  ;;  %v7173_v47 = vld [vmem:[#allocation12 + $0x164] sm:$0xf] }
 0x25b   :  { %4316 = vmatpush.bf16.msra.mxu1 %v6419_v48  ;;  %4355 = vmatpush.bf16.msrb.mxu0 %v6295_v6  ;;  %v6595_v48 = vor.u32 %v7223_v37, %v6594_v36  ;;  %v7122_v6 = vld [vmem:[#allocation10 + $0x3cc] sm:$0xf]  ;;  %v7144_v36 = vld [vmem:[#allocation12 + $0x74] sm:$0xf0]  ;;  %v6531_v22 = vor.u32 %v7207_v33, %v6530_v32  ;;  %v6407_v16 = vor.u32 %v7173_v47, %v6404_v34  ;;  %v6706_v47 = vld [vmem:[#allocation12 + $0x3c0] sm:$0xf] }
 0x25c   :  { %v6207_v41 = vor.u32 %v7122_v6, %v6204_v50  ;;  %v6283_v39 = vor.u32 %v7144_v36, %v6282_v35  ;;  %v7140_v6 = vld [vmem:[#allocation12 + $0x54] sm:$0xf0]  ;;  %v7251_v34 = vld [vmem:[#allocation12 + $0x3cc] sm:$0xf0] }
 0x25d   :  { %3414 = vmatmul.bf16.vlgmr.msrb.gmra.mxu3 %v7864_v40 }
 0x25e   :  { %3462 = vmatpush.bf16.msra.mxu3 %v6155_v60  ;;  %3501 = vmatpush.bf16.msrb.mxu2 %v6031_v9  ;;  %v6452_v60 = vld [vmem:[#allocation12 + $0x1d0] sm:$0xf0]  ;;  %v6330_v9 = vld [vmem:[#allocation12 + $0xc8] sm:$0xf] }
 0x25f   :  { %4317 = vmatpush.bf16.msra.mxu1 %v6403_v3  ;;  %4356 = vmatpush.bf16.msrb.mxu0 %v6279_v4  ;;  %v6579_v3 = vor.u32 %v7219_v56, %v6578_v55  ;;  %v7118_v4 = vld [vmem:[#allocation10 + $0x3ac] sm:$0xf]  ;;  %v6455_v5 = vor.u32 %v7185_v59, %v6452_v60  ;;  %v6331_v7 = vor.u32 %v7156_v61, %v6330_v9  ;;  %v6124_v55 = vld [vmem:[#allocation10 + $0x338] sm:$0xf0]  ;;  %v6498_v60 = vld [vmem:[#allocation12 + $0x220] sm:$0xf] }
 0x260   :  { %v6191_v53 = vor.u32 %v7118_v4, %v6188_v57  ;;  %v7199_v9 = vld [vmem:[#allocation12 + $0x22c] sm:$0xf0]  ;;  %v7165_v61 = vld [vmem:[#allocation12 + $0x124] sm:$0xf]  ;;  %v7136_v4 = vld [vmem:[#allocation12 + $0x34] sm:$0xf0] }
 0x261   :  { %v7098_v57 = vld [vmem:[#allocation10 + $0x30c] sm:$0xf] }
 0x262   :  { %3463 = vmatpush.bf16.msra.mxu3 %v6139_v11  ;;  %3502 = vmatpush.bf16.msrb.mxu2 %v6015_v12  ;;  %v6436_v11 = vld [vmem:[#allocation12 + $0x1b0] sm:$0xf0]  ;;  %v6314_v12 = vld [vmem:[#allocation12 + $0xa8] sm:$0xf] }
 0x263   :  { %4318 = vmatpush.bf16.msra.mxu1 %v6387_v15  ;;  %4357 = vmatpush.bf16.msrb.mxu0 %v6263_v54  ;;  %v6563_v15 = vor.u32 %v7215_v10, %v6562_v8  ;;  %v7114_v54 = vld [vmem:[#allocation10 + $0x38c] sm:$0xf]  ;;  %v6439_v20 = vor.u32 %v7181_v0, %v6436_v11  ;;  %v6315_v14 = vor.u32 %v7152_v13, %v6314_v12  ;;  %v6108_v8 = vld [vmem:[#allocation10 + $0x318] sm:$0xf0]  ;;  %v6482_v10 = vld [vmem:[#allocation12 + $0x200] sm:$0xf] }
 0x264   :  { %v6175_v27 = vor.u32 %v7114_v54, %v6172_v18  ;;  %v7195_v0 = vld [vmem:[#allocation12 + $0x20c] sm:$0xf0]  ;;  %v7161_v13 = vld [vmem:[#allocation12 + $0x104] sm:$0xf]  ;;  %v7132_v18 = vld [vmem:[#allocation12 + $0x14] sm:$0xf0] }
 0x266   :  { %3464 = vmatpush.bf16.msra.mxu3 %v6123_v26  ;;  %3503 = vmatpush.bf16.msrb.mxu2 %v5999_v25  ;;  %v6298_v26 = vld [vmem:[#allocation12 + $0x88] sm:$0xf]  ;;  %v7148_v25 = vld [vmem:[#allocation12 + $0x94] sm:$0xf0] }
 0x267   :  { %4319 = vmatpush.bf16.msra.mxu1 %v6371_v45  ;;  %4358 = vmatpush.bf16.msrb.mxu0 %v6247_v29  ;;  %v6156_v45 = vld [vmem:[#allocation10 + $0x378] sm:$0xf0]  ;;  %v6423_v29 = vor.u32 %v7177_v23, %v6420_v19  ;;  %v6299_v31 = vor.u32 %v7148_v25, %v6298_v26  ;;  %v6474_v23 = vld [vmem:[#allocation12 + $0x1e8] sm:$0xf]  ;;  %v6111_v19 = vor.u32 %v7098_v57, %v6108_v8  ;;  %v7192_v25 = vld [vmem:[#allocation12 + $0x1f4] sm:$0xf0] }
 0x268   :  { %v6159_v37 = vor.u32 %v7110_v21, %v6156_v45  ;;  %v6483_v26 = vor.u32 %v7195_v0, %v6482_v10  ;;  %v7885_v21 = vld [vmem:[#allocation13 + $0x4] ss:$8 sm:$0xf]  ;;  %v6475_v35 = vor.u32 %v7192_v25, %v6474_v23  ;;  %v6426_v10 = vld [vmem:[#allocation12 + $0x188] sm:$0xf] }
 0x269   :  { %v6548_v8 = vld [vmem:[#allocation12 + $0x290] sm:$0xf0]  ;;  %v7142_v25 = vld [vmem:[#allocation12 + $0x6c] sm:$0xf] }
 0x26a   :  { %3465 = vmatpush.bf16.msra.mxu3 %v6107_v38  ;;  %3504 = vmatpush.bf16.msrb.mxu2 %v5983_v52  ;;  %v7881_v24 = vpop.f32.mrf.mxu0  ;;  %v7106_v38 = vld [vmem:[#allocation10 + $0x34c] sm:$0xf]  ;;  %v6140_v52 = vld [vmem:[#allocation10 + $0x358] sm:$0xf0]  ;;  %v6532_v23 = vld [vmem:[#allocation12 + $0x270] sm:$0xf0] }
 0x26b   :  { %4320 = vmatpush.bf16.msra.mxu1 %v6355_v42  ;;  %4359 = vmatpush.bf16.msrb.mxu0 %v6231_v43  ;;  %v7203_v42 = vld [vmem:[#allocation12 + $0x24c] sm:$0xf0]  ;;  %v7169_v43 = vld [vmem:[#allocation12 + $0x144] sm:$0xf]  ;;  %v6143_v50 = vor.u32 %v7106_v38, %v6140_v52  ;;  %v6458_v38 = vld [vmem:[#allocation12 + $0x1c8] sm:$0xf] }
 0x26c   :  { %v7188_v52 = vld [vmem:[#allocation12 + $0x1d4] sm:$0xf0] }
 0x26d   :  { %3505 = vmatmul.bf16.vlgmr.msrb.gmra.mxu2 %v7844_v1  ;;  %3466 = vmatmul.bf16.vlgmr.msra.gmra.mxu3 %v7864_v40  ;;  %v6546_v1 = vld [vmem:[#allocation12 + $0x280] sm:$0xf] }
 0x26e   :  { %3510 = vmatpush.bf16.msrb.mxu3 %v6223_v46  ;;  %4326 = vmatpush.bf16.msra.mxu2 %v6595_v48  ;;  %v6547_v28 = vor.u32 %v7211_v58, %v6546_v1  ;;  %v6388_v46 = vld [vmem:[#allocation12 + $0x150] sm:$0xf0]  ;;  %v6266_v48 = vld [vmem:[#allocation12 + $0x48] sm:$0xf]  ;;  %v7221_v1 = vld [vmem:[#allocation12 + $0x2e4] sm:$0xf] }
 0x26f   :  { %4365 = vmatpush.bf16.msrb.mxu1 %v6471_v51  ;;  %4404 = vmatpush.bf16.msra.mxu0 %v6347_v17  ;;  %v6515_v51 = vor.u32 %v7203_v42, %v6514_v49  ;;  %v7102_v17 = vld [vmem:[#allocation10 + $0x32c] sm:$0xf]  ;;  %v6391_v56 = vor.u32 %v7169_v43, %v6388_v46  ;;  %v6267_v59 = vor.u32 %v7140_v6, %v6266_v48  ;;  %v6596_v58 = vld [vmem:[#allocation12 + $0x2f0] sm:$0xf0]  ;;  %v2667_v49 = vperm.slane %v7885_v21, 0 }
 0x270   :  { %4321 = vmatmul.bf16.vlgmr.msra.gmra.mxu1 %v7875_v2  ;;  %4360 = vmatmul.bf16.vlgmr.msrb.gmra.mxu0 %v7867_v62  ;;  %v6599_v33 = vor.u32 %v7221_v1, %v6596_v58  ;;  %v6707_v43 = vor.u32 %v7251_v34, %v6706_v47  ;;  %v6690_v46 = vld [vmem:[#allocation12 + $0x3a0] sm:$0xf]  ;;  %v7247_v48 = vld [vmem:[#allocation12 + $0x3ac] sm:$0xf0]  ;;  %v6459_v6 = vor.u32 %v7188_v52, %v6458_v38  ;;  %v7205_v58 = vld [vmem:[#allocation12 + $0x264] sm:$0xf] }
 0x271   :  { %v7201_v34 = vld [vmem:[#allocation12 + $0x244] sm:$0xf]  ;;  %v6268_v38 = vld [vmem:[#allocation12 + $0x58] sm:$0xf0]  ;;  %v2668_v52 = vperm.slane %v7885_v21, 1 }
 0x272   :  { %3511 = vmatpush.bf16.msrb.mxu3 %v6207_v41  ;;  %4327 = vmatpush.bf16.msra.mxu2 %v6579_v3  ;;  %v3326_v44 = vpop.f32.mrf.mxu0  ;;  %v6372_v41 = vld [vmem:[#allocation12 + $0x130] sm:$0xf0]  ;;  %v6250_v3 = vld [vmem:[#allocation12 + $0x28] sm:$0xf] }
 0x273   :  { %4366 = vmatpush.bf16.msrb.mxu1 %v6455_v5  ;;  %4405 = vmatpush.bf16.msra.mxu0 %v6331_v7  ;;  %v6127_v5 = vor.u32 %v7102_v17, %v6124_v55  ;;  %v6499_v7 = vor.u32 %v7199_v9, %v6498_v60  ;;  %v6375_v11 = vor.u32 %v7165_v61, %v6372_v41  ;;  %v6564_v17 = vld [vmem:[#allocation12 + $0x2b0] sm:$0xf0]  ;;  %v6442_v55 = vld [vmem:[#allocation12 + $0x1a8] sm:$0xf]  ;;  %v6316_v60 = vld [vmem:[#allocation12 + $0xb8] sm:$0xf0] }
 0x274   :  { %v6251_v12 = vor.u32 %v7136_v4, %v6250_v3  ;;  %v3325_v9 = vadd.f32 %v7881_v24, %v2667_v49  ;;  %v6691_v61 = vor.u32 %v7247_v48, %v6690_v46  ;;  %v6674_v3 = vld [vmem:[#allocation12 + $0x380] sm:$0xf]  ;;  %v7243_v4 = vld [vmem:[#allocation12 + $0x38c] sm:$0xf0]  ;;  %v7197_v48 = vld [vmem:[#allocation12 + $0x224] sm:$0xf] }
 0x276   :  { %3512 = vmatpush.bf16.msrb.mxu3 %v6191_v53  ;;  %4328 = vmatpush.bf16.msra.mxu2 %v6563_v15  ;;  %v6356_v53 = vld [vmem:[#allocation12 + $0x110] sm:$0xf0]  ;;  %v6234_v15 = vld [vmem:[#allocation12 + $0x8] sm:$0xf] }
 0x277   :  { %4367 = vmatpush.bf16.msrb.mxu1 %v6439_v20  ;;  %4406 = vmatpush.bf16.msra.mxu0 %v6315_v14  ;;  %v6722_v20 = vld [vmem:[#allocation12 + $0x3e0] sm:$0xf]  ;;  %v7255_v14 = vld [vmem:[#allocation12 + $0x3ec] sm:$0xf0]  ;;  %v6359_v45 = vor.u32 %v7161_v13, %v6356_v53  ;;  %v6300_v13 = vld [vmem:[#allocation12 + $0x98] sm:$0xf0]  ;;  %v6675_v53 = vor.u32 %v7243_v4, %v6674_v3 }
 0x278   :  { %v6723_v32 = vor.u32 %v7255_v14, %v6722_v20  ;;  %v7239_v20 = vld [vmem:[#allocation12 + $0x36c] sm:$0xf0] }
 0x27a   :  { %3513 = vmatpush.bf16.msrb.mxu3 %v6175_v27  ;;  %4329 = vmatpush.bf16.msra.mxu2 %v6547_v28  ;;  %v7883_v54 = vpop.f32.mrf.mxu0  ;;  %v7158_v27 = vld [vmem:[#allocation12 + $0xec] sm:$0xf]  ;;  %v6348_v28 = vld [vmem:[#allocation12 + $0xf8] sm:$0xf0] }
 0x27b   :  { %4368 = vmatpush.bf16.msrb.mxu1 %v6423_v29  ;;  %4407 = vmatpush.bf16.msra.mxu0 %v6299_v31  ;;  %v6235_v29 = vor.u32 %v7132_v18, %v6234_v15  ;;  %v2532_v31 = vmul.f32 %v7838_v30, %v7838_v30  ;;  %v6351_v36 = vor.u32 %v7158_v27, %v6348_v28  ;;  %v6658_v18 = vld [vmem:[#allocation12 + $0x360] sm:$0xf]  ;;  %v6284_v27 = vld [vmem:[#allocation12 + $0x78] sm:$0xf0] }
 0x27c   :  { %v6659_v28 = vor.u32 %v7239_v20, %v6658_v18  ;;  %v7190_v20 = vld [vmem:[#allocation12 + $0x1ec] sm:$0xf] }
 0x27d   :  { %v7890_v30 = vpack.c.bf16 %v2532_v31, %v2532_v31  ;;  %v7235_v31 = vld [vmem:[#allocation12 + $0x34c] sm:$0xf0] }
 0x27e   :  { %3514 = vmatpush.bf16.msrb.mxu3 %v6159_v37  ;;  %4330 = vmatpush.bf16.msra.mxu2 %v6531_v22  ;;  %v7217_v37 = vld [vmem:[#allocation12 + $0x2c4] sm:$0xf]  ;;  %v6580_v22 = vld [vmem:[#allocation12 + $0x2d0] sm:$0xf0] }
 0x27f   :  { %4369 = vmatpush.bf16.msrb.mxu1 %v6407_v16  ;;  %4408 = vmatpush.bf16.msra.mxu0 %v6283_v39  ;;  %v7154_v16 = vld [vmem:[#allocation12 + $0xcc] sm:$0xf]  ;;  %v6332_v39 = vld [vmem:[#allocation12 + $0xd8] sm:$0xf0]  ;;  %v6583_v44 = vor.u32 %v7217_v37, %v6580_v22  ;;  %v7172_v37 = vld [vmem:[#allocation12 + $0x154] sm:$0xf0] }
 0x280   :  { %v7138_v22 = vld [vmem:[#allocation12 + $0x4c] sm:$0xf] }
 0x281   :  { %v6271_v46 = vor.u32 %v7138_v22, %v6268_v38  ;;  %v6570_v22 = vld [vmem:[#allocation12 + $0x2a8] sm:$0xf]  ;;  %v7216_v38 = vld [vmem:[#allocation12 + $0x2b4] sm:$0xf0] }
 0x282   :  { %3515 = vmatpush.bf16.msrb.mxu3 %v6143_v50  ;;  %4331 = vmatpush.bf16.msra.mxu2 %v6515_v51  ;;  %v3378_v42 = vpop.f32.mrf.mxu0  ;;  %v6335_v50 = vor.u32 %v7154_v16, %v6332_v39  ;;  %v7213_v51 = vld [vmem:[#allocation12 + $0x2a4] sm:$0xf] }
 0x283   :  { %4370 = vmatpush.bf16.msrb.mxu1 %v6391_v56  ;;  %4409 = vmatpush.bf16.msra.mxu0 %v6267_v59  ;;  %v7184_v56 = vld [vmem:[#allocation12 + $0x1b4] sm:$0xf0]  ;;  %v7150_v59 = vld [vmem:[#allocation12 + $0xac] sm:$0xf]  ;;  %v6567_v41 = vor.u32 %v7213_v51, %v6564_v17  ;;  %v6626_v42 = vld [vmem:[#allocation12 + $0x320] sm:$0xf] }
 0x284   :  { %v6319_v57 = vor.u32 %v7150_v59, %v6316_v60  ;;  %v7168_v51 = vld [vmem:[#allocation12 + $0x134] sm:$0xf0]  ;;  %v7134_v17 = vld [vmem:[#allocation12 + $0x2c] sm:$0xf] }
 0x286   :  { %3516 = vmatpush.bf16.msrb.mxu3 %v6127_v5  ;;  %4332 = vmatpush.bf16.msra.mxu2 %v6499_v7  ;;  %v7209_v7 = vld [vmem:[#allocation12 + $0x284] sm:$0xf] }
 0x287   :  { %4371 = vmatpush.bf16.msrb.mxu1 %v6375_v11  ;;  %4410 = vmatpush.bf16.msra.mxu0 %v6251_v12  ;;  %v7180_v11 = vld [vmem:[#allocation12 + $0x194] sm:$0xf0]  ;;  %v7146_v12 = vld [vmem:[#allocation12 + $0x8c] sm:$0xf]  ;;  %v6551_v15 = vor.u32 %v7209_v7, %v6548_v8 }
 0x288   :  { %v6427_v14 = vor.u32 %v7180_v11, %v6426_v10  ;;  %v6303_v1 = vor.u32 %v7146_v12, %v6300_v13  ;;  %v7164_v7 = vld [vmem:[#allocation12 + $0x114] sm:$0xf0]  ;;  %v7130_v10 = vld [vmem:[#allocation12 + $0xc] sm:$0xf]  ;;  %v6236_v11 = vld [vmem:[#allocation12 + $0x18] sm:$0xf0] }
 0x289   :  { %v6724_v12 = vld [vmem:[#allocation12 + $0x3f0] sm:$0xf0]  ;;  %v6602_v13 = vld [vmem:[#allocation12 + $0x2e8] sm:$0xf] }
 0x28a   :  { %3517 = vmatpush.bf16.msrb.mxu3 %v6111_v19  ;;  %4333 = vmatpush.bf16.msra.mxu2 %v6483_v26  ;;  %v3337_v5 = vpop.f32.mrf.mxu1  ;;  %v7899_v24 = vpop.f32.mrf.mxu0  ;;  %v6410_v19 = vld [vmem:[#allocation12 + $0x168] sm:$0xf]  ;;  %v7176_v26 = vld [vmem:[#allocation12 + $0x174] sm:$0xf0] }
 0x28b   :  { %4372 = vmatpush.bf16.msrb.mxu1 %v6359_v45  ;;  %4411 = vmatpush.bf16.msra.mxu0 %v6235_v29  ;;  %v7897_v0 = vadd.f32 %v3337_v5, %v3325_v9  ;;  %v6535_v45 = vor.u32 %v7205_v58, %v6532_v23  ;;  %v6642_v29 = vld [vmem:[#allocation12 + $0x340] sm:$0xf]  ;;  %v6362_v5 = vld [vmem:[#allocation12 + $0x108] sm:$0xf]  ;;  %v6239_v23 = vor.u32 %v7130_v10, %v6236_v11  ;;  %v7233_v11 = vld [vmem:[#allocation12 + $0x344] sm:$0xf] }
 0x28c   :  { %v6643_v39 = vor.u32 %v7235_v31, %v6642_v29  ;;  %v6610_v9 = vld [vmem:[#allocation12 + $0x300] sm:$0xf]  ;;  %v6363_v58 = vor.u32 %v7164_v7, %v6362_v5  ;;  %v7220_v29 = vld [vmem:[#allocation12 + $0x2d4] sm:$0xf0]  ;;  %v7186_v31 = vld [vmem:[#allocation12 + $0x1cc] sm:$0xf] }
 0x28d   :  { %3518 = vmatmul.bf16.vlgmr.msrb.gmra.mxu3 %v7864_v40  ;;  %4334 = vmatmul.bf16.vlgmr.msra.gmra.mxu2 %v7890_v30  ;;  %v6443_v40 = vor.u32 %v7184_v56, %v6442_v55  ;;  %v6252_v55 = vld [vmem:[#allocation12 + $0x38] sm:$0xf0]  ;;  %v3377_v56 = vadd.f32 %v7883_v54, %v2668_v52  ;;  %v7253_v54 = vld [vmem:[#allocation12 + $0x3e4] sm:$0xf]  ;;  %v2669_v52 = vperm.slane %v7885_v21, 2 }
 0x28e   :  { %4339 = vmatpush.bf16.msra.mxu3 %v6723_v32  ;;  %4378 = vmatpush.bf16.msrb.mxu2 %v6599_v33  ;;  %v6411_v32 = vor.u32 %v7176_v26, %v6410_v19  ;;  %v6287_v33 = vor.u32 %v7142_v25, %v6284_v27  ;;  %v6255_v4 = vor.u32 %v7134_v17, %v6252_v55  ;;  %v7249_v25 = vld [vmem:[#allocation12 + $0x3c4] sm:$0xf]  ;;  %v6428_v17 = vld [vmem:[#allocation12 + $0x198] sm:$0xf0] }
 0x28f   :  { %4417 = vmatpush.bf16.msra.mxu1 %v6475_v35  ;;  %4456 = vmatpush.bf16.msrb.mxu0 %v6351_v36  ;;  %v6516_v35 = vld [vmem:[#allocation12 + $0x250] sm:$0xf0]  ;;  %v6394_v36 = vld [vmem:[#allocation12 + $0x148] sm:$0xf]  ;;  %v6727_v19 = vor.u32 %v7253_v54, %v6724_v12 }
 0x290   :  { %4373 = vmatmul.bf16.vlgmr.msrb.gmra.mxu1 %v7875_v2  ;;  %4412 = vmatmul.bf16.vlgmr.msra.gmra.mxu0 %v7867_v62  ;;  %v6519_v49 = vor.u32 %v7201_v34, %v6516_v35  ;;  %v7245_v35 = vld [vmem:[#allocation12 + $0x3a4] sm:$0xf]  ;;  %v6644_v12 = vld [vmem:[#allocation12 + $0x350] sm:$0xf0] }
 0x292   :  { %4340 = vmatpush.bf16.msra.mxu3 %v6707_v43  ;;  %4379 = vmatpush.bf16.msrb.mxu2 %v6583_v44  ;;  %v3339_v47 = vpop.f32.mrf.mxu1  ;;  %v3430_v16 = vpop.f32.mrf.mxu0  ;;  %v7231_v43 = vld [vmem:[#allocation12 + $0x32c] sm:$0xf0]  ;;  %v6395_v44 = vor.u32 %v7172_v37, %v6394_v36  ;;  %v6692_v37 = vld [vmem:[#allocation12 + $0x3b0] sm:$0xf0] }
 0x293   :  { %4418 = vmatpush.bf16.msra.mxu1 %v6459_v6  ;;  %4457 = vmatpush.bf16.msrb.mxu0 %v6335_v50  ;;  %v6500_v6 = vld [vmem:[#allocation12 + $0x230] sm:$0xf0]  ;;  %v6378_v50 = vld [vmem:[#allocation12 + $0x128] sm:$0xf]  ;;  %v6627_v59 = vor.u32 %v7231_v43, %v6626_v42  ;;  %v7182_v16 = vld [vmem:[#allocation12 + $0x1ac] sm:$0xf]  ;;  %v6571_v42 = vor.u32 %v7216_v38, %v6570_v22 }
 0x294   :  { %v6503_v60 = vor.u32 %v7197_v48, %v6500_v6  ;;  %v6379_v3 = vor.u32 %v7168_v51, %v6378_v50  ;;  %v7241_v43 = vld [vmem:[#allocation12 + $0x384] sm:$0xf]  ;;  %v6554_v48 = vld [vmem:[#allocation12 + $0x288] sm:$0xf]  ;;  %v7212_v6 = vld [vmem:[#allocation12 + $0x294] sm:$0xf0]  ;;  %v3429_v50 = vadd.f32 %v7899_v24, %v2669_v52 }
 0x295   :  { %v7178_v51 = vld [vmem:[#allocation12 + $0x18c] sm:$0xf]  ;;  %v6730_v22 = vld [vmem:[#allocation12 + $0x3e8] sm:$0xf]  ;;  %v7256_v38 = vld [vmem:[#allocation12 + $0x3f4] sm:$0xf0] }
 0x296   :  { %4341 = vmatpush.bf16.msra.mxu3 %v6691_v61  ;;  %4380 = vmatpush.bf16.msrb.mxu2 %v6567_v41  ;;  %v7227_v61 = vld [vmem:[#allocation12 + $0x30c] sm:$0xf0]  ;;  %v7193_v41 = vld [vmem:[#allocation12 + $0x204] sm:$0xf]  ;;  %v7222_v52 = vld [vmem:[#allocation12 + $0x2ec] sm:$0xf] }
 0x297   :  { %4419 = vmatpush.bf16.msra.mxu1 %v6443_v40  ;;  %4458 = vmatpush.bf16.msrb.mxu0 %v6319_v57  ;;  %v6484_v57 = vld [vmem:[#allocation12 + $0x210] sm:$0xf0] }
 0x298   :  { %v6487_v18 = vor.u32 %v7193_v41, %v6484_v57  ;;  %v6660_v41 = vld [vmem:[#allocation12 + $0x370] sm:$0xf0]  ;;  %v6412_v57 = vld [vmem:[#allocation12 + $0x178] sm:$0xf0] }
 0x29a   :  { %4342 = vmatpush.bf16.msra.mxu3 %v6675_v53  ;;  %4381 = vmatpush.bf16.msrb.mxu2 %v6551_v15  ;;  %v3389_v40 = vpop.f32.mrf.mxu1  ;;  %v7224_v53 = vld [vmem:[#allocation12 + $0x2f4] sm:$0xf0]  ;;  %v6611_v15 = vor.u32 %v7227_v61, %v6610_v9  ;;  %v7237_v9 = vld [vmem:[#allocation12 + $0x364] sm:$0xf]  ;;  %v6431_v61 = vor.u32 %v7178_v51, %v6428_v17  ;;  %v6588_v51 = vld [vmem:[#allocation12 + $0x2d8] sm:$0xf0] }
 0x29b   :  { %4420 = vmatpush.bf16.msra.mxu1 %v6427_v14  ;;  %4459 = vmatpush.bf16.msrb.mxu0 %v6303_v1  ;;  %v7903_v8 = vadd.f32 %v3389_v40, %v3377_v56  ;;  %v6476_v14 = vld [vmem:[#allocation12 + $0x1f8] sm:$0xf0]  ;;  %v2533_v1 = vmul.f32 %v7858_v63, %v7858_v63  ;;  %v6603_v26 = vor.u32 %v7224_v53, %v6602_v13  ;;  %v7174_v40 = vld [vmem:[#allocation12 + $0x16c] sm:$0xf]  ;;  %v6522_v13 = vld [vmem:[#allocation12 + $0x248] sm:$0xf] }
 0x29c   :  { %v6479_v27 = vor.u32 %v7190_v20, %v6476_v14  ;;  %v6663_v7 = vor.u32 %v7237_v9, %v6660_v41  ;;  %v6415_v54 = vor.u32 %v7174_v40, %v6412_v57  ;;  %v7204_v53 = vld [vmem:[#allocation12 + $0x254] sm:$0xf0]  ;;  %v6572_v41 = vld [vmem:[#allocation12 + $0x2b8] sm:$0xf0]  ;;  %v6682_v40 = vld [vmem:[#allocation12 + $0x388] sm:$0xf] }
 0x29d   :  { %v7248_v9 = vld [vmem:[#allocation12 + $0x3b4] sm:$0xf0] }
 0x29e   :  { %4343 = vmatpush.bf16.msra.mxu3 %v6659_v28  ;;  %4382 = vmatpush.bf16.msrb.mxu2 %v6535_v45  ;;  %v6708_v28 = vld [vmem:[#allocation12 + $0x3d0] sm:$0xf0]  ;;  %v6586_v45 = vld [vmem:[#allocation12 + $0x2c8] sm:$0xf]  ;;  %v7244_v57 = vld [vmem:[#allocation12 + $0x394] sm:$0xf0] }
 0x29f   :  { %4421 = vmatpush.bf16.msra.mxu1 %v6411_v32  ;;  %4460 = vmatpush.bf16.msrb.mxu0 %v6287_v33  ;;  %v6460_v32 = vld [vmem:[#allocation12 + $0x1d8] sm:$0xf0]  ;;  %v7907_v33 = vpack.c.bf16 %v2533_v1, %v2533_v1  ;;  %v6711_v47 = vor.u32 %v7249_v25, %v6708_v28  ;;  %v6587_v34 = vor.u32 %v7220_v29, %v6586_v45  ;;  %v7200_v25 = vld [vmem:[#allocation12 + $0x234] sm:$0xf0] }
 0x2a0   :  { %v6463_v36 = vor.u32 %v7186_v31, %v6460_v32  ;;  %v6647_v1 = vor.u32 %v7233_v11, %v6644_v12  ;;  %v6380_v28 = vld [vmem:[#allocation12 + $0x138] sm:$0xf0]  ;;  %v7225_v32 = vld [vmem:[#allocation12 + $0x304] sm:$0xf] }
 0x2a2   :  { %4344 = vmatpush.bf16.msra.mxu3 %v6643_v39  ;;  %4383 = vmatpush.bf16.msrb.mxu2 %v6519_v49  ;;  %v3391_v63 = vpop.f32.mrf.mxu1  ;;  %v6444_v39 = vld [vmem:[#allocation12 + $0x1b8] sm:$0xf0]  ;;  %v6695_v49 = vor.u32 %v7245_v35, %v6692_v37  ;;  %v7196_v35 = vld [vmem:[#allocation12 + $0x214] sm:$0xf0] }
 0x2a3   :  { %4422 = vmatpush.bf16.msra.mxu1 %v6395_v44  ;;  %4461 = vmatpush.bf16.msrb.mxu0 %v6271_v46  ;;  %v6447_v44 = vor.u32 %v7182_v16, %v6444_v39  ;;  %v6676_v46 = vld [vmem:[#allocation12 + $0x390] sm:$0xf0]  ;;  %v6364_v37 = vld [vmem:[#allocation12 + $0x118] sm:$0xf0] }
 0x2a4   :  { %v6612_v63 = vld [vmem:[#allocation12 + $0x310] sm:$0xf0]  ;;  %v6604_v16 = vld [vmem:[#allocation12 + $0x2f8] sm:$0xf0] }
 0x2a5   :  { %v6615_v39 = vor.u32 %v7225_v32, %v6612_v63  ;;  %v7232_v32 = vld [vmem:[#allocation12 + $0x334] sm:$0xf0] }
 0x2a6   :  { %4345 = vmatpush.bf16.msra.mxu3 %v6627_v59  ;;  %4384 = vmatpush.bf16.msrb.mxu2 %v6503_v60  ;;  %v6679_v59 = vor.u32 %v7241_v43, %v6676_v46  ;;  %v6555_v60 = vor.u32 %v7212_v6, %v6554_v48  ;;  %v6731_v43 = vor.u32 %v7256_v38, %v6730_v22  ;;  %v6714_v46 = vld [vmem:[#allocation12 + $0x3c8] sm:$0xf]  ;;  %v7252_v48 = vld [vmem:[#allocation12 + $0x3d4] sm:$0xf0]  ;;  %v7194_v38 = vld [vmem:[#allocation12 + $0x20c] sm:$0xf] }
 0x2a7   :  { %4423 = vmatpush.bf16.msra.mxu1 %v6379_v3  ;;  %4462 = vmatpush.bf16.msrb.mxu0 %v6255_v4  ;;  %v6538_v3 = vld [vmem:[#allocation12 + $0x268] sm:$0xf]  ;;  %v7208_v4 = vld [vmem:[#allocation12 + $0x274] sm:$0xf0] }
 0x2a8   :  { %v6539_v10 = vor.u32 %v7208_v4, %v6538_v3  ;;  %v2670_v3 = vperm.slane %v7885_v21, 3  ;;  %v7228_v22 = vld [vmem:[#allocation12 + $0x314] sm:$0xf0] }
 0x2aa   :  { %4346 = vmatpush.bf16.msra.mxu3 %v6611_v15  ;;  %4385 = vmatpush.bf16.msrb.mxu2 %v6487_v18  ;;  %v7915_v55 = vpop.f32.mrf.mxu0  ;;  %v7170_v15 = vld [vmem:[#allocation12 + $0x14c] sm:$0xf]  ;;  %v6396_v18 = vld [vmem:[#allocation12 + $0x158] sm:$0xf0] }
 0x2ab   :  { %4424 = vmatpush.bf16.msra.mxu1 %v6363_v58  ;;  %4463 = vmatpush.bf16.msrb.mxu0 %v6239_v23  ;;  %v6523_v58 = vor.u32 %v7204_v53, %v6522_v13  ;;  %v7229_v23 = vld [vmem:[#allocation12 + $0x324] sm:$0xf]  ;;  %v3481_v11 = vadd.f32 %v7915_v55, %v2670_v3  ;;  %v6683_v13 = vor.u32 %v7244_v57, %v6682_v40  ;;  %v6666_v53 = vld [vmem:[#allocation12 + $0x368] sm:$0xf]  ;;  %v7238_v40 = vld [vmem:[#allocation12 + $0x36c] sm:$0xf] }
 0x2ac   :  { %v3441_v56 = vpop.f32.mrf.mxu1  ;;  %v6668_v57 = vld [vmem:[#allocation12 + $0x378] sm:$0xf0] }
 0x2ad   :  { %4347 = vmatmul.bf16.vlgmr.msra.gmra.mxu3 %v7907_v33  ;;  %4386 = vmatmul.bf16.vlgmr.msrb.gmra.mxu2 %v7890_v30 }
 0x2ae   :  { %4391 = vmatpush.bf16.msrb.mxu3 %v6727_v19  ;;  %4430 = vmatpush.bf16.msra.mxu2 %v6603_v26  ;;  %v6628_v19 = vld [vmem:[#allocation12 + $0x330] sm:$0xf0]  ;;  %v6506_v26 = vld [vmem:[#allocation12 + $0x228] sm:$0xf] }
 0x2af   :  { %4469 = vmatpush.bf16.msrb.mxu1 %v6479_v27  ;;  %4464 = vmatmul.bf16.vlgmr.msrb.gmra.mxu0 %v7867_v62  ;;  %v7917_v62 = vadd.f32 %v3441_v56, %v3429_v50  ;;  %v7166_v27 = vld [vmem:[#allocation12 + $0x12c] sm:$0xf]  ;;  %v6631_v29 = vor.u32 %v7229_v23, %v6628_v19  ;;  %v6507_v31 = vor.u32 %v7200_v25, %v6506_v26  ;;  %v6650_v23 = vld [vmem:[#allocation12 + $0x348] sm:$0xf]  ;;  %v6524_v26 = vld [vmem:[#allocation12 + $0x258] sm:$0xf0] }
 0x2b0   :  { %4425 = vmatmul.bf16.vlgmr.msra.gmra.mxu1 %v7875_v2  ;;  %v3350_v24 = vpop.f32.mrf.mxu2  ;;  %v7218_v50 = vld [vmem:[#allocation12 + $0x2cc] sm:$0xf]  ;;  %v6715_v56 = vor.u32 %v7252_v48, %v6714_v46  ;;  %v6716_v48 = vld [vmem:[#allocation12 + $0x3d8] sm:$0xf0] }
 0x2b1   :  { %v7920_v5 = vadd.f32 %v3350_v24, %v7897_v0  ;;  %v6399_v0 = vor.u32 %v7170_v15, %v6396_v18  ;;  %v7240_v15 = vld [vmem:[#allocation12 + $0x374] sm:$0xf0]  ;;  %v7202_v19 = vld [vmem:[#allocation12 + $0x24c] sm:$0xf] }
 0x2b2   :  { %4392 = vmatpush.bf16.msrb.mxu3 %v6711_v47  ;;  %4431 = vmatpush.bf16.msra.mxu2 %v6587_v34  ;;  %v3482_v20 = vpop.f32.mrf.mxu0  ;;  %v6383_v47 = vor.u32 %v7166_v27, %v6380_v28  ;;  %v6490_v34 = vld [vmem:[#allocation12 + $0x208] sm:$0xf]  ;;  %v7250_v46 = vld [vmem:[#allocation12 + $0x3cc] sm:$0xf] }
 0x2b3   :  { %4470 = vmatpush.bf16.msrb.mxu1 %v6463_v36  ;;  %v7162_v36 = vld [vmem:[#allocation12 + $0x10c] sm:$0xf] }
 0x2b4   :  { %v3443_v14 = vpop.f32.mrf.mxu1  ;;  %v7206_v20 = vld [vmem:[#allocation12 + $0x26c] sm:$0xf] }
 0x2b5   :  { %v6540_v14 = vld [vmem:[#allocation12 + $0x278] sm:$0xf0] }
 0x2b6   :  { %4393 = vmatpush.bf16.msrb.mxu3 %v6695_v49  ;;  %4432 = vmatpush.bf16.msra.mxu2 %v6571_v42  ;;  %v6491_v49 = vor.u32 %v7196_v35, %v6490_v34  ;;  %v6367_v42 = vor.u32 %v7162_v36, %v6364_v37  ;;  %v6543_v55 = vor.u32 %v7206_v20, %v6540_v14  ;;  %v6508_v34 = vld [vmem:[#allocation12 + $0x238] sm:$0xf0]  ;;  %v6618_v37 = vld [vmem:[#allocation12 + $0x308] sm:$0xf] }
 0x2b7   :  { %4471 = vmatpush.bf16.msrb.mxu1 %v6447_v44  ;;  %v6607_v44 = vor.u32 %v7222_v52, %v6604_v16  ;;  %v6492_v52 = vld [vmem:[#allocation12 + $0x218] sm:$0xf0] }
 0x2b8   :  { %v3352_v45 = vpop.f32.mrf.mxu2  ;;  %v6732_v16 = vld [vmem:[#allocation12 + $0x3f8] sm:$0xf0] }
 0x2b9   :  { %v6636_v20 = vld [vmem:[#allocation12 + $0x338] sm:$0xf0] }
 0x2ba   :  { %4394 = vmatpush.bf16.msrb.mxu3 %v6679_v59  ;;  %4433 = vmatpush.bf16.msra.mxu2 %v6555_v60  ;;  %v6591_v59 = vor.u32 %v7218_v50, %v6588_v51  ;;  %v6698_v60 = vld [vmem:[#allocation12 + $0x3a8] sm:$0xf]  ;;  %v7943_v50 = vld [vmem:[#allocation13 + $0x5] ss:$8 sm:$0xf]  ;;  %v6719_v51 = vor.u32 %v7250_v46, %v6716_v48 }
 0x2bb   :  { %4472 = vmatpush.bf16.msrb.mxu1 %v6431_v61  ;;  %v7214_v61 = vld [vmem:[#allocation12 + $0x2ac] sm:$0xf] }
 0x2bc   :  { %v6575_v4 = vor.u32 %v7214_v61, %v6572_v41  ;;  %v7242_v41 = vld [vmem:[#allocation12 + $0x38c] sm:$0xf] }
 0x2be   :  { %4395 = vmatpush.bf16.msrb.mxu3 %v6663_v7  ;;  %4434 = vmatpush.bf16.msra.mxu2 %v6539_v10  ;;  %v7210_v7 = vld [vmem:[#allocation12 + $0x28c] sm:$0xf]  ;;  %v6556_v10 = vld [vmem:[#allocation12 + $0x298] sm:$0xf0] }
 0x2bf   :  { %4473 = vmatpush.bf16.msrb.mxu1 %v6415_v54 }
 0x2c0   :  { %v3402_v6 = vpop.f32.mrf.mxu2 }
 0x2c1   :  { %v7923_v17 = vadd.f32 %v3402_v6, %v7903_v8  ;;  %v6699_v8 = vor.u32 %v7248_v9, %v6698_v60  ;;  %v3652_v60 = vperm.slane %v7943_v50, 0 }
 0x2c2   :  { %4396 = vmatpush.bf16.msrb.mxu3 %v6647_v1  ;;  %4435 = vmatpush.bf16.msra.mxu2 %v6523_v58  ;;  %v6667_v58 = vor.u32 %v7240_v15, %v6666_v53 }
 0x2c3   :  { %4474 = vmatpush.bf16.msrb.mxu1 %v6399_v0  ;;  %v7236_v0 = vld [vmem:[#allocation12 + $0x354] sm:$0xf0] }
 0x2c6   :  { %4397 = vmatpush.bf16.msrb.mxu3 %v6631_v29  ;;  %4436 = vmatpush.bf16.msra.mxu2 %v6507_v31  ;;  %v6651_v29 = vor.u32 %v7236_v0, %v6650_v23  ;;  %v6527_v31 = vor.u32 %v7202_v19, %v6524_v26  ;;  %v6620_v23 = vld [vmem:[#allocation12 + $0x318] sm:$0xf0] }
 0x2c7   :  { %4475 = vmatpush.bf16.msrb.mxu1 %v6383_v47  ;;  %v7198_v47 = vld [vmem:[#allocation12 + $0x22c] sm:$0xf] }
 0x2c8   :  { %v3404_v24 = vpop.f32.mrf.mxu2  ;;  %v6511_v36 = vor.u32 %v7198_v47, %v6508_v34 }
 0x2ca   :  { %4398 = vmatpush.bf16.msrb.mxu3 %v6615_v39  ;;  %4437 = vmatpush.bf16.msra.mxu2 %v6491_v49  ;;  %v3493_v54 = vpop.f32.mrf.mxu1  ;;  %v6619_v49 = vor.u32 %v7228_v22, %v6618_v37 }
 0x2cb   :  { %4476 = vmatpush.bf16.msrb.mxu1 %v6367_v42  ;;  %v7932_v21 = vadd.f32 %v3493_v54, %v3481_v11  ;;  %v6495_v42 = vor.u32 %v7194_v38, %v6492_v52  ;;  %v7234_v11 = vld [vmem:[#allocation12 + $0x34c] sm:$0xf] }
 0x2cd   :  { %4399 = vmatmul.bf16.vlgmr.msrb.gmra.mxu3 %v7907_v33  ;;  %4438 = vmatmul.bf16.vlgmr.msra.gmra.mxu2 %v7890_v30  ;;  %v7930_v12 = vpop.f32.mrf.mxu0 }
 0x2ce   :  { %4443 = vmatpush.bf16.msra.mxu3 %v6731_v43  ;;  %4482 = vmatpush.bf16.msrb.mxu2 %v6607_v44  ;;  %v4310_v3 = vadd.f32 %v7930_v12, %v3652_v60 }
 0x2cf   :  { %4477 = vmatmul.bf16.vlgmr.msrb.gmra.mxu1 %v7875_v2  ;;  %v6559_v2 = vor.u32 %v7210_v7, %v6556_v10  ;;  %v6671_v10 = vor.u32 %v7238_v40, %v6668_v57 }
 0x2d0   :  { %v3363_v18 = vpop.f32.mrf.mxu3 }
 0x2d1   :  { %v7935_v1 = vadd.f32 %v3363_v18, %v7920_v5  ;;  %v6634_v5 = vld [vmem:[#allocation12 + $0x328] sm:$0xf]  ;;  %v7230_v18 = vld [vmem:[#allocation12 + $0x32c] sm:$0xf] }
 0x2d2   :  { %4444 = vmatpush.bf16.msra.mxu3 %v6715_v56  ;;  %4483 = vmatpush.bf16.msrb.mxu2 %v6591_v59  ;;  %v3495_v28 = vpop.f32.mrf.mxu1  ;;  %v6635_v35 = vor.u32 %v7232_v32, %v6634_v5  ;;  %v7246_v56 = vld [vmem:[#allocation12 + $0x3ac] sm:$0xf]  ;;  %v6700_v59 = vld [vmem:[#allocation12 + $0x3b8] sm:$0xf0] }
 0x2d3   :  { %v3454_v25 = vpop.f32.mrf.mxu2  ;;  %v6703_v9 = vor.u32 %v7246_v56, %v6700_v59 }
 0x2d4   :  { %v7938_v27 = vadd.f32 %v3454_v25, %v7917_v62  ;;  %v7254_v62 = vld [vmem:[#allocation12 + $0x3ec] sm:$0xf] }
 0x2d5   :  { %v4311_v45 = vpop.f32.mrf.mxu0  ;;  %v6735_v43 = vor.u32 %v7254_v62, %v6732_v16 }
 0x2d6   :  { %4445 = vmatpush.bf16.msra.mxu3 %v6699_v8  ;;  %4484 = vmatpush.bf16.msrb.mxu2 %v6575_v4 }
 0x2d8   :  { %v3365_v63 = vpop.f32.mrf.mxu3 }
 0x2da   :  { %4446 = vmatpush.bf16.msra.mxu3 %v6683_v13  ;;  %4485 = vmatpush.bf16.msrb.mxu2 %v6559_v2 }
 0x2db   :  { %v3456_v39 = vpop.f32.mrf.mxu2 }
 0x2de   :  { %4447 = vmatpush.bf16.msra.mxu3 %v6667_v58  ;;  %4486 = vmatpush.bf16.msrb.mxu2 %v6543_v55  ;;  %v6639_v58 = vor.u32 %v7230_v18, %v6636_v20  ;;  %v7226_v55 = vld [vmem:[#allocation12 + $0x30c] sm:$0xf] }
 0x2df   :  { %v6623_v26 = vor.u32 %v7226_v55, %v6620_v23  ;;  %v2523_v55 = vld [vmem:[#allocation2 + $0x48] sm:$0xff] }
 0x2e0   :  { %v3415_v44 = vpop.f32.mrf.mxu3 }
 0x2e1   :  { %v7941_v6 = vadd.f32 %v3415_v44, %v7923_v17  ;;  %v6684_v17 = vld [vmem:[#allocation12 + $0x398] sm:$0xf0] }
 0x2e2   :  { %4448 = vmatpush.bf16.msra.mxu3 %v6651_v29  ;;  %4487 = vmatpush.bf16.msrb.mxu2 %v6527_v31  ;;  %v6687_v8 = vor.u32 %v7242_v41, %v6684_v17  ;;  %v2522_v41 = vld [vmem:[#allocation2 + $0x40] sm:$0xff] }
 0x2e6   :  { %4449 = vmatpush.bf16.msra.mxu3 %v6635_v35  ;;  %4488 = vmatpush.bf16.msrb.mxu2 %v6511_v36  ;;  %v3654_v36 = vperm.slane %v7943_v50, 2 }
 0x2e8   :  { %v3417_v61 = vpop.f32.mrf.mxu3 }
 0x2ea   :  { %4450 = vmatpush.bf16.msra.mxu3 %v6619_v49  ;;  %4489 = vmatpush.bf16.msrb.mxu2 %v6495_v42 }
 0x2ed   :  { %4451 = vmatmul.bf16.vlgmr.msra.gmra.mxu3 %v7907_v33  ;;  %4490 = vmatmul.bf16.vlgmr.msrb.gmra.mxu2 %v7890_v30  ;;  %v4322_v4 = vpop.f32.mrf.mxu1  ;;  %v4361_v7 = vpop.f32.mrf.mxu0  ;;  %v6652_v30 = vld [vmem:[#allocation12 + $0x358] sm:$0xf0] }
 0x2ee   :  { %4495 = vmatpush.bf16.msrb.mxu3 %v6735_v43  ;;  %v4323_v24 = vadd.f32 %v4322_v4, %v4310_v3  ;;  %v6655_v53 = vor.u32 %v7234_v11, %v6652_v30 }
 0x2f0   :  { %v3506_v54 = vpop.f32.mrf.mxu2  ;;  %v3467_v2 = vpop.f32.mrf.mxu3 }
 0x2f1   :  { %v3507_v13 = vadd.f32 %v3506_v54, %v7932_v21  ;;  %v7951_v15 = vadd.f32 %v3467_v2, %v7938_v27  ;;  %v3653_v21 = vperm.slane %v7943_v50, 1 }
 0x2f2   :  { %4496 = vmatpush.bf16.msrb.mxu3 %v6719_v51 }
 0x2f3   :  { %v4362_v25 = vadd.f32 %v4361_v7, %v3653_v21 }
 0x2f5   :  { %v4324_v12 = vpop.f32.mrf.mxu1  ;;  %v4363_v14 = vpop.f32.mrf.mxu0 }
 0x2f6   :  { %4497 = vmatpush.bf16.msrb.mxu3 %v6703_v9 }
 0x2f8   :  { %v3508_v0 = vpop.f32.mrf.mxu2  ;;  %v3469_v19 = vpop.f32.mrf.mxu3 }
 0x2fa   :  { %4498 = vmatpush.bf16.msrb.mxu3 %v6687_v8 }
 0x2fe   :  { %4499 = vmatpush.bf16.msrb.mxu3 %v6671_v10 }
 0x302   :  { %4500 = vmatpush.bf16.msrb.mxu3 %v6655_v53 }
 0x306   :  { %4501 = vmatpush.bf16.msrb.mxu3 %v6639_v58 }
 0x30a   :  { %4502 = vmatpush.bf16.msrb.mxu3 %v6623_v26  ;;  %v7966_v26 = vld [vmem:[%s8009_s10] ss:$2 sm:$0xf] }
 0x30d   :  { %4503 = vmatmul.bf16.vlgmr.msrb.gmra.mxu3 %v7907_v33  ;;  %v4374_v27 = vpop.f32.mrf.mxu1  ;;  %v4413_v28 = vpop.f32.mrf.mxu0 }
 0x30e   :  { %v4375_v45 = vadd.f32 %v4374_v27, %v4362_v25  ;;  %v4414_v37 = vadd.f32 %v4413_v28, %v3654_v36  ;;  %v7972_v28 = vld [vmem:[%s8009_s10 + $0x1] ss:$2 sm:$0xf] }
 0x30f   :  { %v4602_v36 = vperm.slane %v7972_v28, 1 }
 0x310   :  { %v3519_v29 = vpop.f32.mrf.mxu3  ;;  %v4335_v31 = vpop.f32.mrf.mxu2 }
 0x311   :  { %v7955_v5 = vadd.f32 %v3519_v29, %v3507_v13  ;;  %v4336_v32 = vadd.f32 %v4335_v31, %v4323_v24  ;;  %v4576_v31 = vperm.slane %v7966_v26, 0 }
 0x315   :  { %v4376_v63 = vpop.f32.mrf.mxu1  ;;  %v4415_v47 = vpop.f32.mrf.mxu0 }
 0x318   :  { %v3521_v34 = vpop.f32.mrf.mxu3  ;;  %v4337_v35 = vpop.f32.mrf.mxu2 }
 0x319   :  { %v4601_v35 = vperm.slane %v7972_v28, 0 }
 0x32c   :  { %v7958_v38 = vpop.f32.mrf.mxu0 }
 0x32d   :  { %v4426_v22 = vpop.f32.mrf.mxu1 }
 0x32e   :  { %v4427_v33 = vadd.f32 %v4426_v22, %v4414_v37 }
 0x330   :  { %v4348_v52 = vpop.f32.mrf.mxu3  ;;  %v4387_v16 = vpop.f32.mrf.mxu2 }
 0x331   :  { %v4349_v62 = vadd.f32 %v4348_v52, %v4336_v32  ;;  %v4388_v39 = vadd.f32 %v4387_v16, %v4375_v45  ;;  %v4577_v45 = vperm.slane %v7966_v26, 1 }
 0x333   :  { %v4508_v49 = vadd.f32 1e-16, %v4349_v62 }
 0x334   :  { %v4467_v43 = vpop.f32.mrf.mxu0 }
 0x335   :  { %v4428_v42 = vpop.f32.mrf.mxu1  ;;  %7285 = vrsqrt.f32 %v4508_v49  ;;  %vm4519_vm2 = vcmp.eq.f32.partialorder %v4508_v49, inf  ;;  %v4522_v17 = vand.u32 2147483648, %v4508_v49  ;;  %vm4521_vm3 = vcmp.eq.f32.partialorder %v4508_v49, 0.0 }
 0x338   :  { %v4350_v44 = vpop.f32.mrf.mxu3  ;;  %v4389_v46 = vpop.f32.mrf.mxu2 }
 0x33b   :  { %v7286_v48 = vpop.eup %7285 }
 0x33c   :  { %v4513_v51 = vmul.f32 %v7286_v48, %v4508_v49 }
 0x33e   :  { %v4514_v56 = vmul.f32 %v7286_v48, %v4513_v51 }
 0x340   :  { %v4515_v59 = vmul.f32 0.5, %v4514_v56  ;;  %v3655_v56 = vperm.slane %v7943_v50, 3 }
 0x342   :  { %v4516_v60 = vsub.f32 1.5, %v4515_v59 }
 0x344   :  { %v4517_v9 = vmul.f32 %v7286_v48, %v4516_v60 }
 0x346   :  { %v4518_v61 = vmul.f32 %v4517_v9, %v4508_v49  ;;  %v2524_v9 = vld [vmem:[#allocation2 + $0x50] sm:$0xff] }
 0x348   :  { %v4520_v3 = vsel %vm4519_vm2, %v4508_v49, %v4518_v61 }
 0x349   :  { %v4523_v4 = vsel %vm4521_vm3, %v4522_v17, %v4520_v3 }
 0x34a   :  { %v4560_v40 = vmul.f32 %v4523_v4, %v2522_v41  ;;  %v4466_v41 = vadd.f32 %v7958_v38, %v3655_v56 }
 0x34c   :  { %v7960_v8 = vpop.f32.mrf.mxu1  ;;  %v4564_v57 = vadd.f32 %v4560_v40, %v7935_v1 }
 0x34d   :  { %v4479_v4 = vadd.f32 %v7960_v8, %v4466_v41 }
 0x34e   :  { %v4568_v21 = vmax.f32 %v4564_v57, 0.0 }
 0x350   :  { %v4400_v24 = vpop.f32.mrf.mxu3  ;;  %v4439_v7 = vpop.f32.mrf.mxu2  ;;  %v4596_v34 = vmul.f32 %v4568_v21, %v4568_v21 }
 0x351   :  { %v4401_v10 = vadd.f32 %v4400_v24, %v4388_v39  ;;  %v4440_v25 = vadd.f32 %v4439_v7, %v4427_v33  ;;  %v4584_v33 = vmul.f32 %v4576_v31, %v4568_v21  ;;  %v4578_v7 = vperm.slane %v7966_v26, 2 }
 0x352   :  { %v4609_v52 = vmul.f32 %v4601_v35, %v4596_v34  ;;  %v4604_v31 = vperm.slane %v7972_v28, 3 }
 0x353   :  { %v4509_v11 = vadd.f32 1e-16, %v4401_v10 }
 0x354   :  { %v4480_v30 = vpop.f32.mrf.mxu1 }
 0x355   :  { %7287 = vrsqrt.f32 %v4509_v11  ;;  %vm4531_vm4 = vcmp.eq.f32.partialorder %v4509_v11, inf  ;;  %v4534_v23 = vand.u32 2147483648, %v4509_v11  ;;  %vm4533_vm5 = vcmp.eq.f32.partialorder %v4509_v11, 0.0 }
 0x356   :  { %v4603_v30 = vperm.slane %v7972_v28, 2 }
 0x358   :  { %v4402_v54 = vpop.f32.mrf.mxu3  ;;  %v4441_v13 = vpop.f32.mrf.mxu2 }
 0x35b   :  { %v7288_v2 = vpop.eup %7287 }
 0x35c   :  { %v4525_v53 = vmul.f32 %v7288_v2, %v4509_v11 }
 0x35e   :  { %v4526_v12 = vmul.f32 %v7288_v2, %v4525_v53 }
 0x360   :  { %v4527_v18 = vmul.f32 0.5, %v4526_v12 }
 0x362   :  { %v4528_v20 = vsub.f32 1.5, %v4527_v18 }
 0x364   :  { %v4529_v14 = vmul.f32 %v7288_v2, %v4528_v20 }
 0x366   :  { %v4530_v58 = vmul.f32 %v4529_v14, %v4509_v11 }
 0x368   :  { %v4532_v0 = vsel %vm4531_vm4, %v4509_v11, %v4530_v58 }
 0x369   :  { %v4535_v1 = vsel %vm4533_vm5, %v4534_v23, %v4532_v0  ;;  %v2525_v0 = vld [vmem:[#allocation2 + $0x58] sm:$0xff] }
 0x36a   :  { %v4561_v19 = vmul.f32 %v4535_v1, %v2523_v55 }
 0x36c   :  { %v4565_v27 = vadd.f32 %v4561_v19, %v7941_v6 }
 0x36e   :  { %v4569_v47 = vmax.f32 %v4565_v27, 0.0 }
 0x370   :  { %v4452_v29 = vpop.f32.mrf.mxu3  ;;  %v4491_v63 = vpop.f32.mrf.mxu2  ;;  %v4597_v6 = vmul.f32 %v4569_v47, %v4569_v47  ;;  %v4585_v22 = vmul.f32 %v4577_v45, %v4569_v47  ;;  %v4579_v45 = vperm.slane %v7966_v26, 3 }
 0x371   :  { %v4453_v32 = vadd.f32 %v4452_v29, %v4440_v25  ;;  %v4492_v57 = vadd.f32 %v4491_v63, %v4479_v4 }
 0x372   :  { %v4610_v62 = vmul.f32 %v4602_v36, %v4597_v6  ;;  %v4588_v16 = vadd.f32 %v4585_v22, %v4584_v33  ;;  %v7267_v36 = vld [vmem:[%s8010_s11 + $0x1] ss:$0 sm:$0xff] }
 0x373   :  { %v4510_v37 = vadd.f32 1e-16, %v4453_v32 }
 0x374   :  { %v4613_v49 = vadd.f32 %v4610_v62, %v4609_v52 }
 0x375   :  { %7289 = vrsqrt.f32 %v4510_v37  ;;  %vm4543_vm6 = vcmp.eq.f32.partialorder %v4510_v37, inf  ;;  %v4546_v61 = vand.u32 2147483648, %v4510_v37  ;;  %vm4545_vm7 = vcmp.eq.f32.partialorder %v4510_v37, 0.0 }
 0x378   :  { %v4454_v39 = vpop.f32.mrf.mxu3  ;;  %v4493_v42 = vpop.f32.mrf.mxu2 }
 0x37b   :  { %v7290_v43 = vpop.eup %7289 }
 0x37c   :  { %v4537_v44 = vmul.f32 %v7290_v43, %v4510_v37 }
 0x37e   :  { %v4538_v46 = vmul.f32 %v7290_v43, %v4537_v44 }
 0x380   :  { %v4539_v48 = vmul.f32 0.5, %v4538_v46 }
 0x382   :  { %v4540_v51 = vsub.f32 1.5, %v4539_v48 }
 0x384   :  { %v4541_v59 = vmul.f32 %v7290_v43, %v4540_v51 }
 0x386   :  { %v4542_v60 = vmul.f32 %v4541_v59, %v4510_v37 }
 0x388   :  { %v4544_v17 = vsel %vm4543_vm6, %v4510_v37, %v4542_v60 }
 0x389   :  { %v4547_v3 = vsel %vm4545_vm7, %v4546_v61, %v4544_v17 }
 0x38a   :  { %v4562_v40 = vmul.f32 %v4547_v3, %v2524_v9 }
 0x38c   :  { %v4566_v24 = vadd.f32 %v4562_v40, %v7951_v15 }
 0x38e   :  { %v4570_v11 = vmax.f32 %v4566_v24, 0.0 }
 0x390   :  { %v4504_v10 = vpop.f32.mrf.mxu3  ;;  %v4598_v13 = vmul.f32 %v4570_v11, %v4570_v11  ;;  %v4586_v2 = vmul.f32 %v4578_v7, %v4570_v11 }
 0x391   :  { %v4505_v50 = vadd.f32 %v4504_v10, %v4492_v57 }
 0x392   :  { %v4611_v38 = vmul.f32 %v4603_v30, %v4598_v13  ;;  %v4589_v53 = vadd.f32 %v4588_v16, %v4586_v2  ;;  %v7268_v16 = vld [vmem:[%s8010_s11] ss:$0 sm:$0xff] }
 0x393   :  { %v4511_v54 = vadd.f32 1e-16, %v4505_v50 }
 0x394   :  { %v4614_v18 = vadd.f32 %v4613_v49, %v4611_v38  ;;  %v4622_v49 = vld [vmem:[%s8001_s2] sm:$0xff] }
 0x395   :  { %7291 = vrsqrt.f32 %v4511_v54  ;;  %vm4555_vm8 = vcmp.eq.f32.partialorder %v4511_v54, inf  ;;  %v4558_v1 = vand.u32 2147483648, %v4511_v54  ;;  %vm4557_vm9 = vcmp.eq.f32.partialorder %v4511_v54, 0.0 }
 0x398   :  { %v4506_v12 = vpop.f32.mrf.mxu3 }
 0x39b   :  { %v7292_v8 = vpop.eup %7291 }
 0x39c   :  { %v4549_v20 = vmul.f32 %v7292_v8, %v4511_v54 }
 0x39e   :  { %v4550_v14 = vmul.f32 %v7292_v8, %v4549_v20 }
 0x3a0   :  { %v4551_v58 = vmul.f32 0.5, %v4550_v14 }
 0x3a2   :  { %v4552_v15 = vsub.f32 1.5, %v4551_v58 }
 0x3a4   :  { %v4553_v55 = vmul.f32 %v7292_v8, %v4552_v15 }
 0x3a6   :  { %v4554_v23 = vmul.f32 %v4553_v55, %v4511_v54 }
 0x3a8   :  { %v4556_v19 = vsel %vm4555_vm8, %v4511_v54, %v4554_v23 }
 0x3a9   :  { %v4559_v21 = vsel %vm4557_vm9, %v4558_v1, %v4556_v19 }
 0x3aa   :  { %v4563_v25 = vmul.f32 %v4559_v21, %v2525_v0 }
 0x3ac   :  { %v4567_v27 = vadd.f32 %v4563_v25, %v7955_v5 }
 0x3ae   :  { %v4571_v29 = vmax.f32 %v4567_v27, 0.0 }
 0x3b0   :  { %v4599_v32 = vmul.f32 %v4571_v29, %v4571_v29  ;;  %v4587_v63 = vmul.f32 %v4579_v45, %v4571_v29 }
 0x3b2   :  { %v4612_v47 = vmul.f32 %v4604_v31, %v4599_v32  ;;  %v4590_v34 = vadd.f32 %v4589_v53, %v4587_v63 }
 0x3b4   :  { %v4615_v35 = vadd.f32 %v4614_v18, %v4612_v47 }
 0x3b6   :  { %4616 = vadd.xlane.f32.xlu0 %v4615_v35 }
 0x3be   :  { %4591 = vadd.xlane.f32.xlu0 %v4590_v34 }
 0x429   :  { %v4617_v37 = vpop.xlane.xlu0 %4616 }
 0x42a   :  { %v4620_v6 = vadd.f32 %v7267_v36, %v4617_v37 }
 0x42c   :  { %v4621_v22 = vadd.f32 1e-16, %v4620_v6 }
 0x42e   :  { %7293 = vrsqrt.f32 %v4621_v22  ;;  %vm4630_vm10 = vcmp.eq.f32.partialorder %v4621_v22, inf  ;;  %v4633_v42 = vand.u32 2147483648, %v4621_v22  ;;  %vm4632_vm11 = vcmp.eq.f32.partialorder %v4621_v22, 0.0 }
 0x431   :  { %v4592_v43 = vpop.xlane.xlu0 %4591 }
 0x432   :  { %v4595_v51 = vadd.f32 %v7268_v16, %v4592_v43 }
 0x434   :  { %v7294_v5 = vpop.eup %7293 }
 0x435   :  { %v4624_v26 = vmul.f32 %v7294_v5, %v4621_v22 }
 0x437   :  { %v4625_v33 = vmul.f32 %v7294_v5, %v4624_v26 }
 0x439   :  { %v4626_v52 = vmul.f32 0.5, %v4625_v33 }
 0x43b   :  { %v4627_v28 = vsub.f32 1.5, %v4626_v52 }
 0x43d   :  { %v4628_v62 = vmul.f32 %v7294_v5, %v4627_v28 }
 0x43f   :  { %v4629_v39 = vmul.f32 %v4628_v62, %v4621_v22 }
 0x441   :  { %v4631_v44 = vsel %vm4630_vm10, %v4621_v22, %v4629_v39 }
 0x442   :  { %v4634_v46 = vsel %vm4632_vm11, %v4633_v42, %v4631_v44 }
 0x443   :  { %v4635_v48 = vmul.f32 %v4634_v46, %v4622_v49 }
 0x445   :  { %v4636_v56 = vadd.f32 %v4635_v48, %v4595_v51 }
 0x447   :  { %4638 = vst.msk [vmem:[%s8011_s12] sm:$0xff] %vm4637_vm12, %v4636_v56 }
 0x448   :  { %4643 = vsyncpa [#allocation3], 1 }
 0x449   :  { %4644 = vsyncpa [#allocation5], 1 }
 0x44a   :  { %4645 = vsyncpa [#allocation8], 1 }
 0x44b   :  { %4646 = vsyncpa [#allocation11], 1 }
 0x44c   :  { %4647 = vsyncpa [#allocation14], 1 }

</bundles_post_ra>
